<compile_context>
chip_gen: v7x
topology: tpu7x:2x2x1
jax: 0.10.0
libtpu: 0.0.40
codegen_flags: <defaults>
</compile_context>

<pallas_src>
import jax
import jax.numpy as jnp
from jax import lax
from jax.experimental import pallas as pl
from jax.experimental.pallas import tpu as pltpu

LANE = 128
_VMEM_LIMIT = 48 * 1024 * 1024  # safe on v7x (64 MiB/TC) and v5e/v6e (128 MiB)


def _round_up(x, m):
    return (x + m - 1) // m * m


# --------------------- 1x1 conv + folded BN + LeakyReLU ---------------------

def _mm_bn_leaky_kernel(x_ref, w_ref, b_ref, o_ref):
    # x_ref: (TR, K) bf16, w_ref: (K, TN) bf16 (BN scale folded), b_ref: (1, TN) f32
    acc = jnp.dot(x_ref[...], w_ref[...], preferred_element_type=jnp.float32)
    y = acc + b_ref[...]          # BatchNorm2d (inference, folded affine)
    y = jnp.maximum(y, 0.1 * y)   # LeakyReLU(negative_slope=0.1)
    o_ref[...] = y.astype(o_ref.dtype)


def _conv1x1_bn_leaky(x2d, w_mat, b_mat):
    """(R, K) @ (K, Cp) + bias, LeakyReLU.  K, Cp multiples of 128. bf16 out."""
    R, K = x2d.shape
    Kw, Cp = w_mat.shape
    assert K == Kw and K % LANE == 0 and Cp % LANE == 0

    tn = 256 if Cp % 256 == 0 else 128
    Rp = _round_up(R, 8)
    if Rp > 1024:                      # large problems: fixed 512-row tiles
        tr = 512
        Rp = _round_up(R, tr)
    else:                              # small problems: one tile, no waste
        tr = Rp
    if Rp != R:
        x2d = jnp.pad(x2d, ((0, Rp - R), (0, 0)))

    out = pl.pallas_call(
        _mm_bn_leaky_kernel,
        out_shape=jax.ShapeDtypeStruct((Rp, Cp), jnp.bfloat16),
        # Cout tiles on the OUTER axis -> weight block index constant across the
        # inner row loop (fetched once per Cout tile, not per grid step).
        grid=(Cp // tn, Rp // tr),
        in_specs=[
            pl.BlockSpec((tr, K), lambda j, i: (i, 0)),
            pl.BlockSpec((K, tn), lambda j, i: (0, j)),
            pl.BlockSpec((1, tn), lambda j, i: (0, j)),
        ],
        out_specs=pl.BlockSpec((tr, tn), lambda j, i: (i, j)),
        compiler_params=pltpu.CompilerParams(
            dimension_semantics=("parallel", "parallel"),
            vmem_limit_bytes=_VMEM_LIMIT),
    )(x2d, w_mat, b_mat)
    return out[:R] if Rp != R else out


# --------------------- 3x3 conv + folded BN + LeakyReLU ---------------------

def _conv3x3_kernel(xp_ref, w_ref, b_ref, o_ref):
    # xp_ref: (1, H+2, W+2, Cin) bf16 spatially padded image (halo block)
    # w_ref : (9*Cin, TN) bf16  (tap-major rows, BN scale folded)
    # b_ref : (1, TN) f32
    # o_ref : (1, H, W, TN) bf16
    _, H, W, TN = o_ref.shape
    cin = xp_ref.shape[3]
    acc = jnp.zeros((H * W, TN), jnp.float32)
    for t in range(9):                 # 9 shifted MXU contractions, no im2col
        di, dj = t // 3, t % 3
        xt = xp_ref[0, di:di + H, dj:dj + W, :].reshape(H * W, cin)
        acc = acc + jnp.dot(xt, w_ref[t * cin:(t + 1) * cin, :],
                            preferred_element_type=jnp.float32)
    y = acc + b_ref[...]
    y = jnp.maximum(y, 0.1 * y)
    o_ref[...] = y.reshape(1, H, W, TN).astype(o_ref.dtype)


def _conv3x3_bn_leaky(x_nhwc, w_mat, b_mat):
    """x: (N, H, W, Cin_p) bf16; w_mat: (9*Cin_p, Cout_p) bf16; b_mat: (1, Cout_p) f32."""
    N, H, W, Cin_p = x_nhwc.shape
    K, Cout_p = w_mat.shape
    assert K == 9 * Cin_p and Cout_p % LANE == 0

    # Only the 1-pixel spatial halo is materialized (1.08x copy), not 9 taps.
    xp = jnp.pad(x_nhwc, ((0, 0), (1, 1), (1, 1), (0, 0)))
    tn = 256 if Cout_p % 256 == 0 else 128

    return pl.pallas_call(
        _conv3x3_kernel,
        out_shape=jax.ShapeDtypeStruct((N, H, W, Cout_p), jnp.bfloat16),
        grid=(Cout_p // tn, N),        # weight block constant across inner n loop
        in_specs=[
            pl.BlockSpec((1, H + 2, W + 2, Cin_p), lambda j, n: (n, 0, 0, 0)),
            pl.BlockSpec((K, tn), lambda j, n: (0, j)),
            pl.BlockSpec((1, tn), lambda j, n: (0, j)),
        ],
        out_specs=pl.BlockSpec((1, H, W, tn), lambda j, n: (n, 0, 0, j)),
        compiler_params=pltpu.CompilerParams(
            dimension_semantics=("parallel", "parallel"),
            vmem_limit_bytes=_VMEM_LIMIT),
    )(xp, w_mat, b_mat)


# ------------------------------ layer wrapper -------------------------------

def _conv_bn_leaky(x, w_oihw, gamma, beta, mean, var, eps=1e-5):
    """One ConvolutionalLayer.  x: (N, H, W, Cin_p) bf16, channels padded to 128k."""
    N, H, W, Cin_p = x.shape
    Cout, Cin, kh, kw = w_oihw.shape
    assert kh == kw and kh in (1, 3)
    assert Cin_p == _round_up(Cin, LANE)
    Cout_p = _round_up(Cout, LANE)

    scale = (gamma / jnp.sqrt(var + eps)).astype(jnp.float32)
    bias = (beta - mean * scale).astype(jnp.float32)

    # HWIO weights with BN scale folded along Cout; zero-pad both channel dims;
    # bf16 operands for the MXU (accumulation stays f32 in-kernel).
    w_hwio = jnp.transpose(w_oihw, (2, 3, 1, 0)).astype(jnp.float32) * scale
    w_hwio = jnp.pad(w_hwio, ((0, 0), (0, 0), (0, Cin_p - Cin), (0, Cout_p - Cout)))
    w_mat = w_hwio.reshape(kh * kw * Cin_p, Cout_p).astype(jnp.bfloat16)
    b_mat = jnp.pad(bias, (0, Cout_p - Cout)).reshape(1, Cout_p)   # stays f32

    if kh == 1:
        y2d = _conv1x1_bn_leaky(x.reshape(N * H * W, Cin_p), w_mat, b_mat)
        return y2d.reshape(N, H, W, Cout_p)
    return _conv3x3_bn_leaky(x, w_mat, b_mat)


def convolutional_set(x_nchw, params, eps=1e-5):
    """params: list of 5 tuples (w_oihw, gamma, beta, running_mean, running_var)."""
    N, Cin, H, W = x_nchw.shape
    Cin_p = _round_up(Cin, LANE)
    x = jnp.transpose(x_nchw, (0, 2, 3, 1))                              # NHWC
    x = jnp.pad(x, ((0, 0), (0, 0), (0, 0), (0, Cin_p - Cin))).astype(jnp.bfloat16)
    for (w, g, b, m, v) in params:
        x = _conv_bn_leaky(x, w, g, b, m, v, eps=eps)
    Cout = params[-1][0].shape[0]
    x = x[..., :Cout].astype(jnp.float32)                                # drop channel pad
    return jnp.transpose(x, (0, 3, 1, 2))                                # back to NCHW


# ----------------------------- reference & test -----------------------------

def _reference(x_nchw, params, eps=1e-5):
    x = jnp.transpose(x_nchw, (0, 2, 3, 1))
    for (w, g, b, m, v) in params:
        k = w.shape[2]
        p = (k - 1) // 2
        y = lax.conv_general_dilated(
            x, jnp.transpose(w, (2, 3, 1, 0)),
            window_strides=(1, 1), padding=((p, p), (p, p)),
            dimension_numbers=("NHWC", "HWIO", "NHWC"),
            precision=lax.Precision.HIGHEST)
        scale = g / jnp.sqrt(v + eps)
        y = y * scale + (b - m * scale)
        x = jnp.where(y > 0, y, 0.1 * y)
    return jnp.transpose(x, (0, 3, 1, 2))


def _make_layer_params(key, cin, cout, k):
    kw_, kg, kb, km, kv = jax.random.split(key, 5)
    w = jax.random.normal(kw_, (cout, cin, k, k), jnp.float32) / jnp.sqrt(cin * k * k)
    gamma = 1.0 + 0.1 * jax.random.normal(kg, (cout,), jnp.float32)
    beta = 0.1 * jax.random.normal(kb, (cout,), jnp.float32)
    mean = 0.05 * jax.random.normal(km, (cout,), jnp.float32)
    var = 1.0 + 0.1 * jax.random.uniform(kv, (cout,), jnp.float32)
    return (w, gamma, beta, mean, var)


if __name__ == "__main__":
    N, IN_C, OUT_C, H, W = 2, 4, 8, 16, 16

    key = jax.random.PRNGKey(0)
    kx, *lkeys = jax.random.split(key, 6)

    # PyTorch input layout is NCHW.
    x = jax.random.normal(kx, (N, IN_C, H, W), jnp.float32)

    # ConvolutionalSet(in_channels=4, out_channels=8):
    #   1x1 4->8, 3x3 8->4, 1x1 4->8, 3x3 8->4, 1x1 4->8
    layer_defs = [(IN_C, OUT_C, 1), (OUT_C, IN_C, 3), (IN_C, OUT_C, 1),
                  (OUT_C, IN_C, 3), (IN_C, OUT_C, 1)]
    params = [_make_layer_params(k, ci, co, ks)
              for k, (ci, co, ks) in zip(lkeys, layer_defs)]

    out = jax.jit(convolutional_set)(x, params)
    out = jax.block_until_ready(out)

    ref = _reference(x, params)
    assert out.shape == (N, OUT_C, H, W), out.shape

    # bf16 operands / f32 accumulation through a 5-layer chain: use a
    # bf16-appropriate tolerance against the f32 reference.
    max_err = float(jnp.max(jnp.abs(out - ref)))
    rel_err = float(jnp.linalg.norm(out - ref) / (jnp.linalg.norm(ref) + 1e-12))
    assert max_err < 3e-1, ("max_abs_err", max_err)
    assert rel_err < 3e-2, ("rel_err", rel_err)

    print("KERNEL_OK")
</pallas_src>

<mosaic_0001>
module attributes {stable_mosaic.version = 11 : i64} {
  func.func @_mm_bn_leaky_kernel(%arg0: i32, %arg1: i32, %arg2: memref<512x128xbf16, #tpu.memory_space<vmem>>, %arg3: memref<128x128xbf16, #tpu.memory_space<vmem>>, %arg4: memref<1x128xf32, #tpu.memory_space<vmem>>, %arg5: memref<512x128xbf16, #tpu.memory_space<vmem>>) attributes {dimension_semantics = [#tpu.dimension_semantics<parallel>, #tpu.dimension_semantics<parallel>], iteration_bounds = array<i64: 1, 1>, scalar_prefetch = 0 : i64, scratch_operands = 0 : i64, tpu.core_type = #tpu.core_type<tc>, window_params = [{transform_indices = @transform_0, window_bounds = array<i64: 512, 128>}, {transform_indices = @transform_1, window_bounds = array<i64: 128, 128>}, {transform_indices = @transform_2, window_bounds = array<i64: 1, 128>}, {transform_indices = @transform_3, window_bounds = array<i64: 512, 128>}]} {
    %c0 = arith.constant 0 : index
    %c0_0 = arith.constant 0 : index
    %0 = vector.load %arg2[%c0, %c0_0] : memref<512x128xbf16, #tpu.memory_space<vmem>>, vector<512x128xbf16>
    %c0_1 = arith.constant 0 : index
    %c0_2 = arith.constant 0 : index
    %1 = vector.load %arg3[%c0_1, %c0_2] : memref<128x128xbf16, #tpu.memory_space<vmem>>, vector<128x128xbf16>
    %cst = arith.constant dense<0.000000e+00> : vector<512x128xf32>
    %2 = tpu.matmul %0, %1, %cst {dimension_numbers = #tpu.dot_dimension_numbers<[1], [0], [0], [1], [0, 0, 1, 1], [], []>} : vector<512x128xbf16>, vector<128x128xbf16>, vector<512x128xf32> -> vector<512x128xf32>
    %c0_3 = arith.constant 0 : index
    %c0_4 = arith.constant 0 : index
    %3 = vector.load %arg4[%c0_3, %c0_4] : memref<1x128xf32, #tpu.memory_space<vmem>>, vector<1x128xf32>
    %4 = vector.broadcast %3 : vector<1x128xf32> to vector<512x128xf32>
    %5 = arith.addf %2, %4 : vector<512x128xf32>
    %cst_5 = arith.constant 1.000000e-01 : f32
    %6 = vector.broadcast %cst_5 : f32 to vector<512x128xf32>
    %7 = arith.mulf %6, %5 : vector<512x128xf32>
    %8 = arith.maximumf %5, %7 : vector<512x128xf32>
    %9 = arith.truncf %8 : vector<512x128xf32> to vector<512x128xbf16>
    %c0_6 = arith.constant 0 : index
    %c0_7 = arith.constant 0 : index
    %10 = vector.load %arg5[%c0_6, %c0_7] : memref<512x128xbf16, #tpu.memory_space<vmem>>, vector<512x128xbf16>
    tpu.vector_store %arg5[%c0_6, %c0_7], %9 {strides = array<i32>} : memref<512x128xbf16, #tpu.memory_space<vmem>>, vector<512x128xbf16>,
    return
  }
  func.func @transform_0(%arg0: i32, %arg1: i32) -> (i32, i32) {
    %c0_i32 = arith.constant 0 : i32
    %c0_i32_0 = arith.constant 0 : i32
    return %arg1, %c0_i32 : i32, i32
  }
  func.func @transform_1(%arg0: i32, %arg1: i32) -> (i32, i32) {
    %c0_i32 = arith.constant 0 : i32
    %c0_i32_0 = arith.constant 0 : i32
    return %c0_i32, %arg0 : i32, i32
  }
  func.func @transform_2(%arg0: i32, %arg1: i32) -> (i32, i32) {
    %c0_i32 = arith.constant 0 : i32
    %c0_i32_0 = arith.constant 0 : i32
    return %c0_i32, %arg0 : i32, i32
  }
  func.func @transform_3(%arg0: i32, %arg1: i32) -> (i32, i32) {
    %c0_i32 = arith.constant 0 : i32
    return %arg1, %arg0 : i32, i32
  }
}

module attributes {stable_mosaic.version = 11 : i64} {
  func.func @_conv3x3_kernel(%arg0: i32, %arg1: i32, %arg2: memref<1x18x18x128xbf16, #tpu.memory_space<vmem>>, %arg3: memref<1152x128xbf16, #tpu.memory_space<vmem>>, %arg4: memref<1x128xf32, #tpu.memory_space<vmem>>, %arg5: memref<1x16x16x128xbf16, #tpu.memory_space<vmem>>) attributes {dimension_semantics = [#tpu.dimension_semantics<parallel>, #tpu.dimension_semantics<parallel>], iteration_bounds = array<i64: 1, 2>, scalar_prefetch = 0 : i64, scratch_operands = 0 : i64, tpu.core_type = #tpu.core_type<tc>, window_params = [{transform_indices = @transform_0, window_bounds = array<i64: 1, 18, 18, 128>}, {transform_indices = @transform_1, window_bounds = array<i64: 1152, 128>}, {transform_indices = @transform_2, window_bounds = array<i64: 1, 128>}, {transform_indices = @transform_3, window_bounds = array<i64: 1, 16, 16, 128>}]} {
    %cst = arith.constant 0.000000e+00 : f32
    %0 = vector.broadcast %cst : f32 to vector<256x128xf32>
    %c0 = arith.constant 0 : index
    %c0_0 = arith.constant 0 : index
    %c0_1 = arith.constant 0 : index
    %c0_2 = arith.constant 0 : index
    %1 = vector.load %arg2[%c0, %c0_0, %c0_1, %c0_2] : memref<1x18x18x128xbf16, #tpu.memory_space<vmem>>, vector<1x16x16x128xbf16>
    %2 = vector.shape_cast %1 : vector<1x16x16x128xbf16> to vector<16x16x128xbf16>
    %3 = vector.shape_cast %2 : vector<16x16x128xbf16> to vector<256x128xbf16>
    %c0_3 = arith.constant 0 : index
    %c0_4 = arith.constant 0 : index
    %4 = vector.load %arg3[%c0_3, %c0_4] : memref<1152x128xbf16, #tpu.memory_space<vmem>>, vector<128x128xbf16>
    %cst_5 = arith.constant dense<0.000000e+00> : vector<256x128xf32>
    %5 = tpu.matmul %3, %4, %cst_5 {dimension_numbers = #tpu.dot_dimension_numbers<[1], [0], [0], [1], [0, 0, 1, 1], [], []>} : vector<256x128xbf16>, vector<128x128xbf16>, vector<256x128xf32> -> vector<256x128xf32>
    %6 = arith.addf %0, %5 : vector<256x128xf32>
    %c0_6 = arith.constant 0 : index
    %c0_7 = arith.constant 0 : index
    %c1 = arith.constant 1 : index
    %c0_8 = arith.constant 0 : index
    %7 = vector.load %arg2[%c0_6, %c0_7, %c1, %c0_8] : memref<1x18x18x128xbf16, #tpu.memory_space<vmem>>, vector<1x16x16x128xbf16>
    %8 = vector.shape_cast %7 : vector<1x16x16x128xbf16> to vector<16x16x128xbf16>
    %9 = vector.shape_cast %8 : vector<16x16x128xbf16> to vector<256x128xbf16>
    %c128 = arith.constant 128 : index
    %c0_9 = arith.constant 0 : index
    %10 = vector.load %arg3[%c128, %c0_9] : memref<1152x128xbf16, #tpu.memory_space<vmem>>, vector<128x128xbf16>
    %cst_10 = arith.constant dense<0.000000e+00> : vector<256x128xf32>
    %11 = tpu.matmul %9, %10, %cst_10 {dimension_numbers = #tpu.dot_dimension_numbers<[1], [0], [0], [1], [0, 0, 1, 1], [], []>} : vector<256x128xbf16>, vector<128x128xbf16>, vector<256x128xf32> -> vector<256x128xf32>
    %12 = arith.addf %6, %11 : vector<256x128xf32>
    %c0_11 = arith.constant 0 : index
    %c0_12 = arith.constant 0 : index
    %c2 = arith.constant 2 : index
    %c0_13 = arith.constant 0 : index
    %13 = vector.load %arg2[%c0_11, %c0_12, %c2, %c0_13] : memref<1x18x18x128xbf16, #tpu.memory_space<vmem>>, vector<1x16x16x128xbf16>
    %14 = vector.shape_cast %13 : vector<1x16x16x128xbf16> to vector<16x16x128xbf16>
    %15 = vector.shape_cast %14 : vector<16x16x128xbf16> to vector<256x128xbf16>
    %c256 = arith.constant 256 : index
    %c0_14 = arith.constant 0 : index
    %16 = vector.load %arg3[%c256, %c0_14] : memref<1152x128xbf16, #tpu.memory_space<vmem>>, vector<128x128xbf16>
    %cst_15 = arith.constant dense<0.000000e+00> : vector<256x128xf32>
    %17 = tpu.matmul %15, %16, %cst_15 {dimension_numbers = #tpu.dot_dimension_numbers<[1], [0], [0], [1], [0, 0, 1, 1], [], []>} : vector<256x128xbf16>, vector<128x128xbf16>, vector<256x128xf32> -> vector<256x128xf32>
    %18 = arith.addf %12, %17 : vector<256x128xf32>
    %c0_16 = arith.constant 0 : index
    %c1_17 = arith.constant 1 : index
    %c0_18 = arith.constant 0 : index
    %c0_19 = arith.constant 0 : index
    %19 = vector.load %arg2[%c0_16, %c1_17, %c0_18, %c0_19] : memref<1x18x18x128xbf16, #tpu.memory_space<vmem>>, vector<1x16x16x128xbf16>
    %20 = vector.shape_cast %19 : vector<1x16x16x128xbf16> to vector<16x16x128xbf16>
    %21 = vector.shape_cast %20 : vector<16x16x128xbf16> to vector<256x128xbf16>
    %c384 = arith.constant 384 : index
    %c0_20 = arith.constant 0 : index
    %22 = vector.load %arg3[%c384, %c0_20] : memref<1152x128xbf16, #tpu.memory_space<vmem>>, vector<128x128xbf16>
    %cst_21 = arith.constant dense<0.000000e+00> : vector<256x128xf32>
    %23 = tpu.matmul %21, %22, %cst_21 {dimension_numbers = #tpu.dot_dimension_numbers<[1], [0], [0], [1], [0, 0, 1, 1], [], []>} : vector<256x128xbf16>, vector<128x128xbf16>, vector<256x128xf32> -> vector<256x128xf32>
    %24 = arith.addf %18, %23 : vector<256x128xf32>
    %c0_22 = arith.constant 0 : index
    %c1_23 = arith.constant 1 : index
    %c1_24 = arith.constant 1 : index
    %c0_25 = arith.constant 0 : index
    %25 = vector.load %arg2[%c0_22, %c1_23, %c1_24, %c0_25] : memref<1x18x18x128xbf16, #tpu.memory_space<vmem>>, vector<1x16x16x128xbf16>
    %26 = vector.shape_cast %25 : vector<1x16x16x128xbf16> to vector<16x16x128xbf16>
    %27 = vector.shape_cast %26 : vector<16x16x128xbf16> to vector<256x128xbf16>
    %c512 = arith.constant 512 : index
    %c0_26 = arith.constant 0 : index
    %28 = vector.load %arg3[%c512, %c0_26] : memref<1152x128xbf16, #tpu.memory_space<vmem>>, vector<128x128xbf16>
    %cst_27 = arith.constant dense<0.000000e+00> : vector<256x128xf32>
    %29 = tpu.matmul %27, %28, %cst_27 {dimension_numbers = #tpu.dot_dimension_numbers<[1], [0], [0], [1], [0, 0, 1, 1], [], []>} : vector<256x128xbf16>, vector<128x128xbf16>, vector<256x128xf32> -> vector<256x128xf32>
    %30 = arith.addf %24, %29 : vector<256x128xf32>
    %c0_28 = arith.constant 0 : index
    %c1_29 = arith.constant 1 : index
    %c2_30 = arith.constant 2 : index
    %c0_31 = arith.constant 0 : index
    %31 = vector.load %arg2[%c0_28, %c1_29, %c2_30, %c0_31] : memref<1x18x18x128xbf16, #tpu.memory_space<vmem>>, vector<1x16x16x128xbf16>
    %32 = vector.shape_cast %31 : vector<1x16x16x128xbf16> to vector<16x16x128xbf16>
    %33 = vector.shape_cast %32 : vector<16x16x128xbf16> to vector<256x128xbf16>
    %c640 = arith.constant 640 : index
    %c0_32 = arith.constant 0 : index
    %34 = vector.load %arg3[%c640, %c0_32] : memref<1152x128xbf16, #tpu.memory_space<vmem>>, vector<128x128xbf16>
    %cst_33 = arith.constant dense<0.000000e+00> : vector<256x128xf32>
    %35 = tpu.matmul %33, %34, %cst_33 {dimension_numbers = #tpu.dot_dimension_numbers<[1], [0], [0], [1], [0, 0, 1, 1], [], []>} : vector<256x128xbf16>, vector<128x128xbf16>, vector<256x128xf32> -> vector<256x128xf32>
    %36 = arith.addf %30, %35 : vector<256x128xf32>
    %c0_34 = arith.constant 0 : index
    %c2_35 = arith.constant 2 : index
    %c0_36 = arith.constant 0 : index
    %c0_37 = arith.constant 0 : index
    %37 = vector.load %arg2[%c0_34, %c2_35, %c0_36, %c0_37] : memref<1x18x18x128xbf16, #tpu.memory_space<vmem>>, vector<1x16x16x128xbf16>
    %38 = vector.shape_cast %37 : vector<1x16x16x128xbf16> to vector<16x16x128xbf16>
    %39 = vector.shape_cast %38 : vector<16x16x128xbf16> to vector<256x128xbf16>
    %c768 = arith.constant 768 : index
    %c0_38 = arith.constant 0 : index
    %40 = vector.load %arg3[%c768, %c0_38] : memref<1152x128xbf16, #tpu.memory_space<vmem>>, vector<128x128xbf16>
    %cst_39 = arith.constant dense<0.000000e+00> : vector<256x128xf32>
    %41 = tpu.matmul %39, %40, %cst_39 {dimension_numbers = #tpu.dot_dimension_numbers<[1], [0], [0], [1], [0, 0, 1, 1], [], []>} : vector<256x128xbf16>, vector<128x128xbf16>, vector<256x128xf32> -> vector<256x128xf32>
    %42 = arith.addf %36, %41 : vector<256x128xf32>
    %c0_40 = arith.constant 0 : index
    %c2_41 = arith.constant 2 : index
    %c1_42 = arith.constant 1 : index
    %c0_43 = arith.constant 0 : index
    %43 = vector.load %arg2[%c0_40, %c2_41, %c1_42, %c0_43] : memref<1x18x18x128xbf16, #tpu.memory_space<vmem>>, vector<1x16x16x128xbf16>
    %44 = vector.shape_cast %43 : vector<1x16x16x128xbf16> to vector<16x16x128xbf16>
    %45 = vector.shape_cast %44 : vector<16x16x128xbf16> to vector<256x128xbf16>
    %c896 = arith.constant 896 : index
    %c0_44 = arith.constant 0 : index
    %46 = vector.load %arg3[%c896, %c0_44] : memref<1152x128xbf16, #tpu.memory_space<vmem>>, vector<128x128xbf16>
    %cst_45 = arith.constant dense<0.000000e+00> : vector<256x128xf32>
    %47 = tpu.matmul %45, %46, %cst_45 {dimension_numbers = #tpu.dot_dimension_numbers<[1], [0], [0], [1], [0, 0, 1, 1], [], []>} : vector<256x128xbf16>, vector<128x128xbf16>, vector<256x128xf32> -> vector<256x128xf32>
    %48 = arith.addf %42, %47 : vector<256x128xf32>
    %c0_46 = arith.constant 0 : index
    %c2_47 = arith.constant 2 : index
    %c2_48 = arith.constant 2 : index
    %c0_49 = arith.constant 0 : index
    %49 = vector.load %arg2[%c0_46, %c2_47, %c2_48, %c0_49] : memref<1x18x18x128xbf16, #tpu.memory_space<vmem>>, vector<1x16x16x128xbf16>
    %50 = vector.shape_cast %49 : vector<1x16x16x128xbf16> to vector<16x16x128xbf16>
    %51 = vector.shape_cast %50 : vector<16x16x128xbf16> to vector<256x128xbf16>
    %c1024 = arith.constant 1024 : index
    %c0_50 = arith.constant 0 : index
    %52 = vector.load %arg3[%c1024, %c0_50] : memref<1152x128xbf16, #tpu.memory_space<vmem>>, vector<128x128xbf16>
    %cst_51 = arith.constant dense<0.000000e+00> : vector<256x128xf32>
    %53 = tpu.matmul %51, %52, %cst_51 {dimension_numbers = #tpu.dot_dimension_numbers<[1], [0], [0], [1], [0, 0, 1, 1], [], []>} : vector<256x128xbf16>, vector<128x128xbf16>, vector<256x128xf32> -> vector<256x128xf32>
    %54 = arith.addf %48, %53 : vector<256x128xf32>
    %c0_52 = arith.constant 0 : index
    %c0_53 = arith.constant 0 : index
    %55 = vector.load %arg4[%c0_52, %c0_53] : memref<1x128xf32, #tpu.memory_space<vmem>>, vector<1x128xf32>
    %56 = vector.broadcast %55 : vector<1x128xf32> to vector<256x128xf32>
    %57 = arith.addf %54, %56 : vector<256x128xf32>
    %cst_54 = arith.constant 1.000000e-01 : f32
    %58 = vector.broadcast %cst_54 : f32 to vector<256x128xf32>
    %59 = arith.mulf %58, %57 : vector<256x128xf32>
    %60 = arith.maximumf %57, %59 : vector<256x128xf32>
    %61 = vector.shape_cast %60 : vector<256x128xf32> to vector<1x16x16x128xf32>
    %62 = arith.truncf %61 : vector<1x16x16x128xf32> to vector<1x16x16x128xbf16>
    %c0_55 = arith.constant 0 : index
    %c0_56 = arith.constant 0 : index
    %c0_57 = arith.constant 0 : index
    %c0_58 = arith.constant 0 : index
    %63 = vector.load %arg5[%c0_55, %c0_56, %c0_57, %c0_58] : memref<1x16x16x128xbf16, #tpu.memory_space<vmem>>, vector<1x16x16x128xbf16>
    tpu.vector_store %arg5[%c0_55, %c0_56, %c0_57, %c0_58], %62 {strides = array<i32>} : memref<1x16x16x128xbf16, #tpu.memory_space<vmem>>, vector<1x16x16x128xbf16>,
    return
  }
  func.func @transform_0(%arg0: i32, %arg1: i32) -> (i32, i32, i32, i32) {
    %c0_i32 = arith.constant 0 : i32
    %c0_i32_0 = arith.constant 0 : i32
    %c0_i32_1 = arith.constant 0 : i32
    %c0_i32_2 = arith.constant 0 : i32
    return %arg1, %c0_i32, %c0_i32_0, %c0_i32_1 : i32, i32, i32, i32
  }
  func.func @transform_1(%arg0: i32, %arg1: i32) -> (i32, i32) {
    %c0_i32 = arith.constant 0 : i32
    %c0_i32_0 = arith.constant 0 : i32
    return %c0_i32, %arg0 : i32, i32
  }
  func.func @transform_2(%arg0: i32, %arg1: i32) -> (i32, i32) {
    %c0_i32 = arith.constant 0 : i32
    %c0_i32_0 = arith.constant 0 : i32
    return %c0_i32, %arg0 : i32, i32
  }
  func.func @transform_3(%arg0: i32, %arg1: i32) -> (i32, i32, i32, i32) {
    %c0_i32 = arith.constant 0 : i32
    %c0_i32_0 = arith.constant 0 : i32
    %c0_i32_1 = arith.constant 0 : i32
    return %arg1, %c0_i32, %c0_i32_0, %arg0 : i32, i32, i32, i32
  }
}

</mosaic_0001>

<bundles_post_ra>
// kernel: convolutional_set.5
= control target key start
LH: loop header
LB: loop body
LE: loop exit
PB: predicated region body
PF: predicated region fallthrough
CT: control target
= control target key end

     0   :  { %s1924_s1 = inlined_call_operand.vmem [shape: bf16[128,128], index: 1, kind: input, shape index: {}]   ;;  %s1925_s0 = inlined_call_operand.vmem [shape: bf16[512,128], index: 0, kind: input, shape index: {}]   ;;  %s1926_s2 = inlined_call_operand.vmem [shape: f32[1,128], index: 2, kind: input, shape index: {}]   ;;  %s1927_s3 = inlined_call_operand.vmem [shape: bf16[512,128], index: 3, kind: output, shape index: {}]  }
   0x1   :  { %v1579_v0 = vld [vmem:[%s1924_s1] sm:$0xff]   ;;  %v1580_v1 = vld [vmem:[%s1924_s1 + $0x8] sm:$0xff]   ;;  %v1581_v2 = vld [vmem:[%s1924_s1 + $0x10] sm:$0xff]  }
   0x2   :  { %1483 = vmatprep.subr.bf16.mxu0 %v1579_v0  ;;  %1563 = vmatprep.subr.bf16.mxu1 %v1579_v0  ;;  %v1582_v3 = vld [vmem:[%s1924_s1 + $0x18] sm:$0xff]   ;;  %v1587_v4 = vld [vmem:[%s1925_s0] sm:$0xff]   ;;  %v1584_v7 = vld [vmem:[%s1924_s1 + $0x28] sm:$0xff]  }
   0x3   :  { %1484 = vmatpush3.bf16.msra.mxu0 %v1579_v0  ;;  %1571 = vmatpush3.bf16.msra.mxu1 %v1579_v0  ;;  %v1588_v5 = vld [vmem:[%s1925_s0 + $0x80] sm:$0xff]   ;;  %v1585_v8 = vld [vmem:[%s1924_s1 + $0x30] sm:$0xff]   ;;  %v1586_v9 = vld [vmem:[%s1924_s1 + $0x38] sm:$0xff]  }
   0x4   :  { %1485 = vmatprep.subr.bf16.mxu0 %v1580_v1  ;;  %1564 = vmatprep.subr.bf16.mxu1 %v1580_v1  ;;  %v1583_v6 = vld [vmem:[%s1924_s1 + $0x20] sm:$0xff]   ;;  %v1589_v10 = vld [vmem:[%s1925_s0 + $0x8] sm:$0xff]   ;;  %v1591_v12 = vld [vmem:[%s1925_s0 + $0x10] sm:$0xff]  }
   0x5   :  { %1499 = vmatprep.mubr.bf16.mxu0 %v1587_v4  ;;  %1531 = vmatprep.mubr.bf16.mxu1 %v1588_v5  ;;  %v1590_v11 = vld [vmem:[%s1925_s0 + $0x88] sm:$0xff]   ;;  %v1592_v13 = vld [vmem:[%s1925_s0 + $0x90] sm:$0xff]   ;;  %v1593_v14 = vld [vmem:[%s1925_s0 + $0x18] sm:$0xff]  }
   0x6   :  { %v1594_v15 = vld [vmem:[%s1925_s0 + $0x98] sm:$0xff]   ;;  %v1595_v16 = vld [vmem:[%s1925_s0 + $0x20] sm:$0xff]   ;;  %v1597_v18 = vld [vmem:[%s1925_s0 + $0x28] sm:$0xff]  }
   0x7   :  { %1486 = vmatpush3.bf16.msra.mxu0 %v1580_v1  ;;  %1572 = vmatpush3.bf16.msra.mxu1 %v1580_v1  ;;  %v1596_v17 = vld [vmem:[%s1925_s0 + $0xa0] sm:$0xff]   ;;  %v1598_v19 = vld [vmem:[%s1925_s0 + $0xa8] sm:$0xff]   ;;  %v1599_v20 = vld [vmem:[%s1925_s0 + $0x30] sm:$0xff]  }
   0x8   :  { %1487 = vmatprep.subr.bf16.mxu0 %v1581_v2  ;;  %1565 = vmatprep.subr.bf16.mxu1 %v1581_v2  ;;  %v1600_v21 = vld [vmem:[%s1925_s0 + $0xb0] sm:$0xff]   ;;  %v1601_v22 = vld [vmem:[%s1925_s0 + $0x38] sm:$0xff]   ;;  %v1603_v24 = vld [vmem:[%s1925_s0 + $0x40] sm:$0xff]  }
   0x9   :  { %v1602_v23 = vld [vmem:[%s1925_s0 + $0xb8] sm:$0xff]   ;;  %v1604_v25 = vld [vmem:[%s1925_s0 + $0xc0] sm:$0xff]   ;;  %v1605_v26 = vld [vmem:[%s1925_s0 + $0x48] sm:$0xff]  }
   0xa   :  { %v1606_v27 = vld [vmem:[%s1925_s0 + $0xc8] sm:$0xff]   ;;  %v1607_v28 = vld [vmem:[%s1925_s0 + $0x50] sm:$0xff]   ;;  %v1609_v30 = vld [vmem:[%s1925_s0 + $0x58] sm:$0xff]  }
   0xb   :  { %1488 = vmatpush3.bf16.msra.mxu0 %v1581_v2  ;;  %1573 = vmatpush3.bf16.msra.mxu1 %v1581_v2  ;;  %v1608_v29 = vld [vmem:[%s1925_s0 + $0xd0] sm:$0xff]   ;;  %v1610_v31 = vld [vmem:[%s1925_s0 + $0xd8] sm:$0xff]   ;;  %v1611_v32 = vld [vmem:[%s1925_s0 + $0x60] sm:$0xff]  }
   0xc   :  { %1489 = vmatprep.subr.bf16.mxu0 %v1582_v3  ;;  %1566 = vmatprep.subr.bf16.mxu1 %v1582_v3  ;;  %v1612_v33 = vld [vmem:[%s1925_s0 + $0xe0] sm:$0xff]   ;;  %v1613_v34 = vld [vmem:[%s1925_s0 + $0x68] sm:$0xff]   ;;  %v1615_v36 = vld [vmem:[%s1925_s0 + $0x70] sm:$0xff]  }
   0xd   :  { %v1614_v35 = vld [vmem:[%s1925_s0 + $0xe8] sm:$0xff]   ;;  %v1616_v37 = vld [vmem:[%s1925_s0 + $0xf0] sm:$0xff]   ;;  %v1617_v38 = vld [vmem:[%s1925_s0 + $0x78] sm:$0xff]  }
   0xe   :  { %v1618_v39 = vld [vmem:[%s1925_s0 + $0xf8] sm:$0xff]   ;;  %v1762_v40 = vld [vmem:[%s1926_s2] ss:$0 sm:$0xff] }
   0xf   :  { %1490 = vmatpush3.bf16.msra.mxu0 %v1582_v3  ;;  %1574 = vmatpush3.bf16.msra.mxu1 %v1582_v3 }
  0x10   :  { %1491 = vmatprep.subr.bf16.mxu0 %v1583_v6  ;;  %1567 = vmatprep.subr.bf16.mxu1 %v1583_v6 }
  0x13   :  { %1492 = vmatpush3.bf16.msra.mxu0 %v1583_v6  ;;  %1575 = vmatpush3.bf16.msra.mxu1 %v1583_v6 }
  0x14   :  { %1493 = vmatprep.subr.bf16.mxu0 %v1584_v7  ;;  %1568 = vmatprep.subr.bf16.mxu1 %v1584_v7 }
  0x17   :  { %1494 = vmatpush3.bf16.msra.mxu0 %v1584_v7  ;;  %1576 = vmatpush3.bf16.msra.mxu1 %v1584_v7 }
  0x18   :  { %1495 = vmatprep.subr.bf16.mxu0 %v1585_v8  ;;  %1569 = vmatprep.subr.bf16.mxu1 %v1585_v8 }
  0x1b   :  { %1496 = vmatpush3.bf16.msra.mxu0 %v1585_v8  ;;  %1577 = vmatpush3.bf16.msra.mxu1 %v1585_v8 }
  0x1c   :  { %1497 = vmatprep.subr.bf16.mxu0 %v1586_v9  ;;  %1570 = vmatprep.subr.bf16.mxu1 %v1586_v9 }
  0x1f   :  { %1498 = vmatpush3.bf16.msra.mxu0 %v1586_v9  ;;  %1578 = vmatpush3.bf16.msra.mxu1 %v1586_v9 }
  0x22   :  { %1500 = vmatmul.mubr.bf16.vlgmr.msra.gmra.mrb[0].mxu0 %v1589_v10  ;;  %1532 = vmatmul.mubr.bf16.vlgmr.msra.gmra.mrb[0].mxu1 %v1590_v11 }
  0x23   :  { %1503 = vmatprep.mubr.bf16.mxu0 %v1591_v12  ;;  %1535 = vmatprep.mubr.bf16.mxu1 %v1592_v13 }
  0x2a   :  { %1504 = vmatmul.mubr.bf16.gmra.mrb[4].mxu0 %v1593_v14  ;;  %1536 = vmatmul.mubr.bf16.gmra.mrb[4].mxu1 %v1594_v15 }
  0x2b   :  { %1507 = vmatprep.mubr.bf16.mxu0 %v1595_v16  ;;  %1539 = vmatprep.mubr.bf16.mxu1 %v1596_v17 }
  0x32   :  { %1508 = vmatmul.mubr.bf16.gmra.mrb[8].mxu0 %v1597_v18  ;;  %1540 = vmatmul.mubr.bf16.gmra.mrb[8].mxu1 %v1598_v19 }
  0x33   :  { %1511 = vmatprep.mubr.bf16.mxu0 %v1599_v20  ;;  %1543 = vmatprep.mubr.bf16.mxu1 %v1600_v21 }
  0x3a   :  { %1512 = vmatmul.mubr.bf16.gmra.mrb[12].mxu0 %v1601_v22  ;;  %1544 = vmatmul.mubr.bf16.gmra.mrb[12].mxu1 %v1602_v23 }
  0x3b   :  { %1515 = vmatprep.mubr.bf16.mxu0 %v1603_v24  ;;  %1547 = vmatprep.mubr.bf16.mxu1 %v1604_v25 }
  0x42   :  { %1516 = vmatmul.mubr.bf16.gmra.mrb[16].mxu0 %v1605_v26  ;;  %1548 = vmatmul.mubr.bf16.gmra.mrb[16].mxu1 %v1606_v27 }
  0x43   :  { %1519 = vmatprep.mubr.bf16.mxu0 %v1607_v28  ;;  %1551 = vmatprep.mubr.bf16.mxu1 %v1608_v29 }
  0x4a   :  { %1520 = vmatmul.mubr.bf16.gmra.mrb[20].mxu0 %v1609_v30  ;;  %1552 = vmatmul.mubr.bf16.gmra.mrb[20].mxu1 %v1610_v31 }
  0x4b   :  { %1523 = vmatprep.mubr.bf16.mxu0 %v1611_v32  ;;  %1555 = vmatprep.mubr.bf16.mxu1 %v1612_v33 }
  0x52   :  { %1524 = vmatmul.mubr.bf16.gmra.mrb[24].mxu0 %v1613_v34  ;;  %1556 = vmatmul.mubr.bf16.gmra.mrb[24].mxu1 %v1614_v35 }
  0x53   :  { %1527 = vmatprep.mubr.bf16.mxu0 %v1615_v36  ;;  %1559 = vmatprep.mubr.bf16.mxu1 %v1616_v37 }
  0x5a   :  { %1528 = vmatmul.mubr.bf16.gmra.mrb[28].mxu0 %v1617_v38  ;;  %1560 = vmatmul.mubr.bf16.gmra.mrb[28].mxu1 %v1618_v39 }
  0xf5   :  { %v1501_v41 = vpop.f32.mrb[0].mxu0  ;;  %v1533_v42 = vpop.f32.mrb[0].mxu1 }
  0xf6   :  { %v385_v43 = vadd.f32 %v1501_v41, %v1762_v40  ;;  %v513_v44 = vadd.f32 %v1533_v42, %v1762_v40  ;;  %v376_v45 = vpop.f32.mrb[1].mxu0  ;;  %v504_v46 = vpop.f32.mrb[1].mxu1 }
  0xf7   :  { %v377_v47 = vadd.f32 %v1762_v40, %v376_v45  ;;  %v505_v48 = vadd.f32 %v1762_v40, %v504_v46  ;;  %v1502_v49 = vpop.f32.mrb[2].mxu0  ;;  %v1534_v50 = vpop.f32.mrb[2].mxu1 }
  0xf8   :  { %v633_v51 = vmul.f32 0.1, %v385_v43  ;;  %v665_v52 = vmul.f32 0.1, %v513_v44  ;;  %v388_v53 = vadd.f32 %v1502_v49, %v1762_v40  ;;  %v516_v54 = vadd.f32 %v1534_v50, %v1762_v40  ;;  %v379_v55 = vpop.f32.mrb[3].mxu0  ;;  %v507_v56 = vpop.f32.mrb[3].mxu1 }
  0xf9   :  { %v631_v57 = vmul.f32 0.1, %v377_v47  ;;  %v663_v58 = vmul.f32 0.1, %v505_v48  ;;  %v380_v59 = vadd.f32 %v1762_v40, %v379_v55  ;;  %v508_v60 = vadd.f32 %v1762_v40, %v507_v56 }
  0xfa   :  { %v634_v61 = vmul.f32 0.1, %v388_v53  ;;  %v666_v62 = vmul.f32 0.1, %v516_v54  ;;  %v697_v1 = vmax.f32 %v385_v43, %v633_v51  ;;  %v729_v2 = vmax.f32 %v513_v44, %v665_v52 }
  0xfb   :  { %v632_v63 = vmul.f32 0.1, %v380_v59  ;;  %v664_v0 = vmul.f32 0.1, %v508_v60  ;;  %v695_v5 = vmax.f32 %v377_v47, %v631_v57  ;;  %v727_v6 = vmax.f32 %v505_v48, %v663_v58 }
  0xfc   :  { %v698_v3 = vmax.f32 %v388_v53, %v634_v61  ;;  %v730_v4 = vmax.f32 %v516_v54, %v666_v62 }
  0xfd   :  { %v696_v7 = vmax.f32 %v380_v59, %v632_v63  ;;  %v728_v8 = vmax.f32 %v508_v60, %v664_v0  ;;  %v1505_v9 = vpop.f32.mrb[4].mxu0  ;;  %v1537_v10 = vpop.f32.mrb[4].mxu1 }
  0xfe   :  { %v1260_v11 = vpack.c.bf16 %v698_v3, %v697_v1  ;;  %v1340_v12 = vpack.c.bf16 %v730_v4, %v729_v2  ;;  %v401_v13 = vadd.f32 %v1505_v9, %v1762_v40  ;;  %v529_v14 = vadd.f32 %v1537_v10, %v1762_v40  ;;  %v392_v15 = vpop.f32.mrb[5].mxu0  ;;  %v520_v16 = vpop.f32.mrb[5].mxu1 }
  0xff   :  { %v1255_v17 = vpack.c.bf16 %v696_v7, %v695_v5  ;;  %v1335_v18 = vpack.c.bf16 %v728_v8, %v727_v6  ;;  %v393_v19 = vadd.f32 %v1762_v40, %v392_v15  ;;  %v521_v20 = vadd.f32 %v1762_v40, %v520_v16  ;;  %v1506_v21 = vpop.f32.mrb[6].mxu0  ;;  %v1538_v22 = vpop.f32.mrb[6].mxu1 }
 0x100   :  { %1412 = vst [vmem:[%s1927_s3 + $0x8] sm:$0xff] %v1260_v11   ;;  %1428 = vst [vmem:[%s1927_s3 + $0x88] sm:$0xff] %v1340_v12   ;;  %v637_v23 = vmul.f32 0.1, %v401_v13  ;;  %v669_v24 = vmul.f32 0.1, %v529_v14  ;;  %v404_v25 = vadd.f32 %v1506_v21, %v1762_v40  ;;  %v532_v26 = vadd.f32 %v1538_v22, %v1762_v40 }
 0x101   :  { %v395_v27 = vpop.f32.mrb[7].mxu0  ;;  %v523_v28 = vpop.f32.mrb[7].mxu1  ;;  %1256 = vst [vmem:[%s1927_s3] sm:$0xff] %v1255_v17   ;;  %1427 = vst [vmem:[%s1927_s3 + $0x80] sm:$0xff] %v1335_v18   ;;  %v635_v29 = vmul.f32 0.1, %v393_v19 }
 0x102   :  { %v667_v30 = vmul.f32 0.1, %v521_v20  ;;  %v396_v31 = vadd.f32 %v1762_v40, %v395_v27  ;;  %v524_v32 = vadd.f32 %v1762_v40, %v523_v28  ;;  %v638_v33 = vmul.f32 0.1, %v404_v25 }
 0x103   :  { %v670_v34 = vmul.f32 0.1, %v532_v26  ;;  %v701_v37 = vmax.f32 %v401_v13, %v637_v23  ;;  %v733_v38 = vmax.f32 %v529_v14, %v669_v24  ;;  %v699_v42 = vmax.f32 %v393_v19, %v635_v29 }
 0x104   :  { %v636_v35 = vmul.f32 0.1, %v396_v31  ;;  %v668_v36 = vmul.f32 0.1, %v524_v32  ;;  %v702_v39 = vmax.f32 %v404_v25, %v638_v33  ;;  %v731_v43 = vmax.f32 %v521_v20, %v667_v30 }
 0x105   :  { %v734_v41 = vmax.f32 %v532_v26, %v670_v34  ;;  %v1509_v46 = vpop.f32.mrb[8].mxu0  ;;  %v1541_v47 = vpop.f32.mrb[8].mxu1 }
 0x106   :  { %v700_v44 = vmax.f32 %v396_v31, %v636_v35  ;;  %v732_v45 = vmax.f32 %v524_v32, %v668_v36  ;;  %v1270_v48 = vpack.c.bf16 %v702_v39, %v701_v37  ;;  %v417_v50 = vadd.f32 %v1509_v46, %v1762_v40  ;;  %v408_v52 = vpop.f32.mrb[9].mxu0  ;;  %v536_v53 = vpop.f32.mrb[9].mxu1 }
 0x107   :  { %v1350_v49 = vpack.c.bf16 %v734_v41, %v733_v38  ;;  %v545_v51 = vadd.f32 %v1541_v47, %v1762_v40  ;;  %v409_v56 = vadd.f32 %v1762_v40, %v408_v52  ;;  %v537_v57 = vadd.f32 %v1762_v40, %v536_v53  ;;  %v1510_v58 = vpop.f32.mrb[10].mxu0  ;;  %v1542_v59 = vpop.f32.mrb[10].mxu1 }
 0x108   :  { %v1265_v54 = vpack.c.bf16 %v700_v44, %v699_v42  ;;  %v1345_v55 = vpack.c.bf16 %v732_v45, %v731_v43  ;;  %1414 = vst [vmem:[%s1927_s3 + $0x18] sm:$0xff] %v1270_v48   ;;  %v641_v60 = vmul.f32 0.1, %v417_v50  ;;  %v420_v62 = vadd.f32 %v1510_v58, %v1762_v40  ;;  %v411_v0 = vpop.f32.mrb[11].mxu0  ;;  %v539_v1 = vpop.f32.mrb[11].mxu1 }
 0x109   :  { %1430 = vst [vmem:[%s1927_s3 + $0x98] sm:$0xff] %v1350_v49   ;;  %v673_v61 = vmul.f32 0.1, %v545_v51  ;;  %v548_v63 = vadd.f32 %v1542_v59, %v1762_v40  ;;  %v639_v2 = vmul.f32 0.1, %v409_v56  ;;  %v412_v4 = vadd.f32 %v1762_v40, %v411_v0 }
 0x10a   :  { %1413 = vst [vmem:[%s1927_s3 + $0x10] sm:$0xff] %v1265_v54   ;;  %1429 = vst [vmem:[%s1927_s3 + $0x90] sm:$0xff] %v1345_v55   ;;  %v671_v3 = vmul.f32 0.1, %v537_v57  ;;  %v540_v5 = vadd.f32 %v1762_v40, %v539_v1  ;;  %v642_v6 = vmul.f32 0.1, %v420_v62  ;;  %v705_v10 = vmax.f32 %v417_v50, %v641_v60 }
 0x10b   :  { %v674_v7 = vmul.f32 0.1, %v548_v63  ;;  %v640_v8 = vmul.f32 0.1, %v412_v4  ;;  %v737_v11 = vmax.f32 %v545_v51, %v673_v61  ;;  %v703_v14 = vmax.f32 %v409_v56, %v639_v2 }
 0x10c   :  { %v672_v9 = vmul.f32 0.1, %v540_v5  ;;  %v706_v12 = vmax.f32 %v420_v62, %v642_v6  ;;  %v735_v15 = vmax.f32 %v537_v57, %v671_v3 }
 0x10d   :  { %v738_v13 = vmax.f32 %v548_v63, %v674_v7  ;;  %v704_v16 = vmax.f32 %v412_v4, %v640_v8  ;;  %v1513_v18 = vpop.f32.mrb[12].mxu0  ;;  %v1545_v19 = vpop.f32.mrb[12].mxu1 }
 0x10e   :  { %v736_v17 = vmax.f32 %v540_v5, %v672_v9  ;;  %v1280_v20 = vpack.c.bf16 %v706_v12, %v705_v10  ;;  %v433_v22 = vadd.f32 %v1513_v18, %v1762_v40  ;;  %v561_v23 = vadd.f32 %v1545_v19, %v1762_v40  ;;  %v424_v24 = vpop.f32.mrb[13].mxu0  ;;  %v552_v25 = vpop.f32.mrb[13].mxu1 }
 0x10f   :  { %v1360_v21 = vpack.c.bf16 %v738_v13, %v737_v11  ;;  %v1275_v26 = vpack.c.bf16 %v704_v16, %v703_v14  ;;  %v425_v28 = vadd.f32 %v1762_v40, %v424_v24  ;;  %v553_v29 = vadd.f32 %v1762_v40, %v552_v25  ;;  %v1514_v30 = vpop.f32.mrb[14].mxu0  ;;  %v1546_v31 = vpop.f32.mrb[14].mxu1 }
 0x110   :  { %v1355_v27 = vpack.c.bf16 %v736_v17, %v735_v15  ;;  %1416 = vst [vmem:[%s1927_s3 + $0x28] sm:$0xff] %v1280_v20   ;;  %v645_v32 = vmul.f32 0.1, %v433_v22  ;;  %v677_v33 = vmul.f32 0.1, %v561_v23  ;;  %v436_v34 = vadd.f32 %v1514_v30, %v1762_v40  ;;  %v427_v36 = vpop.f32.mrb[15].mxu0 }
 0x111   :  { %1432 = vst [vmem:[%s1927_s3 + $0xa8] sm:$0xff] %v1360_v21   ;;  %v564_v35 = vadd.f32 %v1546_v31, %v1762_v40  ;;  %v555_v37 = vpop.f32.mrb[15].mxu1  ;;  %1415 = vst [vmem:[%s1927_s3 + $0x20] sm:$0xff] %v1275_v26   ;;  %v643_v38 = vmul.f32 0.1, %v425_v28  ;;  %v428_v41 = vadd.f32 %v1762_v40, %v427_v36 }
 0x112   :  { %1431 = vst [vmem:[%s1927_s3 + $0xa0] sm:$0xff] %v1355_v27   ;;  %v675_v39 = vmul.f32 0.1, %v553_v29  ;;  %v556_v42 = vadd.f32 %v1762_v40, %v555_v37  ;;  %v646_v43 = vmul.f32 0.1, %v436_v34  ;;  %v709_v47 = vmax.f32 %v433_v22, %v645_v32 }
 0x113   :  { %v678_v44 = vmul.f32 0.1, %v564_v35  ;;  %v644_v45 = vmul.f32 0.1, %v428_v41  ;;  %v741_v48 = vmax.f32 %v561_v23, %v677_v33  ;;  %v707_v51 = vmax.f32 %v425_v28, %v643_v38 }
 0x114   :  { %v676_v46 = vmul.f32 0.1, %v556_v42  ;;  %v710_v49 = vmax.f32 %v436_v34, %v646_v43  ;;  %v739_v52 = vmax.f32 %v553_v29, %v675_v39 }
 0x115   :  { %v742_v50 = vmax.f32 %v564_v35, %v678_v44  ;;  %v708_v53 = vmax.f32 %v428_v41, %v644_v45  ;;  %v1517_v55 = vpop.f32.mrb[16].mxu0  ;;  %v1549_v56 = vpop.f32.mrb[16].mxu1 }
 0x116   :  { %v740_v54 = vmax.f32 %v556_v42, %v676_v46  ;;  %v1290_v57 = vpack.c.bf16 %v710_v49, %v709_v47  ;;  %v449_v59 = vadd.f32 %v1517_v55, %v1762_v40  ;;  %v577_v60 = vadd.f32 %v1549_v56, %v1762_v40  ;;  %v440_v61 = vpop.f32.mrb[17].mxu0  ;;  %v568_v62 = vpop.f32.mrb[17].mxu1 }
 0x117   :  { %v1370_v58 = vpack.c.bf16 %v742_v50, %v741_v48  ;;  %v1285_v63 = vpack.c.bf16 %v708_v53, %v707_v51  ;;  %v441_v1 = vadd.f32 %v1762_v40, %v440_v61  ;;  %v569_v2 = vadd.f32 %v1762_v40, %v568_v62  ;;  %v1518_v3 = vpop.f32.mrb[18].mxu0  ;;  %v1550_v4 = vpop.f32.mrb[18].mxu1 }
 0x118   :  { %v1365_v0 = vpack.c.bf16 %v740_v54, %v739_v52  ;;  %1418 = vst [vmem:[%s1927_s3 + $0x38] sm:$0xff] %v1290_v57   ;;  %v649_v5 = vmul.f32 0.1, %v449_v59  ;;  %v681_v6 = vmul.f32 0.1, %v577_v60  ;;  %v452_v7 = vadd.f32 %v1518_v3, %v1762_v40  ;;  %v443_v9 = vpop.f32.mrb[19].mxu0 }
 0x119   :  { %1434 = vst [vmem:[%s1927_s3 + $0xb8] sm:$0xff] %v1370_v58   ;;  %v580_v8 = vadd.f32 %v1550_v4, %v1762_v40  ;;  %v571_v10 = vpop.f32.mrb[19].mxu1  ;;  %1417 = vst [vmem:[%s1927_s3 + $0x30] sm:$0xff] %v1285_v63   ;;  %v647_v11 = vmul.f32 0.1, %v441_v1  ;;  %v444_v13 = vadd.f32 %v1762_v40, %v443_v9 }
 0x11a   :  { %1433 = vst [vmem:[%s1927_s3 + $0xb0] sm:$0xff] %v1365_v0   ;;  %v679_v12 = vmul.f32 0.1, %v569_v2  ;;  %v572_v14 = vadd.f32 %v1762_v40, %v571_v10  ;;  %v650_v15 = vmul.f32 0.1, %v452_v7  ;;  %v713_v19 = vmax.f32 %v449_v59, %v649_v5 }
 0x11b   :  { %v682_v16 = vmul.f32 0.1, %v580_v8  ;;  %v648_v17 = vmul.f32 0.1, %v444_v13  ;;  %v745_v20 = vmax.f32 %v577_v60, %v681_v6  ;;  %v711_v23 = vmax.f32 %v441_v1, %v647_v11 }
 0x11c   :  { %v680_v18 = vmul.f32 0.1, %v572_v14  ;;  %v714_v21 = vmax.f32 %v452_v7, %v650_v15  ;;  %v743_v24 = vmax.f32 %v569_v2, %v679_v12 }
 0x11d   :  { %v746_v22 = vmax.f32 %v580_v8, %v682_v16  ;;  %v712_v25 = vmax.f32 %v444_v13, %v648_v17  ;;  %v1521_v27 = vpop.f32.mrb[20].mxu0  ;;  %v1553_v28 = vpop.f32.mrb[20].mxu1 }
 0x11e   :  { %v744_v26 = vmax.f32 %v572_v14, %v680_v18  ;;  %v1300_v29 = vpack.c.bf16 %v714_v21, %v713_v19  ;;  %v465_v31 = vadd.f32 %v1521_v27, %v1762_v40  ;;  %v593_v32 = vadd.f32 %v1553_v28, %v1762_v40  ;;  %v456_v33 = vpop.f32.mrb[21].mxu0  ;;  %v584_v34 = vpop.f32.mrb[21].mxu1 }
 0x11f   :  { %v1380_v30 = vpack.c.bf16 %v746_v22, %v745_v20  ;;  %v1295_v35 = vpack.c.bf16 %v712_v25, %v711_v23  ;;  %v457_v37 = vadd.f32 %v1762_v40, %v456_v33  ;;  %v585_v38 = vadd.f32 %v1762_v40, %v584_v34  ;;  %v1522_v39 = vpop.f32.mrb[22].mxu0  ;;  %v1554_v41 = vpop.f32.mrb[22].mxu1 }
 0x120   :  { %v1375_v36 = vpack.c.bf16 %v744_v26, %v743_v24  ;;  %1420 = vst [vmem:[%s1927_s3 + $0x48] sm:$0xff] %v1300_v29   ;;  %v653_v42 = vmul.f32 0.1, %v465_v31  ;;  %v685_v43 = vmul.f32 0.1, %v593_v32  ;;  %v468_v44 = vadd.f32 %v1522_v39, %v1762_v40  ;;  %v459_v46 = vpop.f32.mrb[23].mxu0 }
 0x121   :  { %1436 = vst [vmem:[%s1927_s3 + $0xc8] sm:$0xff] %v1380_v30   ;;  %v596_v45 = vadd.f32 %v1554_v41, %v1762_v40  ;;  %v587_v47 = vpop.f32.mrb[23].mxu1  ;;  %1419 = vst [vmem:[%s1927_s3 + $0x40] sm:$0xff] %v1295_v35   ;;  %v651_v48 = vmul.f32 0.1, %v457_v37  ;;  %v460_v50 = vadd.f32 %v1762_v40, %v459_v46 }
 0x122   :  { %1435 = vst [vmem:[%s1927_s3 + $0xc0] sm:$0xff] %v1375_v36   ;;  %v683_v49 = vmul.f32 0.1, %v585_v38  ;;  %v588_v51 = vadd.f32 %v1762_v40, %v587_v47  ;;  %v654_v52 = vmul.f32 0.1, %v468_v44  ;;  %v717_v56 = vmax.f32 %v465_v31, %v653_v42 }
 0x123   :  { %v686_v53 = vmul.f32 0.1, %v596_v45  ;;  %v652_v54 = vmul.f32 0.1, %v460_v50  ;;  %v749_v57 = vmax.f32 %v593_v32, %v685_v43  ;;  %v715_v60 = vmax.f32 %v457_v37, %v651_v48 }
 0x124   :  { %v684_v55 = vmul.f32 0.1, %v588_v51  ;;  %v718_v58 = vmax.f32 %v468_v44, %v654_v52  ;;  %v747_v61 = vmax.f32 %v585_v38, %v683_v49 }
 0x125   :  { %v750_v59 = vmax.f32 %v596_v45, %v686_v53  ;;  %v716_v62 = vmax.f32 %v460_v50, %v652_v54  ;;  %v1525_v0 = vpop.f32.mrb[24].mxu0  ;;  %v1557_v1 = vpop.f32.mrb[24].mxu1 }
 0x126   :  { %v748_v63 = vmax.f32 %v588_v51, %v684_v55  ;;  %v1310_v2 = vpack.c.bf16 %v718_v58, %v717_v56  ;;  %v481_v4 = vadd.f32 %v1525_v0, %v1762_v40  ;;  %v609_v5 = vadd.f32 %v1557_v1, %v1762_v40  ;;  %v472_v6 = vpop.f32.mrb[25].mxu0  ;;  %v600_v7 = vpop.f32.mrb[25].mxu1 }
 0x127   :  { %v1390_v3 = vpack.c.bf16 %v750_v59, %v749_v57  ;;  %v1305_v8 = vpack.c.bf16 %v716_v62, %v715_v60  ;;  %v473_v10 = vadd.f32 %v1762_v40, %v472_v6  ;;  %v601_v11 = vadd.f32 %v1762_v40, %v600_v7  ;;  %v1526_v12 = vpop.f32.mrb[26].mxu0  ;;  %v1558_v13 = vpop.f32.mrb[26].mxu1 }
 0x128   :  { %v1385_v9 = vpack.c.bf16 %v748_v63, %v747_v61  ;;  %1422 = vst [vmem:[%s1927_s3 + $0x58] sm:$0xff] %v1310_v2   ;;  %v657_v14 = vmul.f32 0.1, %v481_v4  ;;  %v689_v15 = vmul.f32 0.1, %v609_v5  ;;  %v484_v16 = vadd.f32 %v1526_v12, %v1762_v40  ;;  %v475_v18 = vpop.f32.mrb[27].mxu0 }
 0x129   :  { %1438 = vst [vmem:[%s1927_s3 + $0xd8] sm:$0xff] %v1390_v3   ;;  %v612_v17 = vadd.f32 %v1558_v13, %v1762_v40  ;;  %v603_v19 = vpop.f32.mrb[27].mxu1  ;;  %1421 = vst [vmem:[%s1927_s3 + $0x50] sm:$0xff] %v1305_v8   ;;  %v655_v20 = vmul.f32 0.1, %v473_v10  ;;  %v476_v22 = vadd.f32 %v1762_v40, %v475_v18 }
 0x12a   :  { %1437 = vst [vmem:[%s1927_s3 + $0xd0] sm:$0xff] %v1385_v9   ;;  %v687_v21 = vmul.f32 0.1, %v601_v11  ;;  %v604_v23 = vadd.f32 %v1762_v40, %v603_v19  ;;  %v658_v24 = vmul.f32 0.1, %v484_v16  ;;  %v721_v28 = vmax.f32 %v481_v4, %v657_v14 }
 0x12b   :  { %v690_v25 = vmul.f32 0.1, %v612_v17  ;;  %v656_v26 = vmul.f32 0.1, %v476_v22  ;;  %v753_v29 = vmax.f32 %v609_v5, %v689_v15  ;;  %v719_v32 = vmax.f32 %v473_v10, %v655_v20 }
 0x12c   :  { %v688_v27 = vmul.f32 0.1, %v604_v23  ;;  %v722_v30 = vmax.f32 %v484_v16, %v658_v24  ;;  %v751_v33 = vmax.f32 %v601_v11, %v687_v21 }
 0x12d   :  { %v754_v31 = vmax.f32 %v612_v17, %v690_v25  ;;  %v720_v34 = vmax.f32 %v476_v22, %v656_v26  ;;  %v1529_v36 = vpop.f32.mrb[28].mxu0  ;;  %v1561_v37 = vpop.f32.mrb[28].mxu1 }
 0x12e   :  { %v752_v35 = vmax.f32 %v604_v23, %v688_v27  ;;  %v1320_v38 = vpack.c.bf16 %v722_v30, %v721_v28  ;;  %v497_v41 = vadd.f32 %v1529_v36, %v1762_v40  ;;  %v625_v42 = vadd.f32 %v1561_v37, %v1762_v40  ;;  %v488_v43 = vpop.f32.mrb[29].mxu0  ;;  %v616_v44 = vpop.f32.mrb[29].mxu1 }
 0x12f   :  { %v1400_v39 = vpack.c.bf16 %v754_v31, %v753_v29  ;;  %v1315_v45 = vpack.c.bf16 %v720_v34, %v719_v32  ;;  %v489_v47 = vadd.f32 %v1762_v40, %v488_v43  ;;  %v617_v48 = vadd.f32 %v1762_v40, %v616_v44  ;;  %v1530_v49 = vpop.f32.mrb[30].mxu0  ;;  %v1562_v50 = vpop.f32.mrb[30].mxu1 }
 0x130   :  { %v1395_v46 = vpack.c.bf16 %v752_v35, %v751_v33  ;;  %1424 = vst [vmem:[%s1927_s3 + $0x68] sm:$0xff] %v1320_v38   ;;  %v661_v51 = vmul.f32 0.1, %v497_v41  ;;  %v693_v52 = vmul.f32 0.1, %v625_v42  ;;  %v500_v53 = vadd.f32 %v1530_v49, %v1762_v40  ;;  %v491_v55 = vpop.f32.mrb[31].mxu0 }
 0x131   :  { %1440 = vst [vmem:[%s1927_s3 + $0xe8] sm:$0xff] %v1400_v39   ;;  %v628_v54 = vadd.f32 %v1562_v50, %v1762_v40  ;;  %v619_v56 = vpop.f32.mrb[31].mxu1  ;;  %1423 = vst [vmem:[%s1927_s3 + $0x60] sm:$0xff] %v1315_v45   ;;  %v659_v57 = vmul.f32 0.1, %v489_v47  ;;  %v492_v59 = vadd.f32 %v1762_v40, %v491_v55 }
 0x132   :  { %1439 = vst [vmem:[%s1927_s3 + $0xe0] sm:$0xff] %v1395_v46   ;;  %v691_v58 = vmul.f32 0.1, %v617_v48  ;;  %v620_v60 = vadd.f32 %v1762_v40, %v619_v56  ;;  %v662_v61 = vmul.f32 0.1, %v500_v53  ;;  %v725_v1 = vmax.f32 %v497_v41, %v661_v51 }
 0x133   :  { %v694_v62 = vmul.f32 0.1, %v628_v54  ;;  %v660_v63 = vmul.f32 0.1, %v492_v59  ;;  %v757_v2 = vmax.f32 %v625_v42, %v693_v52  ;;  %v723_v5 = vmax.f32 %v489_v47, %v659_v57 }
 0x134   :  { %v692_v0 = vmul.f32 0.1, %v620_v60  ;;  %v726_v3 = vmax.f32 %v500_v53, %v662_v61  ;;  %v755_v6 = vmax.f32 %v617_v48, %v691_v58 }
 0x135   :  { %v758_v4 = vmax.f32 %v628_v54, %v694_v62  ;;  %v724_v7 = vmax.f32 %v492_v59, %v660_v63 }
 0x136   :  { %v756_v8 = vmax.f32 %v620_v60, %v692_v0  ;;  %v1330_v9 = vpack.c.bf16 %v726_v3, %v725_v1 }
 0x137   :  { %v1410_v10 = vpack.c.bf16 %v758_v4, %v757_v2  ;;  %v1325_v11 = vpack.c.bf16 %v724_v7, %v723_v5 }
 0x138   :  { %v1405_v12 = vpack.c.bf16 %v756_v8, %v755_v6  ;;  %1426 = vst [vmem:[%s1927_s3 + $0x78] sm:$0xff] %v1330_v9  }
 0x139   :  { %1442 = vst [vmem:[%s1927_s3 + $0xf8] sm:$0xff] %v1410_v10   ;;  %1425 = vst [vmem:[%s1927_s3 + $0x70] sm:$0xff] %v1325_v11  }
 0x13a   :  { %1441 = vst [vmem:[%s1927_s3 + $0xf0] sm:$0xff] %v1405_v12  }

// kernel: convolutional_set.6
= control target key start
LH: loop header
LB: loop body
LE: loop exit
PB: predicated region body
PF: predicated region fallthrough
CT: control target
= control target key end

     0   :  { %s7200_s12 = smov 0   ;;  %s7202_s13 = smov 0   ;;  %s9065_s0 = inlined_call_operand.vmem [shape: bf16[2,18,18,128], index: 0, kind: input, shape index: {}]   ;;  %s9066_s1 = inlined_call_operand.vmem [shape: bf16[1152,128], index: 1, kind: input, shape index: {}]   ;;  %s9067_s2 = inlined_call_operand.vmem [shape: f32[1,128], index: 2, kind: input, shape index: {}]   ;;  %s9068_s3 = inlined_call_operand.vmem [shape: bf16[2,16,16,128], index: 3, kind: output, shape index: {}]  }
   0x1   :  { %s7204_s14 = smov 0  }
   0x2 LB: > { %s22_s15 = sadd.s32 1, %s7174_s13  ;;  %p5398_p0 = scmp.ge.s32.totalorder %s7178_s14, 1  ;;  %s7178_s14 = sphi %s7204_s14, %s13_s14   ;;  %s7174_s13 = sphi %s7202_s13, %s9136_s13   ;;  %s7170_s12 = sphi %s7200_s12, %s9135_s12  }
   0x3   : > { %p23_p1 = scmp.ge.s32.totalorder %s22_s15, 2  ;;  %p168_p2 = scmp.lt.s32.totalorder %s7178_s14, 3 }
   0x5   : > { %s9138_s15 = smov (%p23_p1, %s22_s15), 0  ;;  %p169_p3 = pnand %p5398_p0, %p168_p2 }
   0x7   : > { %172 = sbr.rel (%p169_p3) target bundleno = 592 (0x250), region = 32 }
   0xe   : > { %v6966_v0 = vld [vmem:[%s9066_s1 + $0x40] sm:$0xff]   ;;  %p202_p4 = scmp.lt.s32.totalorder %s7170_s12, 1  ;;  %v6968_v2 = vld [vmem:[%s9066_s1 + $0x48] sm:$0xff]   ;;  %v6970_v4 = vld [vmem:[%s9066_s1 + $0x50] sm:$0xff]   ;;  %vm287_vm0 = vsmask.f32 3328 }
   0xf   : > { %v6967_v1 = vld [vmem:[%s9066_s1 + $0x100] sm:$0xff]   ;;  %6237 = vmatprep.subr.bf16.mxu1 %v6966_v0  ;;  %v6969_v3 = vld [vmem:[%s9066_s1 + $0x108] sm:$0xff]   ;;  %v6971_v5 = vld [vmem:[%s9066_s1 + $0x110] sm:$0xff]   ;;  %vm288_vm1 = vsmask.f32 7440  ;;  %vm1316_vm3 = vcmask 1042432  }
  0x10   : > { %6429 = vmatprep.subr.bf16.mxu0 %v6967_v1  ;;  %6238 = vmatpush3.bf16.msra.mxu1 %v6966_v0  ;;  %s9140_s12 = smov (!%p202_p4, %s7170_s12), 1  ;;  %v6972_v6 = vld [vmem:[%s9066_s1 + $0x58] sm:$0xff]   ;;  %v6974_v8 = vld [vmem:[%s9066_s1 + $0x60] sm:$0xff]   ;;  %v6976_v10 = vld [vmem:[%s9066_s1 + $0x68] sm:$0xff]   ;;  %vm1317_vm4 = vcmask 1046532  }
  0x11   : > { %6430 = vmatpush3.bf16.msra.mxu0 %v6967_v1  ;;  %6239 = vmatprep.subr.bf16.mxu1 %v6968_v2  ;;  %v6973_v7 = vld [vmem:[%s9066_s1 + $0x118] sm:$0xff]   ;;  %s6941_s5 = smul.u32 216, %s9140_s12  ;;  %v6975_v9 = vld [vmem:[%s9066_s1 + $0x120] sm:$0xff]   ;;  %v6977_v11 = vld [vmem:[%s9066_s1 + $0x128] sm:$0xff]   ;;  %s5893_s26 = sshll.u32 %s9140_s12, 7 }
  0x12   : > { %6431 = vmatprep.subr.bf16.mxu0 %v6969_v3  ;;  %v6978_v25 = vld [vmem:[%s9066_s1 + $0x70] sm:$0xff]   ;;  %v6980_v36 = vld [vmem:[%s9066_s1 + $0x78] sm:$0xff]   ;;  %vm7286_vm2 = vmor %vm287_vm0, %vm288_vm1  ;;  %s9005_s29 = scalar_lea.vmem %s9068_s3, %s5893_s26 }
  0x13   : > { %s7254_s16 = scalar_lea.vmem %s9065_s0, %s6941_s5  ;;  %v6979_v30 = vld [vmem:[%s9066_s1 + $0x130] sm:$0xff]   ;;  %v6981_v51 = vld [vmem:[%s9066_s1 + $0x138] sm:$0xff]   ;;  %vm7532_vm5 = vmor %vm1316_vm3, %vm1317_vm4 }
  0x14   : > { %6240 = vmatpush3.bf16.msra.mxu1 %v6968_v2  ;;  %v223_v12 = vld [vmem:[%s7254_s16] sm:$0xf]  ;;  %v224_v13 = vld [vmem:[%s7254_s16 + $0x4] sm:$0xf]  ;;  %v271_v14 = vld [vmem:[%s7254_s16 + $0x8] sm:$0x1] }
  0x15   : > { %6432 = vmatpush3.bf16.msra.mxu0 %v6969_v3  ;;  %6241 = vmatprep.subr.bf16.mxu1 %v6970_v4  ;;  %v291_v15 = vshrl.u32 %v223_v12, 16  ;;  %v294_v16 = vshll.u32 %v223_v12, 16  ;;  %v300_v17 = vshll.u32 %v224_v13, 16  ;;  %v304_v18 = vshrl.u32 %v224_v13, 16  ;;  %v5546_v20 = vld [vmem:[%s7254_s16 + $0xc] sm:$0xf] }
  0x16   : > { %6433 = vmatprep.subr.bf16.mxu0 %v6971_v5  ;;  %v310_v19 = vshll.u32 %v271_v14, 16  ;;  %v7267_v23 = vld [vmem:[%s7254_s16 + $0x10] sm:$0xf]  ;;  %v7270_v24 = vld [vmem:[%s7254_s16 + $0x14] sm:$0x1]  ;;  %v2187_v29 = vshrl.u32 %v5546_v20, 16 }
  0x17   : > { %v293_v21 = vrot.slane %v291_v15, 4  ;;  %v296_v22 = vrot.slane %v294_v16, 5  ;;  %v302_v26 = vrot.slane %v300_v17, 5  ;;  %v306_v27 = vrot.slane %v304_v18, 4  ;;  %v225_v35 = vld [vmem:[%s7254_s16 + $0xc] sm:$0xf] }
  0x18   : > { %6242 = vmatpush3.bf16.msra.mxu1 %v6970_v4  ;;  %v312_v28 = vrot.slane %v310_v19, 5  ;;  %v2190_v32 = vshll.u32 %v5546_v20, 16  ;;  %v2196_v33 = vshll.u32 %v7267_v23, 16  ;;  %v2200_v34 = vshrl.u32 %v7267_v23, 16  ;;  %v226_v42 = vld [vmem:[%s7254_s16 + $0x10] sm:$0xf] }
  0x19   : > { %6434 = vmatpush3.bf16.msra.mxu0 %v6971_v5  ;;  %6243 = vmatprep.subr.bf16.mxu1 %v6972_v6  ;;  %v297_v31 = vor.u32 %v296_v22, %v293_v21  ;;  %v307_v38 = vor.u32 %v306_v27, %v302_v26  ;;  %v2189_v39 = vrot.slane %v2187_v29, 4  ;;  %v2206_v40 = vshll.u32 %v7270_v24, 16  ;;  %v272_v55 = vld [vmem:[%s7254_s16 + $0x14] sm:$0x1]  ;;  %v5549_v57 = vld [vmem:[%s7254_s16 + $0x18] sm:$0xf] }
  0x1a   : > { %6435 = vmatprep.subr.bf16.mxu0 %v6973_v7  ;;  %v2960_v41 = vrot.slane %v7270_v24, 5  ;;  %v2192_v44 = vrot.slane %v2190_v32, 5  ;;  %v2198_v45 = vrot.slane %v2196_v33, 5  ;;  %v2202_v46 = vrot.slane %v2200_v34, 4  ;;  %v7303_v62 = vld [vmem:[%s7254_s16 + $0x1c] sm:$0xf] }
  0x1b   : > { %v298_v43 = vrot.slane %v297_v31, 4  ;;  %v308_v47 = vrot.slane %v307_v38, 4  ;;  %v2208_v48 = vrot.slane %v2206_v40, 5  ;;  %v315_v49 = vshrl.u32 %v225_v35, 16  ;;  %v6982_v3 = vld [vmem:[%s9066_s1] sm:$0xff]  }
  0x1c   : > { %6244 = vmatpush3.bf16.msra.mxu1 %v6972_v6  ;;  %v318_v50 = vshll.u32 %v225_v35, 16  ;;  %v2193_v53 = vor.u32 %v2192_v44, %v2189_v39  ;;  %v2203_v54 = vor.u32 %v2202_v46, %v2198_v45  ;;  %v324_v56 = vshll.u32 %v226_v42, 16  ;;  %v7311_v4 = vld [vmem:[%s9066_s1 + $0x140] sm:$0xff]   ;;  %v227_v21 = vld [vmem:[%s7254_s16 + $0x18] sm:$0xf]  ;;  %v6985_v46 = vld [vmem:[%s9066_s1 + $0x8] sm:$0xff]  }
  0x1d   : > { %6436 = vmatpush3.bf16.msra.mxu0 %v6973_v7  ;;  %6245 = vmatprep.subr.bf16.mxu1 %v6974_v8  ;;  %v303_v52 = vsel %vm7286_vm2, %v298_v43, %v302_v26  ;;  %v313_v58 = vsel %vm7286_vm2, %v308_v47, %v312_v28  ;;  %v317_v59 = vrot.slane %v315_v49, 4  ;;  %v328_v61 = vshrl.u32 %v226_v42, 16  ;;  %v228_v28 = vld [vmem:[%s7254_s16 + $0x1c] sm:$0xf]  ;;  %v273_v33 = vld [vmem:[%s7254_s16 + $0x20] sm:$0x1] }
  0x1e   : > { %6437 = vmatprep.subr.bf16.mxu0 %v6975_v9  ;;  %v320_v60 = vrot.slane %v318_v50, 5  ;;  %v5402_v63 = vcombine.low %v303_v52, %v313_v58  ;;  %v2194_v0 = vrot.slane %v2193_v53, 4  ;;  %v2204_v1 = vrot.slane %v2203_v54, 4  ;;  %v5552_v39 = vld [vmem:[%s7254_s16 + $0x24] sm:$0xf] }
  0x1f   : > { %v326_v2 = vrot.slane %v324_v56, 5  ;;  %v330_v6 = vrot.slane %v328_v61, 4  ;;  %v334_v7 = vshll.u32 %v272_v55, 16  ;;  %v2214_v12 = vshll.u32 %v5549_v57, 16  ;;  %v229_v52 = vld [vmem:[%s7254_s16 + $0x24] sm:$0xf] }
  0x20   : > { %6246 = vmatpush3.bf16.msra.mxu1 %v6974_v8  ;;  %v321_v5 = vor.u32 %v320_v60, %v317_v59  ;;  %v7314_v8 = vld [vmem:[%s7254_s16 + $0x20] sm:$0x1]  ;;  %6253 = vmatprep.mubr.bf16.mxu1 %v5402_v63  ;;  %v2220_v19 = vshll.u32 %v7303_v62, 16  ;;  %v2224_v20 = vshrl.u32 %v7303_v62, 16  ;;  %v2964_v27 = vrot.slane %v7303_v62, 5  ;;  %v6984_v63 = vld [vmem:[%s9066_s1 + $0x148] sm:$0xff]  }
  0x21   : > { %6438 = vmatpush3.bf16.msra.mxu0 %v6975_v9  ;;  %6247 = vmatprep.subr.bf16.mxu1 %v6976_v10  ;;  %v2199_v9 = vsel %vm7286_vm2, %v2194_v0, %v2198_v45  ;;  %v331_v15 = vor.u32 %v330_v6, %v326_v2  ;;  %v336_v16 = vrot.slane %v334_v7, 5  ;;  %v2216_v18 = vrot.slane %v2214_v12, 5  ;;  %v7339_v45 = vld [vmem:[%s7254_s16 + $0x28] sm:$0xf] }
  0x22   : > { %6439 = vmatprep.subr.bf16.mxu0 %v6977_v11  ;;  %v322_v14 = vrot.slane %v321_v5, 4  ;;  %v2230_v26 = vshll.u32 %v7314_v8, 16  ;;  %v2226_v31 = vrot.slane %v2224_v20, 4  ;;  %v2967_v32 = vrot.slane %v7314_v8, 5  ;;  %v230_v5 = vld [vmem:[%s7254_s16 + $0x28] sm:$0xf] }
  0x23   : > { %v339_v38 = vshrl.u32 %v227_v21, 16  ;;  %v342_v44 = vshll.u32 %v227_v21, 16  ;;  %v352_v49 = vshrl.u32 %v228_v28, 16  ;;  %v358_v50 = vshll.u32 %v273_v33, 16  ;;  %v7370_v33 = vld [vmem:[%s7254_s16 + $0x34] sm:$0xf] }
  0x24   : > { %6248 = vmatpush3.bf16.msra.mxu1 %v6976_v10  ;;  %v2209_v10 = vsel %vm7286_vm2, %v2204_v1, %v2208_v48  ;;  %v327_v22 = vsel %vm7286_vm2, %v322_v14, %v326_v2  ;;  %v2232_v35 = vrot.slane %v2230_v26, 5  ;;  %v348_v48 = vshll.u32 %v228_v28, 16 }
  0x25   : > { %6440 = vmatpush3.bf16.msra.mxu0 %v6977_v11  ;;  %6249 = vmatprep.subr.bf16.mxu1 %v6978_v25  ;;  %v2211_v11 = vshrl.u32 %v5549_v57, 16  ;;  %v5594_v13 = vcombine.low %v2199_v9, %v2209_v10  ;;  %v341_v47 = vrot.slane %v339_v38, 4  ;;  %v344_v55 = vrot.slane %v342_v44, 5 }
  0x26   : > { %6441 = vmatprep.subr.bf16.mxu0 %v6979_v30  ;;  %v2235_v56 = vshrl.u32 %v5552_v39, 16  ;;  %v350_v57 = vrot.slane %v348_v48, 5  ;;  %v354_v58 = vrot.slane %v352_v49, 4  ;;  %v360_v59 = vrot.slane %v358_v50, 5  ;;  %v6987_v48 = vld [vmem:[%s9066_s1 + $0x158] sm:$0xff]  }
  0x27   : > { %v2213_v17 = vrot.slane %v2211_v11, 4  ;;  %6445 = vmatprep.mubr.bf16.mxu0 %v5594_v13  ;;  %v2238_v60 = vshll.u32 %v5552_v39, 16  ;;  %v345_v0 = vor.u32 %v344_v55, %v341_v47  ;;  %v2244_v2 = vshll.u32 %v7339_v45, 16  ;;  %v274_v11 = vld [vmem:[%s7254_s16 + $0x2c] sm:$0x1] }
  0x28   : > { %6250 = vmatpush3.bf16.msra.mxu1 %v6978_v25  ;;  %v332_v25 = vrot.slane %v331_v15, 4  ;;  %v2237_v1 = vrot.slane %v2235_v56, 4  ;;  %v355_v7 = vor.u32 %v354_v58, %v350_v57  ;;  %v2248_v10 = vshrl.u32 %v7339_v45, 16 }
  0x29   : > { %6442 = vmatpush3.bf16.msra.mxu0 %v6979_v30  ;;  %6251 = vmatprep.subr.bf16.mxu1 %v6980_v36  ;;  %v2217_v29 = vor.u32 %v2216_v18, %v2213_v17  ;;  %v2222_v30 = vrot.slane %v2220_v19, 5  ;;  %v2240_v9 = vrot.slane %v2238_v60, 5  ;;  %v346_v12 = vrot.slane %v345_v0, 4  ;;  %v6994_v60 = vld [vmem:[%s9066_s1 + $0x20] sm:$0xff]  }
  0x2a   : > { %6443 = vmatprep.subr.bf16.mxu0 %v6981_v51  ;;  %v337_v34 = vsel %vm7286_vm2, %v332_v25, %v336_v16  ;;  %v2246_v13 = vrot.slane %v2244_v2, 5  ;;  %v363_v15 = vshrl.u32 %v229_v52, 16  ;;  %v5555_v16 = vld [vmem:[%s7254_s16 + $0x30] sm:$0xf]  ;;  %v356_v17 = vrot.slane %v355_v7, 4 }
  0x2b   : > { %v5403_v40 = vcombine.low %v327_v22, %v337_v34  ;;  %v2218_v42 = vrot.slane %v2217_v29, 4  ;;  %v2227_v43 = vor.u32 %v2226_v31, %v2222_v30  ;;  %v2241_v18 = vor.u32 %v2240_v9, %v2237_v1  ;;  %v6991_v34 = vld [vmem:[%s9066_s1 + $0x18] sm:$0xff]  }
  0x2c   : > { %6252 = vmatpush3.bf16.msra.mxu1 %v6980_v36  ;;  %v7335_v36 = vrot.slane %v2964_v27, 4  ;;  %v2250_v19 = vrot.slane %v2248_v10, 4  ;;  %v366_v20 = vshll.u32 %v229_v52, 16  ;;  %v351_v21 = vsel %vm7286_vm2, %v346_v12, %v350_v57  ;;  %v275_v2 = vld [vmem:[%s7254_s16 + $0x38] sm:$0x1] }
  0x2d   : > { %6444 = vmatpush3.bf16.msra.mxu0 %v6981_v51  ;;  %6285 = vmatprep.subr.bf16.mxu1 %v6982_v3  ;;  %v7345_v51 = vld [vmem:[%s7254_s16 + $0x2c] sm:$0x1]  ;;  %v2223_v53 = vsel %vm7286_vm2, %v2218_v42, %v2222_v30  ;;  %v2228_v54 = vrot.slane %v2227_v43, 4  ;;  %v365_v25 = vrot.slane %v363_v15, 4  ;;  %v372_v26 = vshll.u32 %v230_v5, 16 }
  0x2e   : > { %6477 = vmatprep.subr.bf16.mxu0 %v7311_v4  ;;  %v2254_v14 = vshll.u32 %v7345_v51, 16  ;;  %v361_v28 = vsel %vm7286_vm2, %v356_v17, %v360_v59  ;;  %v2242_v29 = vrot.slane %v2241_v18, 4  ;;  %v2251_v30 = vor.u32 %v2250_v19, %v2246_v13  ;;  %v232_v59 = vld [vmem:[%s7254_s16 + $0x34] sm:$0xf]  ;;  %v5558_v9 = vld [vmem:[%s7254_s16 + $0x3c] sm:$0xf] }
  0x2f   : > { %6254 = vmatmul.mubr.bf16.vlgmr.msra.gmra.mrb[0].mxu1 %v5403_v40  ;;  %v2233_v61 = vsel %vm7286_vm2, %v2228_v54, %v2232_v35  ;;  %v368_v31 = vrot.slane %v366_v20, 5  ;;  %v5404_v35 = vcombine.low %v351_v21, %v361_v28  ;;  %v374_v38 = vrot.slane %v372_v26, 5  ;;  %v231_v54 = vld [vmem:[%s7254_s16 + $0x30] sm:$0xf]  ;;  %v7404_v19 = vld [vmem:[%s7254_s16 + $0x40] sm:$0xf] }
  0x30   : > { %6286 = vmatpush3.bf16.msra.mxu1 %v6982_v3  ;;  %v6988_v3 = vld [vmem:[%s9066_s1 + $0x10] sm:$0xff]   ;;  %v5595_v6 = vcombine.low %v2223_v53, %v2233_v61  ;;  %v2256_v22 = vrot.slane %v2254_v14, 5  ;;  %v376_v39 = vshrl.u32 %v230_v5, 16  ;;  %v382_v40 = vshll.u32 %v274_v11, 16  ;;  %v6996_v14 = vld [vmem:[%s9066_s1 + $0x28] sm:$0xff]   ;;  %v6989_v20 = vld [vmem:[%s9066_s1 + $0x160] sm:$0xff]  }
  0x31   : > { %6287 = vmatprep.subr.bf16.mxu1 %v6985_v46  ;;  %v2247_v42 = vsel %vm7286_vm2, %v2242_v29, %v2246_v13  ;;  %v2252_v43 = vrot.slane %v2251_v30, 4  ;;  %v369_v44 = vor.u32 %v368_v31, %v365_v25  ;;  %v2259_v47 = vshrl.u32 %v5555_v16, 16  ;;  %6257 = vmatprep.mubr.bf16.mxu1 %v5404_v35  ;;  %v7412_v28 = vld [vmem:[%s7254_s16 + $0x44] sm:$0x1]  ;;  %v6998_v35 = vld [vmem:[%s9066_s1 + $0x30] sm:$0xff]  }
  0x32   : > { %6446 = vmatmul.mubr.bf16.vlgmr.msra.gmra.mrb[0].mxu0 %v5595_v6  ;;  %v378_v49 = vrot.slane %v376_v39, 4  ;;  %v384_v50 = vrot.slane %v382_v40, 5  ;;  %v2262_v52 = vshll.u32 %v5555_v16, 16  ;;  %v2268_v53 = vshll.u32 %v7370_v33, 16 }
  0x33   : > { %6478 = vmatpush3.bf16.msra.mxu0 %v7311_v4  ;;  %v6986_v4 = vld [vmem:[%s9066_s1 + $0x150] sm:$0xff]   ;;  %v2257_v55 = vsel %vm7286_vm2, %v2252_v43, %v2256_v22  ;;  %v370_v56 = vrot.slane %v369_v44, 4  ;;  %v2261_v57 = vrot.slane %v2259_v47, 4  ;;  %v2272_v58 = vshrl.u32 %v7370_v33, 16 }
  0x34   : > { %6288 = vmatpush3.bf16.msra.mxu1 %v6985_v46  ;;  %6479 = vmatprep.subr.bf16.mxu0 %v6984_v63  ;;  %v7381_v46 = vld [vmem:[%s7254_s16 + $0x38] sm:$0x1]  ;;  %v5596_v61 = vcombine.low %v2247_v42, %v2257_v55  ;;  %v2264_v0 = vrot.slane %v2262_v52, 5  ;;  %v2270_v1 = vrot.slane %v2268_v53, 5  ;;  %v387_v7 = vshrl.u32 %v231_v54, 16 }
  0x35   : > { %6289 = vmatprep.subr.bf16.mxu1 %v6988_v3  ;;  %v375_v5 = vsel %vm7286_vm2, %v370_v56, %v374_v38  ;;  %v2278_v6 = vshll.u32 %v7381_v46, 16  ;;  %v390_v12 = vshll.u32 %v231_v54, 16  ;;  %v396_v13 = vshll.u32 %v232_v59, 16  ;;  %v234_v55 = vld [vmem:[%s7254_s16 + $0x40] sm:$0xf] }
  0x36   : > { %6449 = vmatprep.mubr.bf16.mxu0 %v5596_v61  ;;  %v2265_v11 = vor.u32 %v2264_v0, %v2261_v57  ;;  %v389_v17 = vrot.slane %v387_v7, 4  ;;  %v400_v18 = vshrl.u32 %v232_v59, 16  ;;  %v2283_v40 = vshrl.u32 %v5558_v9, 16 }
  0x37   : > { %6480 = vmatpush3.bf16.msra.mxu0 %v6984_v63  ;;  %v379_v63 = vor.u32 %v378_v49, %v374_v38  ;;  %v2280_v16 = vrot.slane %v2278_v6, 5  ;;  %v392_v25 = vrot.slane %v390_v12, 5  ;;  %v398_v26 = vrot.slane %v396_v13, 5 }
  0x38   : > { %6290 = vmatpush3.bf16.msra.mxu1 %v6988_v3  ;;  %6481 = vmatprep.subr.bf16.mxu0 %v6986_v4  ;;  %v2274_v3 = vrot.slane %v2272_v58, 4  ;;  %v2266_v22 = vrot.slane %v2265_v11, 4  ;;  %v402_v31 = vrot.slane %v400_v18, 4  ;;  %v2286_v42 = vshll.u32 %v5558_v9, 16  ;;  %v5561_v9 = vld [vmem:[%s7254_s16 + $0x48] sm:$0xf] }
  0x39   : > { %6291 = vmatprep.subr.bf16.mxu1 %v6991_v34  ;;  %v380_v10 = vrot.slane %v379_v63, 4  ;;  %v393_v39 = vor.u32 %v392_v25, %v389_v17  ;;  %v2292_v49 = vshll.u32 %v7404_v19, 16  ;;  %v2285_v53 = vrot.slane %v2283_v40, 4  ;;  %v276_v63 = vld [vmem:[%s7254_s16 + $0x44] sm:$0x1] }
  0x3a   : > { %v2275_v15 = vor.u32 %v2274_v3, %v2270_v1  ;;  %v2271_v38 = vsel %vm7286_vm2, %v2266_v22, %v2270_v1  ;;  %v403_v44 = vor.u32 %v402_v31, %v398_v26  ;;  %v2288_v54 = vrot.slane %v2286_v42, 5  ;;  %v7445_v22 = vld [vmem:[%s7254_s16 + $0x50] sm:$0x1]  ;;  %v6993_v31 = vld [vmem:[%s9066_s1 + $0x178] sm:$0xff]  }
  0x3b   : > { %6482 = vmatpush3.bf16.msra.mxu0 %v6986_v4  ;;  %v385_v21 = vsel %vm7286_vm2, %v380_v10, %v384_v50  ;;  %v406_v4 = vshll.u32 %v275_v2, 16  ;;  %v394_v52 = vrot.slane %v393_v39, 4  ;;  %v2294_v57 = vrot.slane %v2292_v49, 5  ;;  %v7000_v2 = vld [vmem:[%s9066_s1 + $0x38] sm:$0xff]  }
  0x3c   : > { %6292 = vmatpush3.bf16.msra.mxu1 %v6991_v34  ;;  %6483 = vmatprep.subr.bf16.mxu0 %v6987_v48  ;;  %v5405_v29 = vcombine.low %v375_v5, %v385_v21  ;;  %v2276_v30 = vrot.slane %v2275_v15, 4  ;;  %v233_v34 = vld [vmem:[%s7254_s16 + $0x3c] sm:$0xf]  ;;  %v404_v56 = vrot.slane %v403_v44, 4  ;;  %v2296_v58 = vshrl.u32 %v7404_v19, 16  ;;  %v6992_v15 = vld [vmem:[%s9066_s1 + $0x170] sm:$0xff]  }
  0x3d   : > { %6293 = vmatprep.subr.bf16.mxu1 %v6994_v60  ;;  %v408_v47 = vrot.slane %v406_v4, 5  ;;  %v2302_v59 = vshll.u32 %v7412_v28, 16  ;;  %v2289_v61 = vor.u32 %v2288_v54, %v2285_v53  ;;  %v411_v0 = vshrl.u32 %v233_v34, 16  ;;  %v7456_v4 = vld [vmem:[%s9066_s1 + $0x80] sm:$0xff]   ;;  %v236_v53 = vld [vmem:[%s7254_s16 + $0x4c] sm:$0xf] }
  0x3e   : > { %6258 = vmatmul.mubr.bf16.gmra.mrb[4].mxu1 %v5405_v29  ;;  %v2281_v43 = vsel %vm7286_vm2, %v2276_v30, %v2280_v16  ;;  %v414_v1 = vshll.u32 %v233_v34, 16  ;;  %v2298_v3 = vrot.slane %v2296_v58, 4  ;;  %v420_v7 = vshll.u32 %v234_v55, 16  ;;  %v235_v30 = vld [vmem:[%s7254_s16 + $0x48] sm:$0xf] }
  0x3f   : > { %6484 = vmatpush3.bf16.msra.mxu0 %v6987_v48  ;;  %v5597_v50 = vcombine.low %v2271_v38, %v2281_v43  ;;  %v6990_v48 = vld [vmem:[%s9066_s1 + $0x168] sm:$0xff]   ;;  %v409_v5 = vsel %vm7286_vm2, %v404_v56, %v408_v47  ;;  %v2304_v6 = vrot.slane %v2302_v59, 5  ;;  %v2290_v11 = vrot.slane %v2289_v61, 4  ;;  %v277_v54 = vld [vmem:[%s7254_s16 + $0x50] sm:$0x1] }
  0x40   : > { %6294 = vmatpush3.bf16.msra.mxu1 %v6994_v60  ;;  %6485 = vmatprep.subr.bf16.mxu0 %v6989_v20  ;;  %v399_v60 = vsel %vm7286_vm2, %v394_v52, %v398_v26  ;;  %v413_v12 = vrot.slane %v411_v0, 4  ;;  %v416_v13 = vrot.slane %v414_v1, 5  ;;  %v2299_v16 = vor.u32 %v2298_v3, %v2294_v57  ;;  %v5564_v58 = vld [vmem:[%s7254_s16 + $0x54] sm:$0xf]  ;;  %v7470_v0 = vld [vmem:[%s7254_s16 + $0x58] sm:$0xf] }
  0x41   : > { %6295 = vmatprep.subr.bf16.mxu1 %v6996_v14  ;;  %6450 = vmatmul.mubr.bf16.gmra.mrb[4].mxu0 %v5597_v50  ;;  %v5406_v10 = vcombine.low %v399_v60, %v409_v5  ;;  %v422_v17 = vrot.slane %v420_v7, 5  ;;  %v424_v18 = vshrl.u32 %v234_v55, 16  ;;  %v430_v21 = vshll.u32 %v276_v63, 16 }
  0x42   : > { %v417_v25 = vor.u32 %v416_v13, %v413_v12  ;;  %v2307_v26 = vshrl.u32 %v5561_v9, 16  ;;  %v2310_v29 = vshll.u32 %v5561_v9, 16  ;;  %v2300_v34 = vrot.slane %v2299_v16, 4 }
  0x43   : > { %6486 = vmatpush3.bf16.msra.mxu0 %v6989_v20  ;;  %6261 = vmatprep.mubr.bf16.mxu1 %v5406_v10  ;;  %v2295_v20 = vsel %vm7286_vm2, %v2290_v11, %v2294_v57  ;;  %v432_v38 = vrot.slane %v430_v21, 5  ;;  %v2326_v52 = vshll.u32 %v7445_v22, 16  ;;  %v435_v61 = vshrl.u32 %v235_v30, 16 }
  0x44   : > { %6296 = vmatpush3.bf16.msra.mxu1 %v6996_v14  ;;  %v7439_v14 = vld [vmem:[%s7254_s16 + $0x4c] sm:$0xf]  ;;  %6487 = vmatprep.subr.bf16.mxu0 %v6990_v48  ;;  %v418_v40 = vrot.slane %v417_v25, 4  ;;  %v2309_v42 = vrot.slane %v2307_v26, 4  ;;  %v2312_v43 = vrot.slane %v2310_v29, 5  ;;  %v2305_v47 = vsel %vm7286_vm2, %v2300_v34, %v2304_v6  ;;  %v7475_v6 = vld [vmem:[%s9066_s1 + $0x180] sm:$0xff]  }
  0x45   : > { %6297 = vmatprep.subr.bf16.mxu1 %v6998_v35  ;;  %v2316_v39 = vshll.u32 %v7439_v14, 16  ;;  %v2320_v44 = vshrl.u32 %v7439_v14, 16  ;;  %v5598_v55 = vcombine.low %v2295_v20, %v2305_v47  ;;  %v2328_v60 = vrot.slane %v2326_v52, 5  ;;  %v7482_v20 = vld [vmem:[%s7254_s16 + $0x5c] sm:$0x1] }
  0x46   : > { %v2313_v56 = vor.u32 %v2312_v43, %v2309_v42  ;;  %v438_v63 = vshll.u32 %v235_v30, 16  ;;  %v448_v3 = vshrl.u32 %v236_v53, 16  ;;  %v437_v9 = vrot.slane %v435_v61, 4  ;;  %v238_v43 = vld [vmem:[%s7254_s16 + $0x58] sm:$0xf] }
  0x47   : > { %6488 = vmatpush3.bf16.msra.mxu0 %v6990_v48  ;;  %v2318_v50 = vrot.slane %v2316_v39, 5  ;;  %v423_v48 = vsel %vm7286_vm2, %v418_v40, %v422_v17  ;;  %v2322_v57 = vrot.slane %v2320_v44, 4  ;;  %6453 = vmatprep.mubr.bf16.mxu0 %v5598_v55  ;;  %v454_v11 = vshll.u32 %v277_v54, 16  ;;  %v5567_v52 = vld [vmem:[%s7254_s16 + $0x60] sm:$0xf] }
  0x48   : > { %6298 = vmatpush3.bf16.msra.mxu1 %v6998_v35  ;;  %v426_v35 = vrot.slane %v424_v18, 4  ;;  %6489 = vmatprep.subr.bf16.mxu0 %v6992_v15  ;;  %v2314_v1 = vrot.slane %v2313_v56, 4  ;;  %v440_v10 = vrot.slane %v438_v63, 5  ;;  %v450_v18 = vrot.slane %v448_v3, 4 }
  0x49   : > { %6299 = vmatprep.subr.bf16.mxu1 %v7000_v2  ;;  %v2323_v5 = vor.u32 %v2322_v57, %v2318_v50  ;;  %v456_v21 = vrot.slane %v454_v11, 5  ;;  %v2331_v25 = vshrl.u32 %v5564_v58, 16  ;;  %v2334_v29 = vshll.u32 %v5564_v58, 16 }
  0x4a   : > { %v427_v49 = vor.u32 %v426_v35, %v422_v17  ;;  %v2319_v13 = vsel %vm7286_vm2, %v2314_v1, %v2318_v50  ;;  %v441_v17 = vor.u32 %v440_v10, %v437_v9  ;;  %v2340_v30 = vshll.u32 %v7470_v0, 16  ;;  %v237_v35 = vld [vmem:[%s7254_s16 + $0x54] sm:$0xf]  ;;  %v278_v50 = vld [vmem:[%s7254_s16 + $0x5c] sm:$0x1] }
  0x4b   : > { %6490 = vmatpush3.bf16.msra.mxu0 %v6992_v15  ;;  %v2324_v15 = vrot.slane %v2323_v5, 4  ;;  %v2344_v34 = vshrl.u32 %v7470_v0, 16  ;;  %v2333_v42 = vrot.slane %v2331_v25, 4  ;;  %v459_v55 = vshrl.u32 %v237_v35, 16  ;;  %v7510_v25 = vld [vmem:[%s7254_s16 + $0x60] sm:$0xf] }
  0x4c   : > { %6300 = vmatpush3.bf16.msra.mxu1 %v7000_v2  ;;  %v428_v59 = vrot.slane %v427_v49, 4  ;;  %v444_v2 = vshll.u32 %v236_v53, 16  ;;  %6491 = vmatprep.subr.bf16.mxu0 %v6993_v31  ;;  %v442_v39 = vrot.slane %v441_v17, 4  ;;  %v2342_v44 = vrot.slane %v2340_v30, 5  ;;  %v7506_v17 = vld [vmem:[%s7254_s16 + $0x68] sm:$0x1] }
  0x4d   : > { %6333 = vmatprep.subr.bf16.mxu1 %v7456_v4  ;;  %v2329_v26 = vsel %vm7286_vm2, %v2324_v15, %v2328_v60  ;;  %v2346_v47 = vrot.slane %v2344_v34, 4  ;;  %v2350_v49 = vshll.u32 %v7482_v20, 16  ;;  %v7497_v60 = vld [vmem:[%s7254_s16 + $0x64] sm:$0xf]  ;;  %v461_v63 = vrot.slane %v459_v55, 4 }
  0x4e   : > { %v433_v7 = vsel %vm7286_vm2, %v428_v59, %v432_v38  ;;  %v446_v16 = vrot.slane %v444_v2, 5  ;;  %v5599_v38 = vcombine.low %v2319_v13, %v2329_v26  ;;  %v468_v59 = vshll.u32 %v238_v43, 16 }
  0x4f   : > { %v5407_v12 = vcombine.low %v423_v48, %v433_v7  ;;  %6492 = vmatpush3.bf16.msra.mxu0 %v6993_v31  ;;  %v2336_v31 = vrot.slane %v2334_v29, 5  ;;  %v462_v48 = vshll.u32 %v237_v35, 16  ;;  %v2347_v57 = vor.u32 %v2346_v47, %v2342_v44  ;;  %v7513_v35 = vld [vmem:[%s7254_s16 + $0x64] sm:$0xf] }
  0x50   : > { %6525 = vmatprep.subr.bf16.mxu0 %v7475_v6  ;;  %v451_v40 = vor.u32 %v450_v18, %v446_v16  ;;  %6454 = vmatmul.mubr.bf16.gmra.mrb[8].mxu0 %v5599_v38  ;;  %v447_v53 = vsel %vm7286_vm2, %v442_v39, %v446_v16  ;;  %v2352_v58 = vrot.slane %v2350_v49, 5  ;;  %v472_v5 = vshrl.u32 %v238_v43, 16  ;;  %v279_v43 = vld [vmem:[%s7254_s16 + $0x68] sm:$0x1] }
  0x51   : > { %6262 = vmatmul.mubr.bf16.gmra.mrb[8].mxu1 %v5407_v12  ;;  %v2337_v56 = vor.u32 %v2336_v31, %v2333_v42  ;;  %v464_v1 = vrot.slane %v462_v48, 5  ;;  %v2348_v7 = vrot.slane %v2347_v57, 4  ;;  %v470_v9 = vrot.slane %v468_v59, 5 }
  0x52   : > { %v452_v54 = vrot.slane %v451_v40, 4  ;;  %v474_v11 = vrot.slane %v472_v5, 4  ;;  %v478_v12 = vshll.u32 %v278_v50, 16  ;;  %v2355_v13 = vshrl.u32 %v5567_v52, 16  ;;  %v5618_v50 = vld [vmem:[%s7254_s16 + $0xc] sm:$0xe] }
  0x53   : > { %v2338_v3 = vrot.slane %v2337_v56, 4  ;;  %v465_v10 = vor.u32 %v464_v1, %v461_v63  ;;  %v2353_v16 = vsel %vm7286_vm2, %v2348_v7, %v2352_v58  ;;  %v2358_v18 = vshll.u32 %v5567_v52, 16  ;;  %v7528_v5 = vld [vmem:[%s7254_s16 + $0x6c] sm:$0xf] }
  0x54   : > { %v457_v61 = vsel %vm7286_vm2, %v452_v54, %v456_v21  ;;  %v2364_v21 = vshll.u32 %v7497_v60, 16  ;;  %v475_v30 = vor.u32 %v474_v11, %v470_v9  ;;  %v480_v34 = vrot.slane %v478_v12, 5 }
  0x55   : > { %v5408_v2 = vcombine.low %v447_v53, %v457_v61  ;;  %v2343_v15 = vsel %vm7286_vm2, %v2338_v3, %v2342_v44  ;;  %v466_v29 = vrot.slane %v465_v10, 4  ;;  %v2357_v38 = vrot.slane %v2355_v13, 4 }
  0x56   : > { %v5600_v26 = vcombine.low %v2343_v15, %v2353_v16  ;;  %v2360_v39 = vrot.slane %v2358_v18, 5  ;;  %v2366_v40 = vrot.slane %v2364_v21, 5  ;;  %v2368_v42 = vshrl.u32 %v7497_v60, 16  ;;  %v7540_v21 = vld [vmem:[%s7254_s16 + $0x70] sm:$0xf] }
  0x57   : > { %6265 = vmatprep.mubr.bf16.mxu1 %v5408_v2  ;;  %v471_v31 = vsel %vm7286_vm2, %v466_v29, %v470_v9  ;;  %v476_v44 = vrot.slane %v475_v30, 4  ;;  %v2374_v47 = vshll.u32 %v7506_v17, 16  ;;  %v483_v49 = vshrl.u32 %v7510_v25, 16  ;;  %v7084_v9 = vld [vmem:[%s7254_s16 + $0xb4] sm:$0xff]  }
  0x58   : > { %6457 = vmatprep.mubr.bf16.mxu0 %v5600_v26  ;;  %v2361_v52 = vor.u32 %v2360_v39, %v2357_v38  ;;  %v2370_v53 = vrot.slane %v2368_v42, 4  ;;  %v486_v54 = vshll.u32 %v7510_v25, 16  ;;  %v492_v55 = vshll.u32 %v7513_v35, 16 }
  0x59   : > { %v481_v48 = vsel %vm7286_vm2, %v476_v44, %v480_v34  ;;  %v2376_v56 = vrot.slane %v2374_v47, 5  ;;  %v485_v57 = vrot.slane %v483_v49, 4  ;;  %v496_v58 = vshrl.u32 %v7513_v35, 16  ;;  %v7551_v47 = vld [vmem:[%s7254_s16 + $0x78] sm:$0xf] }
  0x5a   : > { %v5409_v59 = vcombine.low %v471_v31, %v481_v48  ;;  %v2362_v61 = vrot.slane %v2361_v52, 4  ;;  %v2371_v63 = vor.u32 %v2370_v53, %v2366_v40  ;;  %v488_v1 = vrot.slane %v486_v54, 5  ;;  %v7562_v54 = vld [vmem:[%s7254_s16 + $0x7c] sm:$0xf] }
  0x5b   : > { %v494_v2 = vrot.slane %v492_v55, 5  ;;  %v498_v3 = vrot.slane %v496_v58, 4  ;;  %v502_v7 = vshll.u32 %v279_v43, 16  ;;  %v5634_v10 = vrot.slane %v5618_v50, 9  ;;  %v281_v58 = vld [vmem:[%s7254_s16 + $0x80] sm:$0x1] }
  0x5c   : > { %6266 = vmatmul.mubr.bf16.gmra.mrb[12].mxu1 %v5409_v59  ;;  %v2367_v11 = vsel %vm7286_vm2, %v2362_v61, %v2366_v40  ;;  %v2372_v12 = vrot.slane %v2371_v63, 4  ;;  %v489_v13 = vor.u32 %v488_v1, %v485_v57  ;;  %v2957_v15 = vrot.slane %v7267_v23, 5  ;;  %v280_v40 = vld [vmem:[%s7254_s16 + $0x74] sm:$0x1]  ;;  %v5619_v23 = vld [vmem:[%s7254_s16 + $0x18] sm:$0xe] }
  0x5d   : > { %v499_v16 = vor.u32 %v498_v3, %v494_v2  ;;  %v504_v18 = vrot.slane %v502_v7, 5  ;;  %v507_v26 = vshrl.u32 %v7528_v5, 16  ;;  %v510_v29 = vshll.u32 %v7528_v5, 16 }
  0x5e   : > { %v2377_v30 = vsel %vm7286_vm2, %v2372_v12, %v2376_v56  ;;  %v490_v34 = vrot.slane %v489_v13, 4  ;;  %v2958_v38 = vsel %vm7532_vm5, %v5634_v10, %v2957_v15  ;;  %v2959_v39 = vrot.slane %v2957_v15, 4  ;;  %v5620_v13 = vld [vmem:[%s7254_s16 + $0x24] sm:$0xe] }
  0x5f   : > { %v5601_v42 = vcombine.low %v2367_v11, %v2377_v30  ;;  %v500_v43 = vrot.slane %v499_v16, 4  ;;  %v509_v31 = vrot.slane %v507_v26, 4  ;;  %v512_v44 = vrot.slane %v510_v29, 5  ;;  %v7584_v16 = vld [vmem:[%s7254_s16 + $0x84] sm:$0xf]  ;;  %v6997_v29 = vld [vmem:[%s9066_s1 + $0x188] sm:$0xff]  }
  0x60   : > { %v495_v49 = vsel %vm7286_vm2, %v490_v34, %v494_v2  ;;  %v2961_v50 = vsel %vm7532_vm5, %v2959_v39, %v2960_v41  ;;  %v516_v52 = vshll.u32 %v7540_v21, 16  ;;  %v520_v53 = vshrl.u32 %v7540_v21, 16 }
  0x61   : > { %6458 = vmatmul.mubr.bf16.gmra.mrb[12].mxu0 %v5601_v42  ;;  %v505_v55 = vsel %vm7286_vm2, %v500_v43, %v504_v18  ;;  %v5650_v48 = vcombine.low %v2958_v38, %v2961_v50  ;;  %v513_v56 = vor.u32 %v512_v44, %v509_v31  ;;  %v526_v57 = vshll.u32 %v280_v40, 16  ;;  %v7592_v40 = vld [vmem:[%s7254_s16 + $0x88] sm:$0xf]  ;;  %v282_v31 = vld [vmem:[%s7254_s16 + $0x8c] sm:$0x1] }
  0x62   : > { %v5410_v59 = vcombine.low %v495_v49, %v505_v55  ;;  %v518_v24 = vrot.slane %v516_v52, 5  ;;  %v522_v61 = vrot.slane %v520_v53, 4  ;;  %v5635_v63 = vrot.slane %v5619_v23, 9 }
  0x63   : > { %6493 = vmatprep.mubr.bf16.mxu0 %v5650_v48  ;;  %v514_v41 = vrot.slane %v513_v56, 4  ;;  %v528_v1 = vrot.slane %v526_v57, 5  ;;  %v2968_v2 = vsel %vm7532_vm5, %v7335_v36, %v2967_v32  ;;  %v531_v3 = vshrl.u32 %v7551_v47, 16 }
  0x64   : > { %6269 = vmatprep.mubr.bf16.mxu1 %v5410_v59  ;;  %v523_v7 = vor.u32 %v522_v61, %v518_v24  ;;  %v2965_v10 = vsel %vm7532_vm5, %v5635_v63, %v2964_v27  ;;  %v534_v11 = vshll.u32 %v7551_v47, 16  ;;  %v540_v12 = vshll.u32 %v7562_v54, 16 }
  0x65   : > { %v519_v8 = vsel %vm7286_vm2, %v514_v41, %v518_v24  ;;  %v5651_v15 = vcombine.low %v2965_v10, %v2968_v2  ;;  %v533_v32 = vrot.slane %v531_v3, 4  ;;  %v544_v36 = vshrl.u32 %v7562_v54, 16  ;;  %v7613_v2 = vld [vmem:[%s7254_s16 + $0x90] sm:$0xf]  ;;  %v7616_v3 = vld [vmem:[%s7254_s16 + $0x94] sm:$0xf] }
  0x66   : > { %v524_v62 = vrot.slane %v523_v7, 4  ;;  %v536_v18 = vrot.slane %v534_v11, 5  ;;  %v542_v26 = vrot.slane %v540_v12, 5  ;;  %v550_v27 = vshll.u32 %v281_v58, 16 }
  0x67   : > { %v546_v30 = vrot.slane %v544_v36, 4  ;;  %v5636_v34 = vrot.slane %v5620_v13, 9  ;;  %v2971_v38 = vrot.slane %v7339_v45, 5  ;;  %v2974_v39 = vrot.slane %v7345_v51, 5  ;;  %v5621_v45 = vld [vmem:[%s7254_s16 + $0x30] sm:$0xe] }
  0x68   : > { %v529_v23 = vsel %vm7286_vm2, %v524_v62, %v528_v1  ;;  %v537_v42 = vor.u32 %v536_v18, %v533_v32  ;;  %v552_v43 = vrot.slane %v550_v27, 5  ;;  %v555_v44 = vshrl.u32 %v7584_v16, 16  ;;  %v283_v62 = vld [vmem:[%s7254_s16 + $0x98] sm:$0x1] }
  0x69   : > { %v5411_v49 = vcombine.low %v519_v8, %v529_v23  ;;  %6494 = vmatmul.mubr.bf16.vlgmr.msra.gmra.mrb[0].mxu0 %v5651_v15  ;;  %v547_v50 = vor.u32 %v546_v30, %v542_v26  ;;  %v2972_v52 = vsel %vm7532_vm5, %v5636_v34, %v2971_v38  ;;  %v2973_v53 = vrot.slane %v2971_v38, 4  ;;  %v7001_v30 = vld [vmem:[%s9066_s1 + $0x198] sm:$0xff]  }
  0x6a   : > { %6526 = vmatpush3.bf16.msra.mxu0 %v7475_v6  ;;  %v538_v51 = vrot.slane %v537_v42, 4  ;;  %v557_v55 = vrot.slane %v555_v44, 4  ;;  %v558_v48 = vshll.u32 %v7584_v16, 16  ;;  %v564_v56 = vshll.u32 %v7592_v40, 16  ;;  %v6999_v6 = vld [vmem:[%s9066_s1 + $0x190] sm:$0xff]  }
  0x6b   : > { %6270 = vmatmul.mubr.bf16.gmra.mrb[16].mxu1 %v5411_v49  ;;  %v548_v57 = vrot.slane %v547_v50, 4  ;;  %v2975_v58 = vsel %vm7532_vm5, %v2973_v53, %v2974_v39  ;;  %v568_v59 = vshrl.u32 %v7592_v40, 16  ;;  %v574_v24 = vshll.u32 %v282_v31, 16  ;;  %6527 = vmatprep.subr.bf16.mxu0 %v6997_v29  ;;  %v5622_v38 = vld [vmem:[%s7254_s16 + $0x3c] sm:$0xe] }
  0x6c   : > { %v543_v61 = vsel %vm7286_vm2, %v538_v51, %v542_v26  ;;  %v5652_v63 = vcombine.low %v2972_v52, %v2975_v58  ;;  %v560_v41 = vrot.slane %v558_v48, 5  ;;  %v566_v1 = vrot.slane %v564_v56, 5  ;;  %v7634_v31 = vld [vmem:[%s7254_s16 + $0x9c] sm:$0xf]  ;;  %v7643_v48 = vld [vmem:[%s7254_s16 + $0xa0] sm:$0xf] }
  0x6d   : > { %v553_v7 = vsel %vm7286_vm2, %v548_v57, %v552_v43  ;;  %v570_v10 = vrot.slane %v568_v59, 4  ;;  %v576_v11 = vrot.slane %v574_v24, 5  ;;  %v5637_v12 = vrot.slane %v5621_v45, 9  ;;  %v7005_v56 = vld [vmem:[%s9066_s1 + $0x1a0] sm:$0xff]  }
  0x6e   : > { %v5412_v13 = vcombine.low %v543_v61, %v553_v7  ;;  %6497 = vmatprep.mubr.bf16.mxu0 %v5652_v63  ;;  %v561_v8 = vor.u32 %v560_v41, %v557_v55  ;;  %v2978_v15 = vrot.slane %v7370_v33, 5  ;;  %v2981_v32 = vrot.slane %v7381_v46, 5  ;;  %6528 = vmatpush3.bf16.msra.mxu0 %v6997_v29  ;;  %v284_v61 = vld [vmem:[%s7254_s16 + $0xa4] sm:$0x1] }
  0x6f   : > { %v571_v36 = vor.u32 %v570_v10, %v566_v1  ;;  %v579_v18 = vshrl.u32 %v7613_v2, 16  ;;  %v582_v26 = vshll.u32 %v7613_v2, 16  ;;  %v588_v27 = vshll.u32 %v7616_v3, 16  ;;  %6529 = vmatprep.subr.bf16.mxu0 %v6999_v6 }
  0x70   : > { %6273 = vmatprep.mubr.bf16.mxu1 %v5412_v13  ;;  %v562_v34 = vrot.slane %v561_v8, 4  ;;  %v2979_v33 = vsel %vm7532_vm5, %v5637_v12, %v2978_v15  ;;  %v2980_v46 = vrot.slane %v2978_v15, 4  ;;  %v592_v29 = vshrl.u32 %v7616_v3, 16  ;;  %v5623_v15 = vld [vmem:[%s7254_s16 + $0x48] sm:$0xe] }
  0x71   : > { %v572_v39 = vrot.slane %v571_v36, 4  ;;  %v581_v23 = vrot.slane %v579_v18, 4  ;;  %v584_v42 = vrot.slane %v582_v26, 5  ;;  %v590_v43 = vrot.slane %v588_v27, 5  ;;  %v7668_v27 = vld [vmem:[%s7254_s16 + $0xa8] sm:$0xf] }
  0x72   : > { %v567_v44 = vsel %vm7286_vm2, %v562_v34, %v566_v1  ;;  %v2982_v49 = vsel %vm7532_vm5, %v2980_v46, %v2981_v32  ;;  %v594_v50 = vrot.slane %v592_v29, 4  ;;  %v598_v52 = vshll.u32 %v283_v62, 16  ;;  %6530 = vmatpush3.bf16.msra.mxu0 %v6999_v6  ;;  %v7009_v32 = vld [vmem:[%s9066_s1 + $0x1a8] sm:$0xff]  }
  0x73   : > { %v577_v53 = vsel %vm7286_vm2, %v572_v39, %v576_v11  ;;  %v5653_v45 = vcombine.low %v2979_v33, %v2982_v49  ;;  %v585_v51 = vor.u32 %v584_v42, %v581_v23  ;;  %v5638_v55 = vrot.slane %v5622_v38, 9  ;;  %6531 = vmatprep.subr.bf16.mxu0 %v7001_v30  ;;  %v7671_v29 = vld [vmem:[%s7254_s16 + $0xac] sm:$0xf] }
  0x74   : > { %v5413_v57 = vcombine.low %v567_v44, %v577_v53  ;;  %v595_v58 = vor.u32 %v594_v50, %v590_v43  ;;  %v600_v59 = vrot.slane %v598_v52, 5  ;;  %v2985_v24 = vrot.slane %v7404_v19, 5  ;;  %v5624_v53 = vld [vmem:[%s7254_s16 + $0x54] sm:$0xe] }
  0x75   : > { %6498 = vmatmul.mubr.bf16.gmra.mrb[4].mxu0 %v5653_v45  ;;  %v586_v6 = vrot.slane %v585_v51, 4  ;;  %v2988_v63 = vrot.slane %v7412_v28, 5  ;;  %v603_v41 = vshrl.u32 %v7634_v31, 16  ;;  %v606_v1 = vshll.u32 %v7634_v31, 16  ;;  %v7013_v45 = vld [vmem:[%s9066_s1 + $0x1b0] sm:$0xff]  }
  0x76   : > { %6274 = vmatmul.mubr.bf16.gmra.mrb[20].mxu1 %v5413_v57  ;;  %v596_v7 = vrot.slane %v595_v58, 4  ;;  %v2986_v10 = vsel %vm7532_vm5, %v5638_v55, %v2985_v24  ;;  %v2987_v11 = vrot.slane %v2985_v24, 4  ;;  %v612_v12 = vshll.u32 %v7643_v48, 16  ;;  %6532 = vmatpush3.bf16.msra.mxu0 %v7001_v30 }
  0x77   : > { %v591_v19 = vsel %vm7286_vm2, %v586_v6, %v590_v43  ;;  %v605_v13 = vrot.slane %v603_v41, 4  ;;  %v608_v28 = vrot.slane %v606_v1, 5  ;;  %v616_v8 = vshrl.u32 %v7643_v48, 16  ;;  %6533 = vmatprep.subr.bf16.mxu0 %v7005_v56  ;;  %v285_v43 = vld [vmem:[%s7254_s16 + $0xb0] sm:$0x1] }
  0x78   : > { %v601_v36 = vsel %vm7286_vm2, %v596_v7, %v600_v59  ;;  %v2989_v62 = vsel %vm7532_vm5, %v2987_v11, %v2988_v63  ;;  %v614_v18 = vrot.slane %v612_v12, 5  ;;  %v622_v26 = vshll.u32 %v284_v61, 16  ;;  %v7691_v41 = vld [vmem:[%s7254_s16 + $0xb4] sm:$0xf]  ;;  %v7696_v12 = vld [vmem:[%s7254_s16 + $0xb8] sm:$0xf] }
  0x79   : > { %v5414_v30 = vcombine.low %v591_v19, %v601_v36  ;;  %v5654_v34 = vcombine.low %v2986_v10, %v2989_v62  ;;  %v609_v33 = vor.u32 %v608_v28, %v605_v13  ;;  %v618_v46 = vrot.slane %v616_v8, 4  ;;  %v286_v19 = vld [vmem:[%s7254_s16 + $0xbc] sm:$0x1] }
  0x7a   : > { %v624_v38 = vrot.slane %v622_v26, 5  ;;  %v5639_v39 = vrot.slane %v5623_v15, 9  ;;  %v2992_v23 = vrot.slane %v7439_v14, 5  ;;  %v2995_v42 = vrot.slane %v7445_v22, 5  ;;  %6534 = vmatpush3.bf16.msra.mxu0 %v7005_v56  ;;  %v7017_v13 = vld [vmem:[%s9066_s1 + $0x1b8] sm:$0xff]  }
  0x7b   : > { %6277 = vmatprep.mubr.bf16.mxu1 %v5414_v30  ;;  %6501 = vmatprep.mubr.bf16.mxu0 %v5654_v34  ;;  %v610_v44 = vrot.slane %v609_v33, 4  ;;  %v619_v49 = vor.u32 %v618_v46, %v614_v18  ;;  %v627_v50 = vshrl.u32 %v7668_v27, 16  ;;  %v630_v52 = vshll.u32 %v7668_v27, 16  ;;  %v5625_v30 = vld [vmem:[%s7254_s16 + $0x60] sm:$0xe] }
  0x7c   : > { %v2993_v14 = vsel %vm7532_vm5, %v5639_v39, %v2992_v23  ;;  %v2994_v22 = vrot.slane %v2992_v23, 4  ;;  %v636_v51 = vshll.u32 %v7671_v29, 16  ;;  %v640_v55 = vshrl.u32 %v7671_v29, 16  ;;  %6535 = vmatprep.subr.bf16.mxu0 %v7009_v32  ;;  %v5571_v39 = vld [vmem:[%s7254_s16 + $0x70] sm:$0xf] }
  0x7d   : > { %v615_v56 = vsel %vm7286_vm2, %v610_v44, %v614_v18  ;;  %v620_v57 = vrot.slane %v619_v49, 4  ;;  %v629_v58 = vrot.slane %v627_v50, 4  ;;  %v632_v59 = vrot.slane %v630_v52, 5  ;;  %v7718_v44 = vld [vmem:[%s9066_s1 + $0x1c0] sm:$0xff]  }
  0x7e   : > { %v2996_v24 = vsel %vm7532_vm5, %v2994_v22, %v2995_v42  ;;  %v638_v61 = vrot.slane %v636_v51, 5  ;;  %v642_v6 = vrot.slane %v640_v55, 4  ;;  %v646_v63 = vshll.u32 %v285_v43, 16  ;;  %6536 = vmatpush3.bf16.msra.mxu0 %v7009_v32  ;;  %v5626_v43 = vld [vmem:[%s7254_s16 + $0x6c] sm:$0xe] }
  0x7f   : > { %v625_v1 = vsel %vm7286_vm2, %v620_v57, %v624_v38  ;;  %v5655_v7 = vcombine.low %v2993_v14, %v2996_v24  ;;  %v633_v10 = vor.u32 %v632_v59, %v629_v58  ;;  %v5640_v11 = vrot.slane %v5624_v53, 9  ;;  %6537 = vmatprep.subr.bf16.mxu0 %v7013_v45  ;;  %v5572_v55 = vld [vmem:[%s7254_s16 + $0x74] sm:$0x1]  ;;  %v5627_v24 = vld [vmem:[%s7254_s16 + $0x78] sm:$0xe] }
  0x80   : > { %v5415_v28 = vcombine.low %v615_v56, %v625_v1  ;;  %v643_v8 = vor.u32 %v642_v6, %v638_v61  ;;  %v648_v15 = vrot.slane %v646_v63, 5  ;;  %v2999_v32 = vrot.slane %v7470_v0, 5 }
  0x81   : > { %6502 = vmatmul.mubr.bf16.gmra.mrb[8].mxu0 %v5655_v7  ;;  %v634_v36 = vrot.slane %v633_v10, 4  ;;  %v3002_v62 = vrot.slane %v7482_v20, 5  ;;  %v651_v18 = vshrl.u32 %v7691_v41, 16  ;;  %v654_v26 = vshll.u32 %v7691_v41, 16 }
  0x82   : > { %6278 = vmatmul.mubr.bf16.gmra.mrb[24].mxu1 %v5415_v28  ;;  %v644_v34 = vrot.slane %v643_v8, 4  ;;  %v3000_v33 = vsel %vm7532_vm5, %v5640_v11, %v2999_v32  ;;  %v3001_v46 = vrot.slane %v2999_v32, 4  ;;  %v660_v38 = vshll.u32 %v7696_v12, 16  ;;  %6538 = vmatpush3.bf16.msra.mxu0 %v7013_v45  ;;  %v7731_v11 = vld [vmem:[%s7254_s16 + $0x7c] sm:$0xf] }
  0x83   : > { %v639_v0 = vsel %vm7286_vm2, %v634_v36, %v638_v61  ;;  %v653_v20 = vrot.slane %v651_v18, 4  ;;  %v656_v23 = vrot.slane %v654_v26, 5  ;;  %v664_v42 = vshrl.u32 %v7696_v12, 16  ;;  %6539 = vmatprep.subr.bf16.mxu0 %v7017_v13  ;;  %v7086_v36 = vld [vmem:[%s7254_s16] sm:$0xf] }
  0x84   : > { %v649_v49 = vsel %vm7286_vm2, %v644_v34, %v648_v15  ;;  %v3003_v50 = vsel %vm7532_vm5, %v3001_v46, %v3002_v62  ;;  %v662_v52 = vrot.slane %v660_v38, 5  ;;  %v670_v53 = vshll.u32 %v286_v19, 16  ;;  %v5577_v15 = vld [vmem:[%s7254_s16 + $0x88] sm:$0xf]  ;;  %v7746_v62 = vld [vmem:[%s7254_s16 + $0x4] sm:$0xf] }
  0x85   : > { %v5416_v45 = vcombine.low %v639_v0, %v649_v49  ;;  %v5656_v14 = vcombine.low %v3000_v33, %v3003_v50  ;;  %v657_v22 = vor.u32 %v656_v23, %v653_v20  ;;  %v666_v51 = vrot.slane %v664_v42, 4  ;;  %v5578_v26 = vld [vmem:[%s7254_s16 + $0x8c] sm:$0x1]  ;;  %v5581_v23 = vld [vmem:[%s7254_s16 + $0x98] sm:$0x1] }
  0x86   : > { %v672_v56 = vrot.slane %v670_v53, 5  ;;  %v5641_v57 = vrot.slane %v5625_v30, 9  ;;  %v3006_v58 = vrot.slane %v7497_v60, 5  ;;  %v3009_v59 = vrot.slane %v7506_v17, 5  ;;  %6540 = vmatpush3.bf16.msra.mxu0 %v7017_v13  ;;  %v7734_v17 = vld [vmem:[%s7254_s16 + $0x80] sm:$0x1] }
  0x87   : > { %6281 = vmatprep.mubr.bf16.mxu1 %v5416_v45  ;;  %6505 = vmatprep.mubr.bf16.mxu0 %v5656_v14  ;;  %v658_v61 = vrot.slane %v657_v22, 4  ;;  %v667_v6 = vor.u32 %v666_v51, %v662_v52  ;;  %v5642_v63 = vrot.slane %v5626_v43, 9  ;;  %v3013_v1 = vrot.slane %v5571_v39, 5  ;;  %v5628_v30 = vld [vmem:[%s7254_s16 + $0x84] sm:$0xe] }
  0x88   : > { %v3007_v7 = vsel %vm7532_vm5, %v5641_v57, %v3006_v58  ;;  %v3008_v10 = vrot.slane %v3006_v58, 4  ;;  %v3016_v60 = vrot.slane %v5572_v55, 5  ;;  %6573 = vmatprep.subr.bf16.mxu0 %v7718_v44  ;;  %v5426_v18 = vcombine.low %v7086_v36, %v7746_v62  ;;  %v5580_v39 = vld [vmem:[%s7254_s16 + $0x94] sm:$0xf]  ;;  %v5629_v42 = vld [vmem:[%s7254_s16 + $0x90] sm:$0xe] }
  0x89   : > { %v663_v19 = vsel %vm7286_vm2, %v658_v61, %v662_v52  ;;  %v668_v13 = vrot.slane %v667_v6, 4  ;;  %v3014_v28 = vsel %vm7532_vm5, %v5642_v63, %v3013_v1  ;;  %v3015_v8 = vrot.slane %v3013_v1, 4  ;;  %v5630_v50 = vld [vmem:[%s7254_s16 + $0x9c] sm:$0xe]  ;;  %v5583_v14 = vld [vmem:[%s7254_s16 + $0xa0] sm:$0xf] }
  0x8a   : > { %v3010_v32 = vsel %vm7532_vm5, %v3008_v10, %v3009_v59  ;;  %v5643_v38 = vrot.slane %v5627_v24, 9  ;;  %v3020_v43 = vrot.slane %v7731_v11, 5  ;;  %v3023_v49 = vrot.slane %v7734_v17, 5  ;;  %v5584_v22 = vld [vmem:[%s7254_s16 + $0xa4] sm:$0x1] }
  0x8b   : > { %v673_v34 = vsel %vm7286_vm2, %v668_v13, %v672_v56  ;;  %v5657_v33 = vcombine.low %v3007_v7, %v3010_v32  ;;  %v3017_v46 = vsel %vm7532_vm5, %v3015_v8, %v3016_v60  ;;  %v5644_v52 = vrot.slane %v5628_v30, 9  ;;  %v5586_v59 = vld [vmem:[%s7254_s16 + $0xac] sm:$0xf]  ;;  %v7770_v61 = vld [vmem:[%s7254_s16 + $0x10] sm:$0xf] }
  0x8c   : > { %v5417_v0 = vcombine.low %v663_v19, %v673_v34  ;;  %v5658_v20 = vcombine.low %v3014_v28, %v3017_v46  ;;  %v3027_v53 = vrot.slane %v5577_v15, 5  ;;  %v3030_v45 = vrot.slane %v5578_v26, 5  ;;  %v7088_v24 = vld [vmem:[%s7254_s16 + $0xc] sm:$0xf]  ;;  %v7090_v8 = vld [vmem:[%s7254_s16 + $0x18] sm:$0xf] }
  0x8d   : > { %6506 = vmatmul.mubr.bf16.gmra.mrb[12].mxu0 %v5657_v33  ;;  %v3021_v51 = vsel %vm7532_vm5, %v5643_v38, %v3020_v43  ;;  %v3022_v55 = vrot.slane %v3020_v43, 4  ;;  %v3034_v58 = vrot.slane %v5580_v39, 5  ;;  %v5427_v6 = vcombine.low %v7088_v24, %v7770_v61  ;;  %v7008_v19 = vld [vmem:[%s9066_s1 + $0x88] sm:$0xff]   ;;  %v7782_v15 = vld [vmem:[%s7254_s16 + $0x1c] sm:$0xf] }
  0x8e   : > { %6282 = vmatmul.mubr.bf16.gmra.mrb[28].mxu1 %v5417_v0  ;;  %6509 = vmatprep.mubr.bf16.mxu0 %v5658_v20  ;;  %v3028_v56 = vsel %vm7532_vm5, %v5644_v52, %v3027_v53  ;;  %v3029_v57 = vrot.slane %v3027_v53, 4  ;;  %v5645_v1 = vrot.slane %v5629_v42, 9  ;;  %v3037_v7 = vrot.slane %v5581_v23, 5  ;;  %v5587_v30 = vld [vmem:[%s7254_s16 + $0xb0] sm:$0x1] }
  0x8f   : > { %6301 = vmatprep.mubr.bf16.mxu1 %v5426_v18  ;;  %v3024_v63 = vsel %vm7532_vm5, %v3022_v55, %v3023_v49  ;;  %v3036_v13 = vrot.slane %v3034_v58, 4  ;;  %v5646_v28 = vrot.slane %v5630_v50, 9  ;;  %v5428_v32 = vcombine.low %v7090_v8, %v7782_v15  ;;  %v5631_v34 = vld [vmem:[%s7254_s16 + $0xa8] sm:$0xe]  ;;  %v5589_v33 = vld [vmem:[%s7254_s16 + $0xb8] sm:$0xf] }
  0x90   : > { %v5659_v10 = vcombine.low %v3021_v51, %v3024_v63  ;;  %v3031_v60 = vsel %vm7532_vm5, %v3029_v57, %v3030_v45  ;;  %v3041_v18 = vrot.slane %v5583_v14, 5  ;;  %v3044_v26 = vrot.slane %v5584_v22, 5  ;;  %v5590_v20 = vld [vmem:[%s7254_s16 + $0xbc] sm:$0x1]  ;;  %v5632_v23 = vld [vmem:[%s7254_s16 + $0xb4] sm:$0xe] }
  0x91   : > { %v5660_v36 = vcombine.low %v3028_v56, %v3031_v60  ;;  %v3048_v38 = vrot.slane %v5586_v59, 5  ;;  %v3035_v39 = vsel %vm7532_vm5, %v5645_v1, %v3034_v58  ;;  %v3038_v0 = vsel %vm7532_vm5, %v3036_v13, %v3037_v7  ;;  %v7012_v50 = vld [vmem:[%s9066_s1 + $0x90] sm:$0xff]   ;;  %v5592_v53 = vld [vmem:[%s7254_s16 + $0xc4] sm:$0xf]  ;;  %v7805_v51 = vld [vmem:[%s7254_s16 + $0x28] sm:$0xf] }
  0x92   : > { %v3043_v46 = vrot.slane %v3041_v18, 4  ;;  %v3042_v42 = vsel %vm7532_vm5, %v5646_v28, %v3041_v18  ;;  %v3055_v49 = vrot.slane %v5589_v33, 5  ;;  %v5647_v52 = vrot.slane %v5631_v34, 9  ;;  %v7092_v22 = vld [vmem:[%s7254_s16 + $0x24] sm:$0xf]  ;;  %v7016_v1 = vld [vmem:[%s9066_s1 + $0x98] sm:$0xff]  }
  0x93   : > { %v5661_v45 = vcombine.low %v3035_v39, %v3038_v0  ;;  %v3050_v14 = vrot.slane %v3048_v38, 4  ;;  %v5429_v55 = vcombine.low %v7092_v22, %v7805_v51  ;;  %v7094_v57 = vld [vmem:[%s7254_s16 + $0x30] sm:$0xf]  ;;  %v7810_v58 = vld [vmem:[%s7254_s16 + $0x34] sm:$0xf]  ;;  %v5648_v24 = vrot.slane %v5632_v23, 9 }
  0x94   : > { %v3045_v43 = vsel %vm7532_vm5, %v3043_v46, %v3044_v26  ;;  %v5430_v59 = vcombine.low %v7094_v57, %v7810_v58  ;;  %v3058_v63 = vrot.slane %v5590_v20, 5  ;;  %v5633_v7 = vld [vmem:[%s7254_s16 + $0xc0] sm:$0xe]  ;;  %v3049_v60 = vsel %vm7532_vm5, %v5647_v52, %v3048_v38  ;;  %v5593_v8 = vld [vmem:[%s7254_s16 + $0xc8] sm:$0x1]  ;;  %v7019_v22 = vld [vmem:[%s7254_s16 + $0x18] sm:$0xff]  }
  0x95   : > { %6510 = vmatmul.mubr.bf16.gmra.mrb[16].mxu0 %v5659_v10  ;;  %v5662_v56 = vcombine.low %v3042_v42, %v3045_v43  ;;  %v3062_v10 = vrot.slane %v5592_v53, 5  ;;  %v3056_v13 = vsel %vm7532_vm5, %v5648_v24, %v3055_v49  ;;  %v5649_v18 = vrot.slane %v5633_v7, 9  ;;  %v7096_v26 = vld [vmem:[%s7254_s16 + $0x3c] sm:$0xf]  ;;  %v7098_v39 = vld [vmem:[%s7254_s16 + $0x48] sm:$0xf] }
  0x96   : > { %6302 = vmatmul.mubr.bf16.vlgmr.msra.gmra.mrb[0].mxu1 %v5427_v6  ;;  %6513 = vmatprep.mubr.bf16.mxu0 %v5660_v36  ;;  %v3057_v6 = vrot.slane %v3055_v49, 4  ;;  %v3065_v38 = vrot.slane %v5593_v8, 5  ;;  %v7836_v0 = vld [vmem:[%s7254_s16 + $0x4c] sm:$0xf]  ;;  %v7033_v49 = vld [vmem:[%s9066_s1 + $0xb0] sm:$0xff]   ;;  %v2416_v52 = vshrl.u32 %v7731_v11, 16 }
  0x97   : > { %6334 = vmatpush3.bf16.msra.mxu1 %v7456_v4  ;;  %6305 = vmatprep.mubr.bf16.mxu1 %v5428_v32  ;;  %v3051_v4 = vrot.slane %v5587_v30, 5  ;;  %v7021_v32 = vld [vmem:[%s9066_s1 + $0xa0] sm:$0xff]   ;;  %v3064_v46 = vrot.slane %v3062_v10, 4  ;;  %v5432_v20 = vcombine.low %v7098_v39, %v7836_v0  ;;  %v7027_v23 = vld [vmem:[%s9066_s1 + $0xa8] sm:$0xff]   ;;  %v3063_v42 = vsel %vm7532_vm5, %v5649_v18, %v3062_v10  ;;  %v7025_v18 = vld [vmem:[%s7254_s16 + $0x30] sm:$0xff]  }
  0x98   : > { %6335 = vmatprep.subr.bf16.mxu1 %v7008_v19  ;;  %v3059_v28 = vsel %vm7532_vm5, %v3057_v6, %v3058_v63  ;;  %v7831_v30 = vld [vmem:[%s7254_s16 + $0x40] sm:$0xf]  ;;  %v7864_v57 = vrot.slane %v2416_v52, 4  ;;  %v7022_v6 = vld [vmem:[%s7254_s16 + $0x24] sm:$0xff]   ;;  %v1328_v7 = vrot.slane %v7770_v61, 5  ;;  %v2422_v8 = vshll.u32 %v7734_v17, 16 }
  0x99   : > { %v5431_v34 = vcombine.low %v7096_v26, %v7831_v30  ;;  %v5664_v33 = vcombine.low %v3056_v13, %v3059_v28  ;;  %v3066_v43 = vsel %vm7532_vm5, %v3064_v46, %v3065_v38  ;;  %v1268_v63 = vld [vmem:[%s7254_s16] sm:$0xe]  ;;  %v1269_v10 = vld [vmem:[%s7254_s16 + $0xc] sm:$0xe]  ;;  %v1335_v13 = vrot.slane %v7782_v15, 5 }
  0x9a   : > { %v5665_v53 = vcombine.low %v3063_v42, %v3066_v43  ;;  %v1271_v61 = vld [vmem:[%s7254_s16 + $0x24] sm:$0xe]  ;;  %v5437_v15 = vcombine.low %v7584_v16, %v7592_v40  ;;  %v5438_v26 = vcombine.low %v7613_v2, %v7616_v3  ;;  %v5450_v17 = vrot.slane %v1268_v63, 9  ;;  %v7104_v38 = vld [vmem:[%s7254_s16 + $0x20] sm:$0x1]  ;;  %v7034_v2 = vld [vmem:[%s7254_s16 + $0x54] sm:$0xff]  }
  0x9b   : > { %6336 = vmatpush3.bf16.msra.mxu1 %v7008_v19  ;;  %v3052_v19 = vsel %vm7532_vm5, %v3050_v14, %v3051_v4  ;;  %v7853_v14 = vld [vmem:[%s7254_s16 + $0x58] sm:$0xf]  ;;  %v1337_v46 = vrot.slane %v1335_v13, 4  ;;  %v1338_v39 = vrot.slane %v7104_v38, 5  ;;  %v7105_v43 = vld [vmem:[%s7254_s16 + $0x2c] sm:$0x1] }
  0x9c   : > { %6337 = vmatprep.subr.bf16.mxu1 %v7012_v50  ;;  %v5663_v36 = vcombine.low %v3049_v60, %v3052_v19  ;;  %v7879_v60 = vld [vmem:[%s9066_s1 + $0xc0] sm:$0xff]   ;;  %v1270_v19 = vld [vmem:[%s7254_s16 + $0x18] sm:$0xe]  ;;  %v7108_v38 = vld [vmem:[%s7254_s16 + $0x50] sm:$0x1]  ;;  %v1370_v16 = vrot.slane %v7853_v14, 5 }
  0x9d   : > { %6514 = vmatmul.mubr.bf16.gmra.mrb[20].mxu0 %v5661_v45  ;;  %v7100_v45 = vld [vmem:[%s7254_s16 + $0x54] sm:$0xf]  ;;  %v8002_v40 = vld [vmem:[%s7254_s16 + $0x64] sm:$0xf] }
  0x9e   : > { %6306 = vmatmul.mubr.bf16.gmra.mrb[4].mxu1 %v5429_v55  ;;  %6517 = vmatprep.mubr.bf16.mxu0 %v5662_v56  ;;  %v5433_v4 = vcombine.low %v7100_v45, %v7853_v14  ;;  %v5434_v55 = vcombine.low %v7510_v25, %v7513_v35  ;;  %v7039_v56 = vld [vmem:[%s9066_s1 + $0xb8] sm:$0xff]   ;;  %v7103_v25 = vld [vmem:[%s7254_s16 + $0x14] sm:$0x1]  ;;  %v7037_v3 = vld [vmem:[%s7254_s16 + $0x60] sm:$0xff]  }
  0x9f   : > { %6309 = vmatprep.mubr.bf16.mxu1 %v5430_v59  ;;  %6338 = vmatpush3.bf16.msra.mxu1 %v7012_v50  ;;  %v2412_v50 = vshll.u32 %v7731_v11, 16  ;;  %v7867_v59 = vld [vmem:[%s7254_s16 + $0x8] sm:$0x1]  ;;  %v1331_v35 = vrot.slane %v7103_v25, 5 }
  0xa0   : > { %6339 = vmatprep.subr.bf16.mxu1 %v7016_v1  ;;  %v1324_v24 = vrot.slane %v7867_v59, 5 }
  0xa1   : > { %v7862_v11 = vrot.slane %v2412_v50, 5 }
  0xa3   : > { %6340 = vmatpush3.bf16.msra.mxu1 %v7016_v1  ;;  %v1321_v1 = vrot.slane %v7746_v62, 5  ;;  %v5435_v62 = vcombine.low %v7528_v5, %v7540_v21  ;;  %v5451_v21 = vrot.slane %v1269_v10, 9  ;;  %v5730_v10 = vld [vmem:[%s7254_s16 + $0x18] sm:$0xf] }
  0xa4   : > { %6341 = vmatprep.subr.bf16.mxu1 %v7021_v32 }
  0xa5   : > { %6518 = vmatmul.mubr.bf16.gmra.mrb[24].mxu0 %v5663_v36  ;;  %v5436_v36 = vcombine.low %v7551_v47, %v7562_v54  ;;  %v1323_v5 = vrot.slane %v1321_v1, 4  ;;  %v7029_v47 = vld [vmem:[%s9066_s1 + $0x1c8] sm:$0xff]   ;;  %v5452_v54 = vrot.slane %v1270_v19, 9  ;;  %v7922_v59 = vsel %vm7532_vm5, %v5450_v17, %v1321_v1  ;;  %v5731_v19 = vld [vmem:[%s7254_s16 + $0x1c] sm:$0xf] }
  0xa6   : > { %6310 = vmatmul.mubr.bf16.gmra.mrb[8].mxu1 %v5431_v34  ;;  %6521 = vmatprep.mubr.bf16.mxu0 %v5664_v33  ;;  %v1349_v34 = vrot.slane %v7810_v58, 5  ;;  %v1330_v33 = vrot.slane %v1328_v7, 4  ;;  %v5453_v58 = vrot.slane %v1271_v61, 9  ;;  %v1363_v1 = vrot.slane %v7836_v0, 5  ;;  %v7031_v0 = vld [vmem:[%s7254_s16 + $0x48] sm:$0xff]  }
  0xa7   : > { %6313 = vmatprep.mubr.bf16.mxu1 %v5432_v20  ;;  %6342 = vmatpush3.bf16.msra.mxu1 %v7021_v32  ;;  %v1342_v32 = vrot.slane %v7805_v51, 5  ;;  %v1272_v51 = vld [vmem:[%s7254_s16 + $0x30] sm:$0xe]  ;;  %v5439_v20 = vcombine.low %v7634_v31, %v7643_v48  ;;  %v7930_v25 = vsel %vm7532_vm5, %v1323_v5, %v1324_v24  ;;  %v7938_v63 = vsel %vm7532_vm5, %v5452_v54, %v1335_v13  ;;  %v1274_v13 = vld [vmem:[%s7254_s16 + $0x48] sm:$0xe] }
  0xa8   : > { %6343 = vmatprep.subr.bf16.mxu1 %v7027_v23  ;;  %v5454_v50 = vrot.slane %v1272_v51, 9  ;;  %v1351_v52 = vrot.slane %v1349_v34, 4  ;;  %v3823_v5 = vshrl.u32 %v5730_v10, 16  ;;  %v3836_v51 = vshrl.u32 %v5731_v19, 16  ;;  %v7040_v48 = vld [vmem:[%s7254_s16 + $0x6c] sm:$0xff]  }
  0xa9   : > { %v1344_v42 = vrot.slane %v1342_v32, 4  ;;  %v7950_v24 = vsel %vm7532_vm5, %v5453_v58, %v1342_v32  ;;  %v7107_v32 = vld [vmem:[%s7254_s16 + $0x44] sm:$0x1]  ;;  %v5456_v54 = vrot.slane %v1274_v13, 9  ;;  %v5734_v13 = vld [vmem:[%s7254_s16 + $0x28] sm:$0xf] }
  0xaa   : > { %v7960_v61 = vsel %vm7532_vm5, %v5454_v50, %v1349_v34  ;;  %v1359_v17 = vrot.slane %v7107_v32, 5  ;;  %v5732_v50 = vld [vmem:[%s7254_s16 + $0x20] sm:$0x1]  ;;  %v1276_v32 = vld [vmem:[%s7254_s16 + $0x60] sm:$0xe] }
  0xab   : > { %6344 = vmatpush3.bf16.msra.mxu1 %v7027_v23  ;;  %v5440_v23 = vcombine.low %v7668_v27, %v7671_v29 }
  0xac   : > { %6345 = vmatprep.subr.bf16.mxu1 %v7033_v49 }
  0xad   : > { %6522 = vmatmul.mubr.bf16.gmra.mrb[28].mxu0 %v5665_v53  ;;  %v7106_v53 = vld [vmem:[%s7254_s16 + $0x38] sm:$0x1] }
  0xae   : > { %6314 = vmatmul.mubr.bf16.gmra.mrb[12].mxu1 %v5433_v4  ;;  %6541 = vmatprep.mubr.bf16.mxu0 %v7019_v22  ;;  %v1352_v45 = vrot.slane %v7106_v53, 5  ;;  %v1273_v4 = vld [vmem:[%s7254_s16 + $0x3c] sm:$0xe]  ;;  %v1356_v22 = vrot.slane %v7831_v30, 5  ;;  %v7926_v30 = vsel %vm7532_vm5, %v5451_v21, %v1328_v7  ;;  %v3826_v21 = vshll.u32 %v5730_v10, 16  ;;  %v7045_v53 = vld [vmem:[%s9066_s1 + $0x1e0] sm:$0xff]  }
  0xaf   : > { %6317 = vmatprep.mubr.bf16.mxu1 %v5434_v55  ;;  %6346 = vmatpush3.bf16.msra.mxu1 %v7033_v49  ;;  %v1345_v49 = vrot.slane %v7105_v43, 5  ;;  %v7913_v55 = vrot.slane %v2422_v8, 5  ;;  %v7028_v7 = vld [vmem:[%s7254_s16 + $0x3c] sm:$0xff]   ;;  %v7946_v8 = vsel %vm7532_vm5, %v1337_v46, %v1338_v39  ;;  %v1365_v46 = vrot.slane %v1363_v1, 4  ;;  %v5736_v43 = vld [vmem:[%s7254_s16 + $0x30] sm:$0xf] }
  0xb0   : > { %6347 = vmatprep.subr.bf16.mxu1 %v7039_v56  ;;  %v1366_v39 = vrot.slane %v7108_v38, 5  ;;  %v3825_v10 = vrot.slane %v3823_v5, 4 }
  0xb1   : > { %9087 = vst [vmem:[#allocation2_spill] sm:$0xff] %v7913_v55 }
  0xb3   : > { %6348 = vmatpush3.bf16.msra.mxu1 %v7039_v56  ;;  %v7035_v56 = vld [vmem:[%s9066_s1 + $0x1d0] sm:$0xff]  }
  0xb4   : > { %6381 = vmatprep.subr.bf16.mxu1 %v7879_v60 }
  0xb5   : > { %6542 = vmatmul.mubr.bf16.vlgmr.msra.gmra.mrb[0].mxu0 %v7022_v6  ;;  %v7934_v6 = vsel %vm7532_vm5, %v1330_v33, %v1331_v35  ;;  %v7954_v35 = vsel %vm7532_vm5, %v1344_v42, %v1345_v49  ;;  %v3832_v33 = vshll.u32 %v5731_v19, 16  ;;  %v3828_v19 = vrot.slane %v3826_v21, 5  ;;  %v1277_v21 = vld [vmem:[%s7254_s16 + $0x6c] sm:$0xe] }
  0xb6   : > { %6318 = vmatmul.mubr.bf16.gmra.mrb[16].mxu1 %v5435_v62  ;;  %6574 = vmatpush3.bf16.msra.mxu0 %v7718_v44  ;;  %v5455_v62 = vrot.slane %v1273_v4, 9  ;;  %v5459_v58 = vrot.slane %v1277_v21, 9 }
  0xb7   : > { %6321 = vmatprep.mubr.bf16.mxu1 %v5436_v36  ;;  %6545 = vmatprep.mubr.bf16.mxu0 %v7025_v18  ;;  %v7964_v36 = vsel %vm7532_vm5, %v1351_v52, %v1352_v45  ;;  %v1358_v18 = vrot.slane %v1356_v22, 4  ;;  %v5733_v52 = vld [vmem:[%s7254_s16 + $0x24] sm:$0xf]  ;;  %v3860_v45 = vshrl.u32 %v5734_v13, 16 }
  0xb8   : > { %6575 = vmatprep.subr.bf16.mxu0 %v7029_v47  ;;  %v7981_v49 = vsel %vm7532_vm5, %v5455_v62, %v1356_v22  ;;  %v7998_v22 = vld [vmem:[%s7254_s16 + $0x54] sm:$0xe]  ;;  %v3838_v62 = vrot.slane %v3836_v51, 4  ;;  %v3847_v38 = vshrl.u32 %v5733_v52, 16  ;;  %v3850_v28 = vshll.u32 %v5733_v52, 16 }
  0xb9   : > { %v7995_v4 = vsel %vm7532_vm5, %v1358_v18, %v1359_v17  ;;  %v3842_v17 = vshll.u32 %v5732_v50, 16  ;;  %v5457_v5 = vrot.slane %v7998_v22, 9  ;;  %v7049_v50 = vld [vmem:[%s9066_s1 + $0x1e8] sm:$0xff]   ;;  %v1372_v52 = vrot.slane %v1370_v16, 4 }
  0xba   : > { %6576 = vmatpush3.bf16.msra.mxu0 %v7029_v47  ;;  %v7041_v47 = vld [vmem:[%s9066_s1 + $0x1d8] sm:$0xff]   ;;  %v3829_v22 = vor.u32 %v3828_v19, %v3825_v10  ;;  %v3849_v34 = vrot.slane %v3847_v38, 4  ;;  %v3852_v44 = vrot.slane %v3850_v28, 5  ;;  %v7113_v10 = vld [vmem:[%s7254_s16 + $0x74] sm:$0x1]  ;;  %v3862_v28 = vrot.slane %v3860_v45, 4 }
  0xbb   : > { %6577 = vmatprep.subr.bf16.mxu0 %v7035_v56  ;;  %v8036_v42 = vrot.slane %v3842_v17, 5  ;;  %v1387_v19 = vrot.slane %v7113_v10, 5  ;;  %v3871_v38 = vshrl.u32 %v5736_v43, 16  ;;  %v8061_v27 = vsel %vm7532_vm5, %v5457_v5, %v1370_v16 }
  0xbc   : > { %v3830_v21 = vrot.slane %v3829_v22, 4 }
  0xbd   : > { %6546 = vmatmul.mubr.bf16.gmra.mrb[4].mxu0 %v7028_v7  ;;  %v8008_v7 = vrot.slane %v3832_v33, 5  ;;  %v7111_v33 = vld [vmem:[%s7254_s16 + $0x70] sm:$0xf] }
  0xbe   : > { %6322 = vmatmul.mubr.bf16.gmra.mrb[20].mxu1 %v5437_v15  ;;  %6549 = vmatprep.mubr.bf16.mxu0 %v7031_v0  ;;  %v1377_v15 = vrot.slane %v8002_v40, 5  ;;  %v7110_v0 = vld [vmem:[%s7254_s16 + $0x5c] sm:$0x1]  ;;  %v1384_v51 = vrot.slane %v7111_v33, 5 }
  0xbf   : > { %6325 = vmatprep.mubr.bf16.mxu1 %v5438_v26  ;;  %6578 = vmatpush3.bf16.msra.mxu0 %v7035_v56  ;;  %v1373_v18 = vrot.slane %v7110_v0, 5  ;;  %v8017_v26 = vsel %vm7532_vm5, %v5456_v54, %v1363_v1  ;;  %v8021_v56 = vsel %vm7532_vm5, %v1365_v46, %v1366_v39  ;;  %v7112_v1 = vld [vmem:[%s7254_s16 + $0x68] sm:$0x1]  ;;  %v3856_v0 = vshll.u32 %v5734_v13, 16  ;;  %v7057_v40 = vld [vmem:[%s9066_s1 + $0x1f8] sm:$0xff]  }
  0xc0   : > { %6579 = vmatprep.subr.bf16.mxu0 %v7041_v47  ;;  %v1380_v54 = vrot.slane %v7112_v1, 5  ;;  %v5458_v46 = vrot.slane %v1276_v32, 9  ;;  %v1379_v39 = vrot.slane %v1377_v15, 4  ;;  %v3839_v33 = vor.u32 %v3838_v62, %v8008_v7  ;;  %v5737_v1 = vld [vmem:[%s7254_s16 + $0x34] sm:$0xf] }
  0xc1   : > { %v1386_v32 = vrot.slane %v1384_v51, 4  ;;  %v5735_v62 = vld [vmem:[%s7254_s16 + $0x2c] sm:$0x1]  ;;  %v8048_v17 = vrot.slane %v3856_v0, 5  ;;  %v3880_v13 = vshll.u32 %v5737_v1, 16  ;;  %v3884_v31 = vshrl.u32 %v5737_v1, 16 }
  0xc2   : > { %v3840_v10 = vrot.slane %v3839_v33, 4  ;;  %v8065_v29 = vsel %vm7532_vm5, %v1372_v52, %v1373_v18  ;;  %v8072_v45 = vsel %vm7532_vm5, %v5458_v46, %v1377_v15  ;;  %v8076_v14 = vsel %vm7532_vm5, %v1379_v39, %v1380_v54  ;;  %v1278_v18 = vld [vmem:[%s7254_s16 + $0x78] sm:$0xe] }
  0xc3   : > { %6580 = vmatpush3.bf16.msra.mxu0 %v7041_v47  ;;  %v8080_v16 = vsel %vm7532_vm5, %v5459_v58, %v1384_v51  ;;  %v8090_v15 = vsel %vm7532_vm5, %v1386_v32, %v1387_v19  ;;  %v3863_v5 = vor.u32 %v3862_v28, %v8048_v17  ;;  %v3873_v52 = vrot.slane %v3871_v38, 4  ;;  %v5739_v58 = vld [vmem:[%s7254_s16 + $0x3c] sm:$0xf]  ;;  %v5740_v51 = vld [vmem:[%s7254_s16 + $0x40] sm:$0xf] }
  0xc4   : > { %6581 = vmatprep.subr.bf16.mxu0 %v7045_v53  ;;  %v3835_v0 = vsel %vm7286_vm2, %v3830_v21, %v8008_v7  ;;  %v3845_v46 = vsel %vm7286_vm2, %v3840_v10, %v8036_v42  ;;  %v8101_v39 = vrot.slane %v3880_v13, 5  ;;  %v3886_v22 = vrot.slane %v3884_v31, 4  ;;  %v7115_v19 = vld [vmem:[%s7254_s16 + $0x80] sm:$0x1]  ;;  %v8260_v47 = vld [vmem:[%s7254_s16 + $0x68] sm:$0x1] }
  0xc5   : > { %6550 = vmatmul.mubr.bf16.gmra.mrb[8].mxu0 %v7034_v2  ;;  %v3874_v2 = vshll.u32 %v5736_v43, 16  ;;  %v3866_v43 = vshll.u32 %v5735_v62, 16  ;;  %v5460_v32 = vrot.slane %v1278_v18, 9  ;;  %v1279_v62 = vld [vmem:[%s7254_s16 + $0x84] sm:$0xe]  ;;  %v3895_v28 = vshrl.u32 %v5739_v58, 16 }
  0xc6   : > { %6326 = vmatmul.mubr.bf16.gmra.mrb[24].mxu1 %v5439_v20  ;;  %6553 = vmatprep.mubr.bf16.mxu0 %v7037_v3  ;;  %v7053_v20 = vld [vmem:[%s9066_s1 + $0x1f0] sm:$0xff]   ;;  %v7114_v3 = vld [vmem:[%s7254_s16 + $0x7c] sm:$0xf]  ;;  %v3898_v7 = vshll.u32 %v5739_v58, 16  ;;  %v3904_v38 = vshll.u32 %v5740_v51, 16  ;;  %v9088_v42 = vcombine.low %v7691_v41, %v7696_v12  ;;  %v8112_v13 = vrot.slane %v3863_v5, 4 }
  0xc7   : > { %6329 = vmatprep.mubr.bf16.mxu1 %v5440_v23  ;;  %6582 = vmatpush3.bf16.msra.mxu0 %v7045_v53  ;;  %v3853_v23 = vor.u32 %v3852_v44, %v3849_v34  ;;  %v7042_v53 = vld [vmem:[%s7254_s16 + $0x78] sm:$0xff]   ;;  %v1391_v44 = vrot.slane %v7114_v3, 5  ;;  %v3876_v54 = vrot.slane %v3874_v2, 5  ;;  %v8105_v1 = vrot.slane %v3866_v43, 5  ;;  %v8117_v21 = vld [vmem:[%s9066_s1 + $0x200] sm:$0xff]   ;;  %9096 = vst [vmem:[#allocation5_spill] sm:$0xff] %v8260_v47 }
  0xc8   : > { %6583 = vmatprep.subr.bf16.mxu0 %v7049_v50  ;;  %v5738_v34 = vld [vmem:[%s7254_s16 + $0x38] sm:$0x1]  ;;  %v3908_v2 = vshrl.u32 %v5740_v51, 16  ;;  %v7044_v43 = vld [vmem:[%s7254_s16 + $0x84] sm:$0xff]   ;;  %v3887_v12 = vor.u32 %v3886_v22, %v8101_v39  ;;  %v3900_v58 = vrot.slane %v3898_v7, 5  ;;  %v8139_v51 = vrot.slane %v3904_v38, 5 }
  0xc9   : > { %v8103_v33 = vrot.slane %v3853_v23, 4  ;;  %v1393_v10 = vrot.slane %v1391_v44, 4  ;;  %v3877_v31 = vor.u32 %v3876_v54, %v3873_v52  ;;  %v9089_v23 = vcombine.low %v7922_v59, %v7930_v25  ;;  %v7116_v18 = vld [vmem:[%s7254_s16 + $0x88] sm:$0xf]  ;;  %v5741_v5 = vld [vmem:[%s7254_s16 + $0x44] sm:$0x1] }
  0xca   : > { %v1398_v3 = vrot.slane %v7116_v18, 5  ;;  %v8130_v59 = vcombine.low %v3835_v0, %v3845_v46  ;;  %v5742_v52 = vld [vmem:[%s7254_s16 + $0x48] sm:$0xf]  ;;  %v3897_v54 = vrot.slane %v3895_v28, 4  ;;  %v3910_v22 = vrot.slane %v3908_v2, 4 }
  0xcb   : > { %6584 = vmatpush3.bf16.msra.mxu0 %v7049_v50  ;;  %v1394_v50 = vrot.slane %v7115_v19, 5  ;;  %v7046_v19 = vld [vmem:[%s7254_s16 + $0x90] sm:$0xff]   ;;  %v3859_v0 = vsel %vm7286_vm2, %v8103_v33, %v8048_v17  ;;  %v3878_v46 = vrot.slane %v3877_v31, 4  ;;  %v3869_v28 = vsel %vm7286_vm2, %v8112_v13, %v8105_v1  ;;  %v8161_v33 = vld [vmem:[%s7254_s16 + $0x58] sm:$0xf]  ;;  %v7047_v31 = vld [vmem:[%s9066_s1 + $0xc8] sm:$0xff]  }
  0xcc   : > { %6585 = vmatprep.subr.bf16.mxu0 %v7053_v20  ;;  %v3888_v38 = vrot.slane %v3887_v12, 4  ;;  %v1400_v2 = vrot.slane %v1398_v3, 4  ;;  %v5745_v17 = vld [vmem:[%s7254_s16 + $0x54] sm:$0xf]  ;;  %v3914_v1 = vshll.u32 %v5741_v5, 16  ;;  %v3919_v13 = vshrl.u32 %v5742_v52, 16 }
  0xcd   : > { %6554 = vmatmul.mubr.bf16.gmra.mrb[12].mxu0 %v7040_v48  ;;  %v3890_v48 = vshll.u32 %v5738_v34, 16  ;;  %v8157_v7 = vsel %vm7532_vm5, %v1393_v10, %v1394_v50  ;;  %v3922_v50 = vshll.u32 %v5742_v52, 16  ;;  %v3901_v10 = vor.u32 %v3900_v58, %v3897_v54  ;;  %v7048_v54 = vld [vmem:[%s7254_s16 + $0x9c] sm:$0xff]   ;;  %v7122_v41 = vld [vmem:[%s7254_s16 + $0xac] sm:$0xf] }
  0xce   : > { %6330 = vmatmul.mubr.bf16.gmra.mrb[28].mxu1 %v9088_v42  ;;  %6557 = vmatprep.mubr.bf16.mxu0 %v7042_v53  ;;  %v5461_v53 = vrot.slane %v1279_v62, 9  ;;  %v7117_v42 = vld [vmem:[%s7254_s16 + $0x8c] sm:$0x1]  ;;  %v3952_v5 = vshll.u32 %v8161_v33, 16  ;;  %v9091_v52 = vcombine.low %v7938_v63, %v7946_v8  ;;  %v8197_v63 = vld [vmem:[%s7254_s16 + $0x50] sm:$0x1] }
  0xcf   : > { %6349 = vmatprep.mubr.bf16.mxu1 %v9089_v23  ;;  %6586 = vmatpush3.bf16.msra.mxu0 %v7053_v20  ;;  %v8136_v20 = vsel %vm7532_vm5, %v5460_v32, %v1391_v44  ;;  %v3892_v62 = vrot.slane %v3890_v48, 5  ;;  %v1401_v23 = vrot.slane %v7117_v42, 5  ;;  %v1280_v44 = vld [vmem:[%s7254_s16 + $0x90] sm:$0xe]  ;;  %v8149_v32 = vld [vmem:[%s7254_s16 + $0x4c] sm:$0xf]  ;;  %v3911_v48 = vor.u32 %v3910_v22, %v8139_v51 }
  0xd0   : > { %6587 = vmatprep.subr.bf16.mxu0 %v7057_v40  ;;  %v3928_v12 = vshll.u32 %v8149_v32, 16  ;;  %v3932_v18 = vshrl.u32 %v8149_v32, 16  ;;  %v9090_v42 = vcombine.low %v7926_v30, %v7934_v6  ;;  %v7051_v30 = vld [vmem:[%s9066_s1 + $0xd0] sm:$0xff]   ;;  %v3883_v6 = vsel %vm7286_vm2, %v3878_v46, %v8101_v39  ;;  %v7050_v8 = vld [vmem:[%s7254_s16 + $0xa8] sm:$0xff]   ;;  %v8204_v39 = vld [vmem:[%s7254_s16 + $0x5c] sm:$0x1] }
  0xd1   : > { %v3893_v58 = vsel %vm7286_vm2, %v3888_v38, %v3892_v62  ;;  %v5462_v22 = vrot.slane %v1280_v44, 9  ;;  %v3924_v25 = vrot.slane %v3922_v50, 5  ;;  %9092 = vst [vmem:[#allocation3_spill] sm:$0xff] %v8204_v39  ;;  %v3902_v46 = vrot.slane %v3901_v10, 4 }
  0xd2   : > { %v3912_v62 = vrot.slane %v3911_v48, 4  ;;  %v8206_v38 = vrot.slane %v3928_v12, 5  ;;  %v8208_v34 = vrot.slane %v3952_v5, 5  ;;  %v8213_v50 = vcombine.low %v3859_v0, %v3869_v28  ;;  %v5748_v28 = vld [vmem:[%s7254_s16 + $0x60] sm:$0xf] }
  0xd3   : > { %6588 = vmatpush3.bf16.msra.mxu0 %v7057_v40  ;;  %v8169_v40 = vsel %vm7532_vm5, %v5461_v53, %v1398_v3  ;;  %v3943_v53 = vshrl.u32 %v5745_v17, 16  ;;  %v3946_v3 = vshll.u32 %v5745_v17, 16  ;;  %v7118_v17 = vld [vmem:[%s7254_s16 + $0x94] sm:$0xf]  ;;  %v8217_v48 = vcombine.low %v3883_v6, %v3893_v58 }
  0xd4   : > { %6621 = vmatprep.subr.bf16.mxu0 %v8117_v21  ;;  %v3938_v0 = vshll.u32 %v8197_v63, 16  ;;  %v3907_v6 = vsel %vm7286_vm2, %v3902_v46, %v8139_v51  ;;  %v9095_v46 = vcombine.low %v7960_v61, %v7964_v36 }
  0xd5   : > { %6558 = vmatmul.mubr.bf16.gmra.mrb[16].mxu0 %v7044_v43  ;;  %v3956_v43 = vshrl.u32 %v8161_v33, 16  ;;  %v3945_v44 = vrot.slane %v3943_v53, 4  ;;  %v7119_v53 = vld [vmem:[%s7254_s16 + $0x98] sm:$0x1] }
  0xd6   : > { %6350 = vmatmul.mubr.bf16.vlgmr.msra.gmra.mrb[0].mxu1 %v9090_v42  ;;  %6561 = vmatprep.mubr.bf16.mxu0 %v7046_v19  ;;  %v8200_v19 = vrot.slane %v3914_v1, 5  ;;  %v1405_v42 = vrot.slane %v7118_v17, 5  ;;  %v7120_v17 = vld [vmem:[%s7254_s16 + $0xa0] sm:$0xf]  ;;  %v3940_v36 = vrot.slane %v3938_v0, 5 }
  0xd7   : > { %6382 = vmatpush3.bf16.msra.mxu1 %v7879_v60  ;;  %6353 = vmatprep.mubr.bf16.mxu1 %v9091_v52  ;;  %v8194_v60 = vsel %vm7532_vm5, %v1400_v2, %v1401_v23  ;;  %v3921_v52 = vrot.slane %v3919_v13, 4  ;;  %v3934_v23 = vrot.slane %v3932_v18, 4  ;;  %v3948_v2 = vrot.slane %v3946_v3, 5  ;;  %v7055_v13 = vld [vmem:[%s9066_s1 + $0xd8] sm:$0xff]  }
  0xd8   : > { %6383 = vmatprep.subr.bf16.mxu1 %v7047_v31  ;;  %v3958_v1 = vrot.slane %v3956_v43, 4  ;;  %v1281_v18 = vld [vmem:[%s7254_s16 + $0x9c] sm:$0xe]  ;;  %v1408_v3 = vrot.slane %v7119_v53, 5  ;;  %v8230_v43 = vld [vmem:[%s7254_s16 + $0x64] sm:$0xf] }
  0xd9   : > { %v3925_v5 = vor.u32 %v3924_v25, %v3921_v52  ;;  %9093 = vst [vmem:[#allocation4_spill] sm:$0xff] %v8230_v43  ;;  %v3935_v58 = vor.u32 %v3934_v23, %v8206_v38  ;;  %v1412_v12 = vrot.slane %v7120_v17, 5  ;;  %v9094_v25 = vcombine.low %v7950_v24, %v7954_v35  ;;  %v7052_v23 = vld [vmem:[%s7254_s16 + $0xb4] sm:$0xff]   ;;  %v7058_v24 = vld [vmem:[%s9066_s1 + $0xe0] sm:$0xff]   ;;  %v5751_v17 = vld [vmem:[%s7254_s16 + $0x6c] sm:$0xf] }
  0xda   : > { %v1407_v52 = vrot.slane %v1405_v42, 4  ;;  %v3949_v53 = vor.u32 %v3948_v2, %v3945_v44  ;;  %v3959_v51 = vor.u32 %v3958_v1, %v8208_v34  ;;  %v3967_v35 = vshrl.u32 %v5748_v28, 16  ;;  %v7121_v2 = vld [vmem:[%s7254_s16 + $0xa4] sm:$0x1] }
  0xdb   : > { %6384 = vmatpush3.bf16.msra.mxu1 %v7047_v31  ;;  %v8224_v31 = vsel %vm7532_vm5, %v5462_v22, %v1405_v42  ;;  %v3962_v22 = vshll.u32 %v8204_v39, 16  ;;  %v3980_v42 = vshrl.u32 %v8230_v43, 16  ;;  %v3926_v61 = vrot.slane %v3925_v5, 4  ;;  %v8399_v39 = vld [vmem:[%s7254_s16 + $0x98] sm:$0x1] }
  0xdc   : > { %6385 = vmatprep.subr.bf16.mxu1 %v7051_v30  ;;  %v5463_v44 = vrot.slane %v1281_v18, 9  ;;  %v1415_v1 = vrot.slane %v7121_v2, 5  ;;  %v3950_v5 = vrot.slane %v3949_v53, 4  ;;  %v3960_v18 = vrot.slane %v3959_v51, 4  ;;  %9109 = vst [vmem:[#allocation14_spill] sm:$0xff] %v8399_v39 }
  0xdd   : > { %6562 = vmatmul.mubr.bf16.gmra.mrb[20].mxu0 %v7048_v54  ;;  %v3917_v54 = vsel %vm7286_vm2, %v3912_v62, %v8200_v19  ;;  %v3976_v19 = vshll.u32 %v8230_v43, 16  ;;  %v7054_v62 = vld [vmem:[%s7254_s16 + $0xc0] sm:$0xff]   ;;  %v3964_v10 = vrot.slane %v3962_v22, 5  ;;  %v8266_v43 = vsel %vm7532_vm5, %v1407_v52, %v1408_v3 }
  0xde   : > { %6354 = vmatmul.mubr.bf16.gmra.mrb[4].mxu1 %v9094_v25  ;;  %6565 = vmatprep.mubr.bf16.mxu0 %v7050_v8  ;;  %v3970_v8 = vshll.u32 %v5748_v28, 16  ;;  %v3936_v25 = vrot.slane %v3935_v58, 4  ;;  %v1419_v28 = vrot.slane %v7122_v41, 5  ;;  %v8262_v55 = vcombine.low %v3907_v6, %v3917_v54  ;;  %v7060_v41 = vld [vmem:[%s9066_s1 + $0xe8] sm:$0xff]  }
  0xdf   : > { %6357 = vmatprep.mubr.bf16.mxu1 %v9095_v46  ;;  %6386 = vmatpush3.bf16.msra.mxu1 %v7051_v30  ;;  %v1282_v30 = vld [vmem:[%s7254_s16 + $0xa8] sm:$0xe]  ;;  %v1414_v46 = vrot.slane %v1412_v12, 4  ;;  %v3969_v0 = vrot.slane %v3967_v35, 4  ;;  %v8268_v58 = vrot.slane %v3976_v19, 5  ;;  %v3982_v22 = vrot.slane %v3980_v42, 4 }
  0xe0   : > { %6387 = vmatprep.subr.bf16.mxu1 %v7055_v13  ;;  %v3972_v2 = vrot.slane %v3970_v8, 5  ;;  %v3931_v3 = vsel %vm7286_vm2, %v3926_v61, %v8206_v38  ;;  %v8278_v6 = vsel %vm7532_vm5, %v5463_v44, %v1412_v12  ;;  %v3991_v54 = vshrl.u32 %v5751_v17, 16  ;;  %v7123_v38 = vld [vmem:[%s7254_s16 + $0xb0] sm:$0x1]  ;;  %v1283_v19 = vld [vmem:[%s7254_s16 + $0xb4] sm:$0xe] }
  0xe1   : > { %v3994_v52 = vshll.u32 %v5751_v17, 16  ;;  %v3941_v53 = vsel %vm7286_vm2, %v3936_v25, %v3940_v36  ;;  %v8287_v51 = vsel %vm7532_vm5, %v1414_v46, %v1415_v1  ;;  %v5464_v35 = vrot.slane %v1282_v30, 9  ;;  %v8309_v30 = vld [vmem:[%s7254_s16 + $0x74] sm:$0x1]  ;;  %v7124_v25 = vld [vmem:[%s7254_s16 + $0xb8] sm:$0xf] }
  0xe2   : > { %v1422_v8 = vrot.slane %v7123_v38, 5  ;;  %v9098_v12 = vcombine.low %v7981_v49, %v7995_v4  ;;  %v3955_v42 = vsel %vm7286_vm2, %v3950_v5, %v8208_v34  ;;  %v3965_v61 = vsel %vm7286_vm2, %v3960_v18, %v3964_v10  ;;  %v7056_v4 = vld [vmem:[%s7254_s16 + $0xcc] sm:$0xff]   ;;  %9100 = vst [vmem:[#allocation7_spill] sm:$0xff] %v8309_v30  ;;  %v5757_v38 = vld [vmem:[%s7254_s16 + $0x84] sm:$0xf] }
  0xe3   : > { %6388 = vmatpush3.bf16.msra.mxu1 %v7055_v13  ;;  %v8281_v13 = vld [vmem:[%s7254_s16 + $0x70] sm:$0xf]  ;;  %v1421_v36 = vrot.slane %v1419_v28, 4  ;;  %v3986_v44 = vshll.u32 %v8260_v47, 16  ;;  %v9099_v49 = vcombine.low %v8017_v26, %v8021_v56  ;;  %v3983_v1 = vor.u32 %v3982_v22, %v8268_v58  ;;  %v8326_v22 = vld [vmem:[%s7254_s16 + $0x7c] sm:$0xf] }
  0xe4   : > { %6389 = vmatprep.subr.bf16.mxu1 %v7058_v24  ;;  %9097 = vst [vmem:[#allocation6_spill] sm:$0xff] %v8281_v13  ;;  %v4000_v34 = vshll.u32 %v8281_v13, 16  ;;  %v4004_v10 = vshrl.u32 %v8281_v13, 16  ;;  %v5465_v17 = vrot.slane %v1283_v19, 9  ;;  %v1426_v46 = vrot.slane %v7124_v25, 5  ;;  %9101 = vst [vmem:[#allocation8_spill] sm:$0xff] %v8326_v22 }
  0xe5   : > { %6566 = vmatmul.mubr.bf16.gmra.mrb[24].mxu0 %v7052_v23  ;;  %v7062_v23 = vld [vmem:[%s9066_s1 + $0xf0] sm:$0xff]   ;;  %v3993_v26 = vrot.slane %v3991_v54, 4  ;;  %v3996_v56 = vrot.slane %v3994_v52, 5  ;;  %v8317_v18 = vcombine.low %v3931_v3, %v3941_v53  ;;  %v8329_v19 = vcombine.low %v3955_v42, %v3965_v61  ;;  %v7125_v3 = vld [vmem:[%s7254_s16 + $0xbc] sm:$0x1] }
  0xe6   : > { %6358 = vmatmul.mubr.bf16.gmra.mrb[8].mxu1 %v9098_v12  ;;  %6569 = vmatprep.mubr.bf16.mxu0 %v7054_v62  ;;  %v3973_v62 = vor.u32 %v3972_v2, %v3969_v0  ;;  %v8323_v2 = vsel %vm7532_vm5, %v5464_v35, %v1419_v28  ;;  %v8333_v54 = vsel %vm7532_vm5, %v1421_v36, %v1422_v8  ;;  %v8335_v52 = vrot.slane %v3986_v44, 5  ;;  %v7064_v12 = vld [vmem:[%s9066_s1 + $0xf8] sm:$0xff]   ;;  %v8342_v28 = vld [vmem:[%s7254_s16 + $0x88] sm:$0xf] }
  0xe7   : > { %6361 = vmatprep.mubr.bf16.mxu1 %v9099_v49  ;;  %6390 = vmatpush3.bf16.msra.mxu1 %v7058_v24  ;;  %v5754_v24 = vld [vmem:[%s7254_s16 + $0x78] sm:$0xf]  ;;  %v1429_v53 = vrot.slane %v7125_v3, 5  ;;  %9102 = vst [vmem:[#allocation9_spill] sm:$0xff] %v8342_v28  ;;  %v8346_v42 = vrot.slane %v3983_v1, 4  ;;  %v8348_v61 = vrot.slane %v4000_v34, 5  ;;  %v8352_v36 = vsel %vm7532_vm5, %v5465_v17, %v1426_v46 }
  0xe8   : > { %6391 = vmatprep.subr.bf16.mxu1 %v7060_v41  ;;  %v8344_v35 = vrot.slane %v3973_v62, 4  ;;  %v4006_v8 = vrot.slane %v4004_v10, 4  ;;  %v1428_v44 = vrot.slane %v1426_v46, 4  ;;  %v3997_v49 = vor.u32 %v3996_v56, %v3993_v26  ;;  %v5760_v3 = vld [vmem:[%s7254_s16 + $0x90] sm:$0xf] }
  0xe9   : > { %v4010_v25 = vshll.u32 %v8309_v30, 16  ;;  %v4018_v0 = vshll.u32 %v5754_v24, 16  ;;  %v4024_v62 = vshll.u32 %v8326_v22, 16  ;;  %v4028_v1 = vshrl.u32 %v8326_v22, 16  ;;  %v8359_v34 = vld [vmem:[%s7254_s16 + $0x94] sm:$0xf] }
  0xea   : > { %9103 = vst [vmem:[#allocation10_spill] sm:$0xff] %v8359_v34  ;;  %v9104_v10 = vcombine.low %v8061_v27, %v8065_v29  ;;  %v4039_v17 = vshrl.u32 %v5757_v38, 16  ;;  %v4042_v46 = vshll.u32 %v5757_v38, 16  ;;  %v4052_v26 = vshrl.u32 %v8342_v28, 16  ;;  %v5763_v38 = vld [vmem:[%s7254_s16 + $0x9c] sm:$0xf] }
  0xeb   : > { %6392 = vmatpush3.bf16.msra.mxu1 %v7060_v41  ;;  %v4015_v41 = vshrl.u32 %v5754_v24, 16  ;;  %v9105_v56 = vcombine.low %v8072_v45, %v8076_v14  ;;  %v4007_v29 = vor.u32 %v4006_v8, %v8348_v61  ;;  %v4066_v24 = vshll.u32 %v5760_v3, 16  ;;  %v8381_v45 = vld [vmem:[%s7254_s16 + $0x80] sm:$0x1] }
  0xec   : > { %6393 = vmatprep.subr.bf16.mxu1 %v7062_v23  ;;  %v8378_v5 = vrot.slane %v4010_v25, 5  ;;  %9106 = vst [vmem:[#allocation11_spill] sm:$0xff] %v8381_v45  ;;  %v4072_v14 = vshll.u32 %v8359_v34, 16  ;;  %v4020_v27 = vrot.slane %v4018_v0, 5  ;;  %v4030_v8 = vrot.slane %v4028_v1, 4 }
  0xed   : > { %6570 = vmatmul.mubr.bf16.gmra.mrb[28].mxu0 %v7056_v4  ;;  %v4048_v4 = vshll.u32 %v8342_v28, 16  ;;  %v8385_v28 = vrot.slane %v4024_v62, 5  ;;  %v8391_v22 = vld [vmem:[%s7254_s16 + $0xa0] sm:$0xf]  ;;  %v4041_v25 = vrot.slane %v4039_v17, 4  ;;  %v4044_v30 = vrot.slane %v4042_v46, 5 }
  0xee   : > { %6362 = vmatmul.mubr.bf16.gmra.mrb[12].mxu1 %v9104_v10  ;;  %6589 = vmatprep.mubr.bf16.mxu0 %v8130_v59  ;;  %v4063_v59 = vshrl.u32 %v5760_v3, 16  ;;  %v8376_v10 = vrot.slane %v3997_v49, 4  ;;  %v8388_v3 = vld [vmem:[%s7254_s16 + $0x8c] sm:$0x1]  ;;  %9108 = vst [vmem:[#allocation13_spill] sm:$0xff] %v8391_v22  ;;  %v4054_v47 = vrot.slane %v4052_v26, 4  ;;  %v8408_v62 = vsel %vm7532_vm5, %v1428_v44, %v1429_v53 }
  0xef   : > { %6365 = vmatprep.mubr.bf16.mxu1 %v9105_v56  ;;  %6394 = vmatpush3.bf16.msra.mxu1 %v7062_v23  ;;  %v4076_v23 = vshrl.u32 %v8359_v34, 16  ;;  %v4017_v56 = vrot.slane %v4015_v41, 4  ;;  %9107 = vst [vmem:[#allocation12_spill] sm:$0xff] %v8388_v3  ;;  %v7061_v49 = vld [vmem:[%s9066_s1 + $0x208] sm:$0xff]   ;;  %v8396_v13 = vrot.slane %v4048_v4, 5  ;;  %v4068_v34 = vrot.slane %v4066_v24, 5 }
  0xf0   : > { %6395 = vmatprep.subr.bf16.mxu1 %v7064_v12  ;;  %v5766_v41 = vld [vmem:[%s7254_s16 + $0xa8] sm:$0xf]  ;;  %v4065_v1 = vrot.slane %v4063_v59, 4  ;;  %v8413_v17 = vld [vmem:[%s9066_s1 + $0x100] sm:$0xff]   ;;  %v8416_v46 = vrot.slane %v4072_v14, 5  ;;  %v4087_v26 = vshrl.u32 %v5763_v38, 16  ;;  %v9111_v24 = vcombine.low %v8080_v16, %v8090_v15 }
  0xf1   : > { %9110 = vst [vmem:[#allocation15_spill] sm:$0xff] %v8413_v17  ;;  %v4078_v4 = vrot.slane %v4076_v23, 4  ;;  %v4090_v0 = vshll.u32 %v5763_v38, 16  ;;  %v8419_v53 = vrot.slane %v4007_v29, 4  ;;  %v4096_v44 = vshll.u32 %v8391_v22, 16  ;;  %v7063_v16 = vld [vmem:[%s9066_s1 + $0x210] sm:$0xff]  }
  0xf2   : > { %v4100_v59 = vshrl.u32 %v8391_v22, 16  ;;  %v4021_v14 = vor.u32 %v4020_v27, %v4017_v56  ;;  %v4031_v38 = vor.u32 %v4030_v8, %v8385_v28  ;;  %v4045_v23 = vor.u32 %v4044_v30, %v4041_v25  ;;  %v8431_v29 = vld [vmem:[%s7254_s16 + $0xac] sm:$0xf]  ;;  %v8444_v25 = vld [vmem:[%s7254_s16 + $0xa4] sm:$0x1] }
  0xf3   : > { %6396 = vmatpush3.bf16.msra.mxu1 %v7064_v12  ;;  %v4034_v12 = vshll.u32 %v8381_v45, 16  ;;  %9112 = vst [vmem:[#allocation16_spill] sm:$0xff] %v8431_v29  ;;  %v4055_v15 = vor.u32 %v4054_v47, %v8396_v13  ;;  %v4111_v27 = vshrl.u32 %v5766_v41, 16  ;;  %v4114_v30 = vshll.u32 %v5766_v41, 16 }
  0xf4   : > { %6669 = vmatprep.subr.bf16.mxu1 %v8413_v17  ;;  %v9113_v17 = vcombine.low %v8136_v20, %v8157_v7  ;;  %v4069_v56 = vor.u32 %v4068_v34, %v4065_v1  ;;  %v4079_v8 = vor.u32 %v4078_v4, %v8416_v46  ;;  %v4089_v20 = vrot.slane %v4087_v26, 4 }
  0xf5   : > { %6590 = vmatmul.mubr.bf16.vlgmr.msra.gmra.mrb[0].mxu0 %v8213_v50  ;;  %v4058_v50 = vshll.u32 %v8388_v3, 16  ;;  %v4092_v7 = vrot.slane %v4090_v0, 5  ;;  %v4124_v22 = vshrl.u32 %v8431_v29, 16  ;;  %v4022_v47 = vrot.slane %v4021_v14, 4  ;;  %v7065_v0 = vld [vmem:[%s9066_s1 + $0x218] sm:$0xff]  }
  0xf6   : > { %6366 = vmatmul.mubr.bf16.gmra.mrb[16].mxu1 %v9111_v24  ;;  %6622 = vmatpush3.bf16.msra.mxu0 %v8117_v21  ;;  %v4082_v21 = vshll.u32 %v8399_v39, 16  ;;  %v4120_v24 = vshll.u32 %v8431_v29, 16  ;;  %v4032_v39 = vrot.slane %v4031_v38, 4  ;;  %v4036_v3 = vrot.slane %v4034_v12, 5 }
  0xf7   : > { %6369 = vmatprep.mubr.bf16.mxu1 %v9113_v17  ;;  %6593 = vmatprep.mubr.bf16.mxu0 %v8217_v48  ;;  %v8446_v17 = vrot.slane %v4096_v44, 5  ;;  %v4102_v48 = vrot.slane %v4100_v59, 4  ;;  %v4060_v41 = vrot.slane %v4058_v50, 5  ;;  %v4046_v34 = vrot.slane %v4045_v23, 4 }
  0xf8   : > { %6623 = vmatprep.subr.bf16.mxu0 %v7061_v49  ;;  %v4056_v1 = vrot.slane %v4055_v15, 4  ;;  %v4113_v4 = vrot.slane %v4111_v27, 4  ;;  %v4116_v45 = vrot.slane %v4114_v30, 5  ;;  %v4070_v26 = vrot.slane %v4069_v56, 4  ;;  %v8512_v27 = vld [vmem:[%s7254_s16 + $0xbc] sm:$0x1] }
  0xf9   : > { %v4084_v44 = vrot.slane %v4082_v21, 5  ;;  %v4093_v59 = vor.u32 %v4092_v7, %v4089_v20  ;;  %v4106_v29 = vshll.u32 %v8444_v25, 16  ;;  %v4103_v12 = vor.u32 %v4102_v48, %v8446_v17  ;;  %v8479_v21 = vld [vmem:[%s7254_s16 + $0xb0] sm:$0x1] }
  0xfa   : > { %6624 = vmatpush3.bf16.msra.mxu0 %v7061_v49  ;;  %v4080_v49 = vrot.slane %v4079_v8, 4  ;;  %v8456_v14 = vrot.slane %v4120_v24, 5  ;;  %v4126_v38 = vrot.slane %v4124_v22, 4  ;;  %v9114_v23 = vor.u32 %v7864_v57, %v7862_v11 }
  0xfb   : > { %6625 = vmatprep.subr.bf16.mxu0 %v7063_v16  ;;  %v9115_v15 = vcombine.low %v8169_v40, %v8194_v60  ;;  %v4013_v22 = vsel %vm7286_vm2, %v8419_v53, %v8378_v5  ;;  %v4027_v57 = vsel %vm7286_vm2, %v4022_v47, %v8385_v28  ;;  %v9116_v40 = vcombine.low %v8224_v31, %v8266_v43  ;;  %v7068_v31 = vld [vmem:[%s9066_s1 + $0x220] sm:$0xff]  }
  0xfc   : > { %v8461_v50 = vrot.slane %v9114_v23, 4  ;;  %v4037_v60 = vsel %vm7286_vm2, %v4032_v39, %v4036_v3  ;;  %v4117_v5 = vor.u32 %v4116_v45, %v4113_v4  ;;  %v4061_v28 = vsel %vm7286_vm2, %v4056_v1, %v4060_v41  ;;  %v5806_v41 = vld [vmem:[%s7254_s16 + $0x48] sm:$0xe] }
  0xfd   : > { %6594 = vmatmul.mubr.bf16.gmra.mrb[4].mxu0 %v8262_v55  ;;  %v4003_v55 = vsel %vm7286_vm2, %v8376_v10, %v8348_v61  ;;  %v5769_v61 = vld [vmem:[%s7254_s16 + $0xb4] sm:$0xf]  ;;  %v8491_v10 = vld [vmem:[%s7254_s16 + $0xb8] sm:$0xf]  ;;  %v4075_v39 = vsel %vm7286_vm2, %v4070_v26, %v8416_v46  ;;  %v8501_v43 = vrot.slane %v4093_v59, 4  ;;  %v8503_v3 = vrot.slane %v4106_v29, 5 }
  0xfe   : > { %6370 = vmatmul.mubr.bf16.gmra.mrb[20].mxu1 %v9115_v15  ;;  %6597 = vmatprep.mubr.bf16.mxu0 %v8317_v18  ;;  %v4051_v18 = vsel %vm7286_vm2, %v4046_v34, %v8396_v13  ;;  %v4085_v13 = vsel %vm7286_vm2, %v4080_v49, %v4084_v44  ;;  %v8507_v45 = vrot.slane %v4103_v12, 4  ;;  %v4127_v53 = vor.u32 %v4126_v38, %v8456_v14  ;;  %v5807_v26 = vld [vmem:[%s7254_s16 + $0x54] sm:$0xe] }
  0xff   : > { %6373 = vmatprep.mubr.bf16.mxu1 %v9116_v40  ;;  %6626 = vmatpush3.bf16.msra.mxu0 %v7063_v16  ;;  %v4130_v16 = vshll.u32 %v8479_v21, 16  ;;  %v9117_v46 = vsel %vm7286_vm2, %v8346_v42, %v8335_v52  ;;  %v9118_v29 = vsel %vm7286_vm2, %v8344_v35, %v8268_v58  ;;  %v4135_v56 = vshrl.u32 %v5769_v61, 16 }
 0x100   : > { %6627 = vmatprep.subr.bf16.mxu0 %v7065_v0  ;;  %v5784_v30 = vcombine.low %v9118_v29, %v9117_v46  ;;  %v4138_v8 = vshll.u32 %v5769_v61, 16  ;;  %v4144_v20 = vshll.u32 %v8491_v10, 16  ;;  %v5480_v7 = vcombine.low %v8323_v2, %v8333_v54  ;;  %v7071_v2 = vld [vmem:[%s9066_s1 + $0x228] sm:$0xff]   ;;  %v5772_v54 = vld [vmem:[%s7254_s16 + $0xc0] sm:$0xf]  ;;  %v9122_v29 = vld [vmem:[#allocation5_spill] sm:$0xff] }
 0x101   : > { %v5481_v48 = vcombine.low %v8352_v36, %v8408_v62  ;;  %v5785_v24 = vcombine.low %v4003_v55, %v4013_v22  ;;  %v8529_v52 = vrot.slane %v4117_v5, 4  ;;  %v5786_v42 = vcombine.low %v4027_v57, %v4037_v60 }
 0x102   : > { %v8531_v58 = vcombine.low %v4051_v18, %v4061_v28  ;;  %v8533_v35 = vcombine.low %v4075_v39, %v4085_v13  ;;  %v4099_v47 = vsel %vm7286_vm2, %v8501_v43, %v8446_v17  ;;  %v4109_v34 = vsel %vm7286_vm2, %v8507_v45, %v8503_v3  ;;  %v5809_v28 = vld [vmem:[%s7254_s16 + $0x6c] sm:$0xe] }
 0x103   : > { %6628 = vmatpush3.bf16.msra.mxu0 %v7065_v0  ;;  %v8549_v1 = vrot.slane %v4127_v53, 4  ;;  %v8551_v4 = vrot.slane %v4130_v16, 5  ;;  %v4148_v0 = vshrl.u32 %v8491_v10, 16  ;;  %v9119_v44 = vcombine.low %v8278_v6, %v8287_v51  ;;  %v7074_v6 = vld [vmem:[%s9066_s1 + $0x230] sm:$0xff]   ;;  %v8573_v51 = vld [vmem:[%s7254_s16 + $0xc4] sm:$0xf] }
 0x104   : > { %6629 = vmatprep.subr.bf16.mxu0 %v7068_v31  ;;  %v8558_v59 = vrot.slane %v4135_v56, 4  ;;  %v8562_v49 = vrot.slane %v4144_v20, 5  ;;  %v4154_v12 = vshll.u32 %v8512_v27, 16  ;;  %v4123_v38 = vsel %vm7286_vm2, %v8529_v52, %v8456_v14  ;;  %v5808_v14 = vld [vmem:[%s7254_s16 + $0x60] sm:$0xe]  ;;  %v9120_v39 = vld [vmem:[#allocation3_spill] sm:$0xff] }
 0x105   : > { %6598 = vmatmul.mubr.bf16.gmra.mrb[8].mxu0 %v8329_v19  ;;  %v8560_v19 = vrot.slane %v4138_v8, 5  ;;  %v4159_v23 = vshrl.u32 %v5772_v54, 16  ;;  %v5822_v15 = vrot.slane %v5806_v41, 9  ;;  %v4621_v55 = vrot.slane %v8149_v32, 5  ;;  %v7066_v13 = vld [vmem:[%s7254_s16 + $0xc] sm:$0xff]   ;;  %v7077_v56 = vld [vmem:[%s9066_s1 + $0x238] sm:$0xff]  }
 0x106   : > { %6374 = vmatmul.mubr.bf16.gmra.mrb[24].mxu1 %v9119_v44  ;;  %6601 = vmatprep.mubr.bf16.mxu0 %v5784_v30  ;;  %v4162_v22 = vshll.u32 %v5772_v54, 16  ;;  %v4624_v57 = vrot.slane %v8197_v63, 5  ;;  %v5823_v40 = vrot.slane %v5807_v26, 9  ;;  %v4628_v60 = vrot.slane %v8161_v33, 5  ;;  %v9121_v16 = vld [vmem:[#allocation4_spill] sm:$0xff]  ;;  %v9123_v52 = vld [vmem:[#allocation6_spill] sm:$0xff] }
 0x107   : > { %6377 = vmatprep.mubr.bf16.mxu1 %v5480_v7  ;;  %6630 = vmatpush3.bf16.msra.mxu0 %v7068_v31  ;;  %v4133_v18 = vsel %vm7286_vm2, %v8549_v1, %v8551_v4  ;;  %v8583_v5 = vrot.slane %v4148_v0, 4  ;;  %v8587_v61 = vsel %vm7532_vm5, %v5822_v15, %v4621_v55  ;;  %v4623_v32 = vrot.slane %v4621_v55, 4  ;;  %v9124_v4 = vld [vmem:[#allocation7_spill] sm:$0xff] }
 0x108   : > { %6631 = vmatprep.subr.bf16.mxu0 %v7071_v2  ;;  %v4168_v31 = vshll.u32 %v8573_v51, 16  ;;  %v8593_v63 = vsel %vm7532_vm5, %v5823_v40, %v4628_v60  ;;  %v4630_v33 = vrot.slane %v4628_v60, 4  ;;  %v4631_v3 = vrot.slane %v9120_v39, 5  ;;  %v8624_v26 = vld [vmem:[%s7254_s16 + $0xc8] sm:$0x1]  ;;  %v7067_v40 = vld [vmem:[%s7254_s16 + $0x18] sm:$0xff]  }
 0x109   : > { %v8599_v45 = vsel %vm7532_vm5, %v4623_v32, %v4624_v57  ;;  %v5824_v53 = vrot.slane %v5808_v14, 9  ;;  %v4635_v46 = vrot.slane %v9121_v16, 5  ;;  %v4638_v30 = vrot.slane %v9122_v29, 5  ;;  %v7069_v39 = vld [vmem:[%s7254_s16 + $0x24] sm:$0xff]  }
 0x10a   : > { %v5838_v8 = vcombine.low %v8587_v61, %v8599_v45  ;;  %v8610_v20 = vsel %vm7532_vm5, %v4630_v33, %v4631_v3  ;;  %v5825_v7 = vrot.slane %v5809_v28, 9  ;;  %v4645_v0 = vrot.slane %v9124_v4, 5  ;;  %v9126_v28 = vld [vmem:[#allocation11_spill] sm:$0xff]  ;;  %v5579_v61 = vld [vmem:[%s7254_s16 + $0x90] sm:$0xf] }
 0x10b   : > { %6632 = vmatpush3.bf16.msra.mxu0 %v7071_v2  ;;  %v4642_v2 = vrot.slane %v9123_v52, 5  ;;  %v5839_v54 = vcombine.low %v8593_v63, %v8610_v20  ;;  %v8617_v41 = vsel %vm7532_vm5, %v5824_v53, %v4635_v46  ;;  %v4637_v1 = vrot.slane %v4635_v46, 4  ;;  %v9127_v53 = vld [vmem:[#allocation2_spill] sm:$0xff]  ;;  %v7083_v45 = vld [vmem:[%s7254_s16 + $0xa8] sm:$0xff]  }
 0x10c   : > { %6633 = vmatprep.subr.bf16.mxu0 %v7074_v6  ;;  %v8626_v44 = vrot.slane %v4159_v23, 4  ;;  %v8639_v36 = vcombine.low %v4099_v47, %v4109_v34  ;;  %v4141_v62 = vor.u32 %v8560_v19, %v8558_v59  ;;  %v5810_v23 = vld [vmem:[%s7254_s16 + $0x78] sm:$0xe]  ;;  %v8651_v57 = vrot.slane %v4154_v12, 5  ;;  %v5775_v12 = vld [vmem:[%s7254_s16 + $0xcc] sm:$0xf] }
 0x10d   : > { %6602 = vmatmul.mubr.bf16.gmra.mrb[12].mxu0 %v5785_v24  ;;  %v8628_v24 = vrot.slane %v4162_v22, 5  ;;  %v8632_v15 = vsel %vm7532_vm5, %v5825_v7, %v4642_v2  ;;  %v4644_v55 = vrot.slane %v4642_v2, 4  ;;  %v8649_v22 = vcombine.low %v4123_v38, %v4133_v18  ;;  %v5573_v47 = vld [vmem:[%s7254_s16 + $0x78] sm:$0xf]  ;;  %v9125_v18 = vld [vmem:[#allocation8_spill] sm:$0xff] }
 0x10e   : > { %6378 = vmatmul.mubr.bf16.gmra.mrb[28].mxu1 %v5481_v48  ;;  %6605 = vmatprep.mubr.bf16.mxu0 %v5786_v42  ;;  %v4172_v48 = vshrl.u32 %v8573_v51, 16  ;;  %v8646_v42 = vsel %vm7532_vm5, %v4637_v1, %v4638_v30  ;;  %v4151_v34 = vor.u32 %v8583_v5, %v8562_v49  ;;  %v8662_v59 = vrot.slane %v4168_v31, 5  ;;  %v8676_v31 = vld [vmem:[%s7254_s16 + $0xd0] sm:$0xf]  ;;  %v9128_v1 = vld [vmem:[#allocation9_spill] sm:$0xff] }
 0x10f   : > { %6397 = vmatprep.mubr.bf16.mxu1 %v7066_v13  ;;  %6634 = vmatpush3.bf16.msra.mxu0 %v7074_v6  ;;  %v5840_v17 = vcombine.low %v8617_v41, %v8646_v42  ;;  %v8657_v43 = vsel %vm7532_vm5, %v4644_v55, %v4645_v0  ;;  %v4178_v19 = vshll.u32 %v8624_v26, 16  ;;  %v5811_v6 = vld [vmem:[%s7254_s16 + $0x84] sm:$0xe]  ;;  %v4165_v60 = vor.u32 %v8628_v24, %v8626_v44  ;;  %v9129_v24 = vld [vmem:[#allocation12_spill] sm:$0xff]  ;;  %v7147_v63 = vld [vmem:[%s7254_s16 + $0x8c] sm:$0x1] }
 0x110   : > { %6635 = vmatprep.subr.bf16.mxu0 %v7077_v56  ;;  %v5841_v38 = vcombine.low %v8632_v15, %v8657_v43  ;;  %v5826_v14 = vrot.slane %v5810_v23, 9  ;;  %v4649_v32 = vrot.slane %v9125_v18, 5  ;;  %v4652_v33 = vrot.slane %v9126_v28, 5 }
 0x111   : > { %v4174_v5 = vrot.slane %v4172_v48, 4  ;;  %v2403_v3 = vshrl.u32 %v5573_v47, 16  ;;  %v2406_v13 = vshll.u32 %v5573_v47, 16  ;;  %v2425_v16 = vsel %vm7286_vm2, %v8461_v50, %v9127_v53 }
 0x112   : > { %v4183_v46 = vshrl.u32 %v5775_v12, 16  ;;  %v8684_v29 = vsel %vm7532_vm5, %v5826_v14, %v4649_v32  ;;  %v4651_v30 = vrot.slane %v4649_v32, 4  ;;  %v5827_v7 = vrot.slane %v5811_v6, 9  ;;  %v7127_v6 = vld [vmem:[%s9066_s1 + $0x108] sm:$0xff]  }
 0x113   : > { %6636 = vmatpush3.bf16.msra.mxu0 %v7077_v56  ;;  %v4186_v52 = vshll.u32 %v5775_v12, 16  ;;  %v2405_v2 = vrot.slane %v2403_v3, 4  ;;  %v2408_v56 = vrot.slane %v2406_v13, 5  ;;  %v4656_v4 = vrot.slane %v9128_v1, 5  ;;  %v5812_v12 = vld [vmem:[%s7254_s16 + $0x90] sm:$0xe] }
 0x114   : > { %v4192_v50 = vshll.u32 %v8676_v31, 16  ;;  %v4196_v0 = vshrl.u32 %v8676_v31, 16  ;;  %v8693_v44 = vsel %vm7532_vm5, %v4651_v30, %v4652_v33  ;;  %v4659_v55 = vrot.slane %v9129_v24, 5  ;;  %v7070_v3 = vld [vmem:[%s7254_s16 + $0x30] sm:$0xff]  }
 0x115   : > { %6606 = vmatmul.mubr.bf16.gmra.mrb[16].mxu0 %v8531_v58  ;;  %v9130_v58 = vld [vmem:[#allocation15_spill] sm:$0xff]  ;;  %v4175_v48 = vor.u32 %v4174_v5, %v8662_v59  ;;  %v2409_v23 = vor.u32 %v2408_v56, %v2405_v2  ;;  %v4658_v47 = vrot.slane %v4656_v4, 4  ;;  %v4152_v14 = vrot.slane %v4151_v34, 4  ;;  %v8714_v13 = vld [vmem:[%s7254_s16 + $0xd4] sm:$0x1]  ;;  %v9131_v2 = vld [vmem:[#allocation10_spill] sm:$0xff] }
 0x116   : > { %6398 = vmatmul.mubr.bf16.vlgmr.msra.gmra.mrb[0].mxu1 %v7067_v40  ;;  %6609 = vmatprep.mubr.bf16.mxu0 %v8533_v35  ;;  %v5842_v35 = vcombine.low %v8684_v29, %v8693_v44  ;;  %v4142_v40 = vrot.slane %v4141_v62, 4  ;;  %v4180_v18 = vrot.slane %v4178_v19, 5  ;;  %v8706_v32 = vsel %vm7532_vm5, %v5827_v7, %v4656_v4  ;;  %v7072_v19 = vld [vmem:[%s7254_s16 + $0x3c] sm:$0xff]   ;;  %v7128_v1 = vld [vmem:[%s9066_s1 + $0x110] sm:$0xff]  }
 0x117   : > { %6677 = vmatpush3.bf16.msra.mxu1 %v9130_v58  ;;  %6401 = vmatprep.mubr.bf16.mxu1 %v7069_v39  ;;  %v4185_v28 = vrot.slane %v4183_v46, 4  ;;  %v4188_v33 = vrot.slane %v4186_v52, 5  ;;  %v2410_v39 = vrot.slane %v2409_v23, 4  ;;  %v8710_v5 = vsel %vm7532_vm5, %v4658_v47, %v4659_v55  ;;  %v7129_v47 = vld [vmem:[%s7254_s16 + $0x1c] sm:$0xf] }
 0x118   : > { %6670 = vmatprep.subr.bf16.mxu1 %v7127_v6  ;;  %v8716_v53 = vrot.slane %v4192_v50, 5  ;;  %v4198_v30 = vrot.slane %v4196_v0, 4  ;;  %v5843_v62 = vcombine.low %v8706_v32, %v8710_v5  ;;  %v5828_v34 = vrot.slane %v5812_v12, 9 }
 0x119   : > { %v4166_v7 = vrot.slane %v4165_v60, 4  ;;  %v4176_v46 = vrot.slane %v4175_v48, 4  ;;  %v2415_v52 = vsel %vm7286_vm2, %v2410_v39, %v7862_v11  ;;  %v4663_v56 = vrot.slane %v9131_v2, 5  ;;  %v9132_v11 = vld [vmem:[#allocation14_spill] sm:$0xff]  ;;  %v7073_v39 = vld [vmem:[%s7254_s16 + $0x48] sm:$0xff]  }
 0x11a   : > { %v4147_v4 = vsel %vm7286_vm2, %v4142_v40, %v8562_v49  ;;  %v4157_v60 = vsel %vm7286_vm2, %v4152_v14, %v8651_v57  ;;  %v8734_v50 = vcombine.low %v2415_v52, %v2425_v16  ;;  %v4666_v0 = vrot.slane %v9132_v11, 5  ;;  %v5802_v57 = vld [vmem:[%s7254_s16 + $0x18] sm:$0xe]  ;;  %v5813_v16 = vld [vmem:[%s7254_s16 + $0x9c] sm:$0xe] }
 0x11b   : > { %6678 = vmatpush3.bf16.msra.mxu1 %v7127_v6  ;;  %v4189_v24 = vor.u32 %v4188_v33, %v4185_v28  ;;  %v4202_v55 = vshll.u32 %v8714_v13, 16  ;;  %v8741_v58 = vsel %vm7532_vm5, %v5828_v34, %v4663_v56  ;;  %v4665_v48 = vrot.slane %v4663_v56, 4  ;;  %v7130_v40 = vld [vmem:[%s9066_s1 + $0x118] sm:$0xff]   ;;  %v7131_v2 = vld [vmem:[%s7254_s16 + $0x20] sm:$0x1] }
 0x11c   : > { %6671 = vmatprep.subr.bf16.mxu1 %v7128_v1  ;;  %v4199_v49 = vor.u32 %v4198_v30, %v8716_v53  ;;  %v4181_v23 = vsel %vm7286_vm2, %v4176_v46, %v4180_v18  ;;  %v4593_v12 = vrot.slane %v7129_v47, 5  ;;  %v5791_v6 = vcombine.low %v4147_v4, %v4157_v60  ;;  %v9133_v34 = vld [vmem:[#allocation13_spill] sm:$0xff]  ;;  %v5814_v11 = vld [vmem:[%s7254_s16 + $0xa8] sm:$0xe] }
 0x11d   : > { %6610 = vmatmul.mubr.bf16.gmra.mrb[20].mxu0 %v8639_v36  ;;  %v4171_v36 = vsel %vm7286_vm2, %v4166_v7, %v8662_v59  ;;  %v4190_v14 = vrot.slane %v4189_v24, 4  ;;  %v4204_v28 = vrot.slane %v4202_v55, 5  ;;  %v5818_v18 = vrot.slane %v5802_v57, 9  ;;  %v7075_v46 = vld [vmem:[%s7254_s16 + $0x54] sm:$0xff]   ;;  %v5803_v55 = vld [vmem:[%s7254_s16 + $0x24] sm:$0xe] }
 0x11e   : > { %6402 = vmatmul.mubr.bf16.gmra.mrb[4].mxu1 %v7070_v3  ;;  %6613 = vmatprep.mubr.bf16.mxu0 %v8649_v22  ;;  %v8755_v22 = vsel %vm7532_vm5, %v4665_v48, %v4666_v0  ;;  %v5829_v33 = vrot.slane %v5813_v16, 9  ;;  %v5792_v3 = vcombine.low %v4171_v36, %v4181_v23  ;;  %v4200_v30 = vrot.slane %v4199_v49, 4  ;;  %v7133_v48 = vld [vmem:[%s7254_s16 + $0x28] sm:$0xf]  ;;  %v7134_v36 = vld [vmem:[%s7254_s16 + $0x34] sm:$0xf] }
 0x11f   : > { %6405 = vmatprep.mubr.bf16.mxu1 %v7072_v19  ;;  %6679 = vmatpush3.bf16.msra.mxu1 %v7128_v1  ;;  %v5844_v59 = vcombine.low %v8741_v58, %v8755_v22  ;;  %v4670_v19 = vrot.slane %v9133_v34, 5  ;;  %v4673_v7 = vrot.slane %v8444_v25, 5  ;;  %v4595_v52 = vrot.slane %v4593_v12, 4  ;;  %v7132_v1 = vld [vmem:[%s9066_s1 + $0x120] sm:$0xff]  }
 0x120   : > { %6672 = vmatprep.subr.bf16.mxu1 %v7130_v40  ;;  %v4596_v56 = vrot.slane %v7131_v2, 5  ;;  %v4594_v25 = vsel %vm7532_vm5, %v5818_v18, %v4593_v12  ;;  %v4195_v0 = vsel %vm7286_vm2, %v4190_v14, %v8716_v53  ;;  %v4205_v24 = vsel %vm7286_vm2, %v4200_v30, %v4204_v28  ;;  %v5804_v12 = vld [vmem:[%s7254_s16 + $0x30] sm:$0xe]  ;;  %v7076_v30 = vld [vmem:[%s7254_s16 + $0x60] sm:$0xff]  }
 0x121   : > { %v8772_v4 = vsel %vm7532_vm5, %v5829_v33, %v4670_v19  ;;  %v4672_v60 = vrot.slane %v4670_v19, 4  ;;  %v4600_v49 = vrot.slane %v7133_v48, 5  ;;  %v4607_v23 = vrot.slane %v7134_v36, 5  ;;  %v7136_v33 = vld [vmem:[%s7254_s16 + $0x2c] sm:$0x1] }
 0x122   : > { %v4597_v16 = vsel %vm7532_vm5, %v4595_v52, %v4596_v56  ;;  %v5830_v47 = vrot.slane %v5814_v11, 9  ;;  %v5793_v28 = vcombine.low %v4195_v0, %v4205_v24  ;;  %v5819_v18 = vrot.slane %v5803_v55, 9  ;;  %v7078_v52 = vld [vmem:[%s7254_s16 + $0x6c] sm:$0xff]   ;;  %v5815_v11 = vld [vmem:[%s7254_s16 + $0xb4] sm:$0xe] }
 0x123   : > { %6680 = vmatpush3.bf16.msra.mxu1 %v7130_v40  ;;  %v8786_v57 = vsel %vm7532_vm5, %v4672_v60, %v4673_v7  ;;  %v9134_v40 = vld [vmem:[#allocation16_spill] sm:$0xff]  ;;  %v5834_v34 = vcombine.low %v4594_v25, %v4597_v16  ;;  %v4602_v19 = vrot.slane %v4600_v49, 4  ;;  %v5820_v2 = vrot.slane %v5804_v12, 9  ;;  %v5805_v0 = vld [vmem:[%s7254_s16 + $0x3c] sm:$0xe] }
 0x124   : > { %6673 = vmatprep.subr.bf16.mxu1 %v7132_v1  ;;  %v5845_v53 = vcombine.low %v8772_v4, %v8786_v57  ;;  %v4677_v14 = vrot.slane %v9134_v40, 5  ;;  %v4609_v56 = vrot.slane %v4607_v23, 4  ;;  %v7138_v24 = vld [vmem:[%s7254_s16 + $0x40] sm:$0xf]  ;;  %v4601_v48 = vsel %vm7532_vm5, %v5819_v18, %v4600_v49  ;;  %v7140_v18 = vld [vmem:[%s7254_s16 + $0x44] sm:$0x1] }
 0x125   : > { %6614 = vmatmul.mubr.bf16.gmra.mrb[24].mxu0 %v5791_v6  ;;  %v7135_v6 = vld [vmem:[%s9066_s1 + $0x128] sm:$0xff]   ;;  %v4614_v55 = vrot.slane %v7138_v24, 5  ;;  %v4684_v12 = vrot.slane %v8491_v10, 5  ;;  %v4608_v49 = vsel %vm7532_vm5, %v5820_v2, %v4607_v23  ;;  %v7141_v10 = vld [vmem:[%s9066_s1 + $0x138] sm:$0xff]   ;;  %v5816_v23 = vld [vmem:[%s7254_s16 + $0xc0] sm:$0xe] }
 0x126   : > { %6406 = vmatmul.mubr.bf16.gmra.mrb[8].mxu1 %v7073_v39  ;;  %6617 = vmatprep.mubr.bf16.mxu0 %v5792_v3  ;;  %v4603_v39 = vrot.slane %v7136_v33, 5  ;;  %v4680_v3 = vrot.slane %v8479_v21, 5  ;;  %v8803_v7 = vsel %vm7532_vm5, %v5830_v47, %v4677_v14  ;;  %v7139_v21 = vld [vmem:[%s9066_s1 + $0x130] sm:$0xff]   ;;  %v5831_v47 = vrot.slane %v5815_v11, 9 }
 0x127   : > { %6409 = vmatprep.mubr.bf16.mxu1 %v7075_v46  ;;  %6681 = vmatpush3.bf16.msra.mxu1 %v7132_v1  ;;  %v4679_v46 = vrot.slane %v4677_v14, 4  ;;  %v7137_v1 = vld [vmem:[%s7254_s16 + $0x38] sm:$0x1]  ;;  %v5821_v14 = vrot.slane %v5805_v0, 9  ;;  %v4617_v33 = vrot.slane %v7140_v18, 5  ;;  %v4691_v11 = vrot.slane %v8573_v51, 5 }
 0x128   : > { %6674 = vmatprep.subr.bf16.mxu1 %v7135_v6  ;;  %v4610_v60 = vrot.slane %v7137_v1, 5  ;;  %v4604_v36 = vsel %vm7532_vm5, %v4602_v19, %v4603_v39  ;;  %v4686_v39 = vrot.slane %v4684_v12, 4  ;;  %v5570_v19 = vld [vmem:[%s7254_s16 + $0x6c] sm:$0xf]  ;;  %v7081_v18 = vld [vmem:[%s7254_s16 + $0x90] sm:$0xff]   ;;  %v2446_v20 = vshll.u32 %v7147_v63, 16 }
 0x129   : > { %v8815_v25 = vsel %vm7532_vm5, %v4679_v46, %v4680_v3  ;;  %v5835_v3 = vcombine.low %v4601_v48, %v4604_v36  ;;  %v4615_v1 = vsel %vm7532_vm5, %v5821_v14, %v4614_v55  ;;  %v2379_v0 = vshrl.u32 %v5570_v19, 16  ;;  %v5817_v51 = vld [vmem:[%s7254_s16 + $0xcc] sm:$0xe] }
 0x12a   : > { %v5846_v16 = vcombine.low %v8803_v7, %v8815_v25  ;;  %v4611_v40 = vsel %vm7532_vm5, %v4609_v56, %v4610_v60  ;;  %v5832_v56 = vrot.slane %v5816_v23, 9  ;;  %v2382_v24 = vshll.u32 %v5570_v19, 16 }
 0x12b   : > { %6682 = vmatpush3.bf16.msra.mxu1 %v7135_v6  ;;  %v4687_v6 = vrot.slane %v8512_v27, 5  ;;  %v8835_v27 = vsel %vm7532_vm5, %v5831_v47, %v4684_v12  ;;  %v4694_v36 = vrot.slane %v8624_v26, 5  ;;  %v4693_v12 = vrot.slane %v4691_v11, 4 }
 0x12c   : > { %6675 = vmatprep.subr.bf16.mxu1 %v7139_v21  ;;  %v2384_v26 = vrot.slane %v2382_v24, 5  ;;  %v4701_v23 = vrot.slane %v8714_v13, 5 }
 0x12d   : > { %6618 = vmatmul.mubr.bf16.gmra.mrb[28].mxu0 %v5793_v28  ;;  %v4616_v28 = vrot.slane %v4614_v55, 4  ;;  %v8842_v46 = vsel %vm7532_vm5, %v4686_v39, %v4687_v6  ;;  %v8856_v55 = vsel %vm7532_vm5, %v5832_v56, %v4691_v11  ;;  %v4698_v39 = vrot.slane %v8676_v31, 5  ;;  %v7143_v56 = vld [vmem:[%s7254_s16 + $0x74] sm:$0x1] }
 0x12e   : > { %6410 = vmatmul.mubr.bf16.gmra.mrb[12].mxu1 %v7076_v30  ;;  %6637 = vmatprep.mubr.bf16.mxu0 %v5834_v34  ;;  %v7079_v30 = vld [vmem:[%s7254_s16 + $0x78] sm:$0xff]   ;;  %v5836_v34 = vcombine.low %v4608_v49, %v4611_v40  ;;  %v5847_v2 = vcombine.low %v8835_v27, %v8842_v46  ;;  %v8861_v49 = vsel %vm7532_vm5, %v4693_v12, %v4694_v36  ;;  %v2381_v40 = vrot.slane %v2379_v0, 4  ;;  %v7144_v0 = vld [vmem:[%s7254_s16 + $0x88] sm:$0xf] }
 0x12f   : > { %6413 = vmatprep.mubr.bf16.mxu1 %v7078_v52  ;;  %6683 = vmatpush3.bf16.msra.mxu1 %v7139_v21  ;;  %v7080_v52 = vld [vmem:[%s7254_s16 + $0x84] sm:$0xff]   ;;  %v4618_v60 = vsel %vm7532_vm5, %v4616_v28, %v4617_v33  ;;  %v7142_v21 = vld [vmem:[%s7254_s16 + $0x70] sm:$0xf]  ;;  %v5848_v28 = vcombine.low %v8856_v55, %v8861_v49  ;;  %v4700_v19 = vrot.slane %v4698_v39, 4  ;;  %v2436_v24 = vshll.u32 %v7144_v0, 16 }
 0x130   : > { %6676 = vmatprep.subr.bf16.mxu1 %v7141_v10  ;;  %v2388_v48 = vshll.u32 %v7142_v21, 16  ;;  %v2392_v47 = vshrl.u32 %v7142_v21, 16  ;;  %v5837_v6 = vcombine.low %v4615_v1, %v4618_v60  ;;  %v2398_v1 = vshll.u32 %v7143_v56, 16 }
 0x131   : > { %v8883_v11 = vsel %vm7532_vm5, %v4700_v19, %v4701_v23  ;;  %v2440_v21 = vshrl.u32 %v7144_v0, 16  ;;  %v7146_v19 = vld [vmem:[%s7254_s16 + $0xa0] sm:$0xf] }
 0x132   : > { %v8863_v14 = vrot.slane %v2388_v48, 5  ;;  %v2394_v33 = vrot.slane %v2392_v47, 4  ;;  %v2488_v56 = vshrl.u32 %v7146_v19, 16 }
 0x133   : > { %6684 = vmatpush3.bf16.msra.mxu1 %v7141_v10  ;;  %v5833_v10 = vrot.slane %v5817_v51, 9 }
 0x134   : > { %v2395_v31 = vor.u32 %v2394_v33, %v8863_v14  ;;  %v2454_v33 = vshll.u32 %v5579_v61, 16 }
 0x135   : > { %6638 = vmatmul.mubr.bf16.vlgmr.msra.gmra.mrb[0].mxu0 %v5835_v3  ;;  %v7082_v3 = vld [vmem:[%s7254_s16 + $0x9c] sm:$0xff]  }
 0x136   : > { %6414 = vmatmul.mubr.bf16.gmra.mrb[16].mxu1 %v7079_v30  ;;  %6641 = vmatprep.mubr.bf16.mxu0 %v5836_v34  ;;  %v5576_v30 = vld [vmem:[%s7254_s16 + $0x84] sm:$0xf]  ;;  %v8874_v34 = vsel %vm7532_vm5, %v5833_v10, %v4698_v39  ;;  %v2396_v47 = vrot.slane %v2395_v31, 4  ;;  %v7145_v10 = vld [vmem:[%s7254_s16 + $0x94] sm:$0xf]  ;;  %v2456_v0 = vrot.slane %v2454_v33, 5 }
 0x137   : > { %6417 = vmatprep.mubr.bf16.mxu1 %v7080_v52  ;;  %v2385_v52 = vor.u32 %v2384_v26, %v2381_v40  ;;  %v2427_v13 = vshrl.u32 %v5576_v30, 16  ;;  %v2430_v60 = vshll.u32 %v5576_v30, 16  ;;  %v5849_v48 = vcombine.low %v8874_v34, %v8883_v11 }
 0x138   : > { %v8892_v40 = vrot.slane %v2436_v24, 5  ;;  %v2442_v26 = vrot.slane %v2440_v21, 4  ;;  %v2460_v39 = vshll.u32 %v7145_v10, 16  ;;  %v2464_v23 = vshrl.u32 %v7145_v10, 16  ;;  %v7149_v10 = vld [vmem:[%s7254_s16 + $0xa4] sm:$0x1] }
 0x139   : > { %v2386_v36 = vrot.slane %v2385_v52, 4  ;;  %v2429_v12 = vrot.slane %v2427_v13, 4  ;;  %v2432_v51 = vrot.slane %v2430_v60, 5  ;;  %v2484_v52 = vshll.u32 %v7146_v19, 16  ;;  %v7150_v19 = vld [vmem:[%s7254_s16 + $0xac] sm:$0xf] }
 0x13a   : > { %v2443_v13 = vor.u32 %v2442_v26, %v8892_v40  ;;  %v8909_v41 = vrot.slane %v2460_v39, 5  ;;  %v2466_v42 = vrot.slane %v2464_v23, 4  ;;  %v2490_v21 = vrot.slane %v2488_v56, 4  ;;  %v5588_v23 = vld [vmem:[%s7254_s16 + $0xb4] sm:$0xf] }
 0x13b   : > { %v2494_v39 = vshll.u32 %v7149_v10, 16  ;;  %v2512_v15 = vshrl.u32 %v7150_v19, 16  ;;  %v2526_v63 = vshll.u32 %v5588_v23, 16 }
 0x13c   : > { %v2467_v26 = vor.u32 %v2466_v42, %v8909_v41 }
 0x13d   : > { %6642 = vmatmul.mubr.bf16.gmra.mrb[4].mxu0 %v5837_v6  ;;  %v5582_v6 = vld [vmem:[%s7254_s16 + $0x9c] sm:$0xf] }
 0x13e   : > { %6418 = vmatmul.mubr.bf16.gmra.mrb[20].mxu1 %v7081_v18  ;;  %6645 = vmatprep.mubr.bf16.mxu0 %v5838_v8  ;;  %v2400_v8 = vrot.slane %v2398_v1, 5  ;;  %v2451_v18 = vshrl.u32 %v5579_v61, 16  ;;  %v2478_v30 = vshll.u32 %v5582_v6, 16  ;;  %v2391_v1 = vsel %vm7286_vm2, %v2386_v36, %v8863_v14  ;;  %v7085_v61 = vld [vmem:[%s7254_s16 + $0xc0] sm:$0xff]  }
 0x13f   : > { %6421 = vmatprep.mubr.bf16.mxu1 %v7082_v3  ;;  %v2475_v3 = vshrl.u32 %v5582_v6, 16  ;;  %v8911_v14 = vrot.slane %v2484_v52, 5  ;;  %v2508_v52 = vshll.u32 %v7150_v19, 16 }
 0x140   : > { %v2401_v31 = vsel %vm7286_vm2, %v2396_v47, %v2400_v8  ;;  %v2453_v60 = vrot.slane %v2451_v18, 4  ;;  %v2480_v24 = vrot.slane %v2478_v30, 5  ;;  %v2448_v8 = vrot.slane %v2446_v20, 5  ;;  %v7151_v20 = vld [vmem:[%s7254_s16 + $0xb8] sm:$0xf] }
 0x141   : > { %v2444_v47 = vrot.slane %v2443_v13, 4  ;;  %v2491_v33 = vor.u32 %v2490_v21, %v8911_v14  ;;  %v2532_v29 = vshll.u32 %v7151_v20, 16  ;;  %v2536_v44 = vshrl.u32 %v7151_v20, 16 }
 0x143   : > { %v2492_v13 = vrot.slane %v2491_v33, 4 }
 0x145   : > { %6646 = vmatmul.mubr.bf16.gmra.mrb[8].mxu0 %v5839_v54  ;;  %v2433_v54 = vor.u32 %v2432_v51, %v2429_v12  ;;  %v2457_v12 = vor.u32 %v2456_v0, %v2453_v60  ;;  %v7148_v51 = vld [vmem:[%s7254_s16 + $0x98] sm:$0x1]  ;;  %v2496_v60 = vrot.slane %v2494_v39, 5 }
 0x146   : > { %6422 = vmatmul.mubr.bf16.gmra.mrb[24].mxu1 %v7083_v45  ;;  %6649 = vmatprep.mubr.bf16.mxu0 %v5840_v17  ;;  %v2477_v17 = vrot.slane %v2475_v3, 4  ;;  %v5602_v45 = vcombine.low %v2391_v1, %v2401_v31  ;;  %v2470_v6 = vshll.u32 %v7148_v51, 16  ;;  %v2523_v31 = vshrl.u32 %v5588_v23, 16 }
 0x147   : > { %6425 = vmatprep.mubr.bf16.mxu1 %v7084_v9  ;;  %v2434_v36 = vrot.slane %v2433_v54, 4  ;;  %v5585_v9 = vld [vmem:[%s7254_s16 + $0xa8] sm:$0xf]  ;;  %v2458_v56 = vrot.slane %v2457_v12, 4  ;;  %v2497_v32 = vsel %vm7286_vm2, %v2492_v13, %v2496_v60 }
 0x148   : > { %v2481_v18 = vor.u32 %v2480_v24, %v2477_v17  ;;  %v2499_v3 = vshrl.u32 %v5585_v9, 16  ;;  %v2502_v30 = vshll.u32 %v5585_v9, 16  ;;  %v2472_v1 = vrot.slane %v2470_v6, 5 }
 0x149   : > { %v2439_v43 = vsel %vm7286_vm2, %v2434_v36, %v8892_v40  ;;  %v2510_v17 = vrot.slane %v2508_v52, 5  ;;  %v2514_v24 = vrot.slane %v2512_v15, 4  ;;  %v2525_v21 = vrot.slane %v2523_v31, 4  ;;  %v5591_v36 = vld [vmem:[%s7254_s16 + $0xc0] sm:$0xf] }
 0x14a   : > { %v2482_v54 = vrot.slane %v2481_v18, 4  ;;  %v2501_v0 = vrot.slane %v2499_v3, 4  ;;  %v2504_v42 = vrot.slane %v2502_v30, 5  ;;  %v2547_v9 = vshrl.u32 %v5591_v36, 16  ;;  %v7153_v18 = vld [vmem:[%s7254_s16 + $0xc4] sm:$0xf] }
 0x14b   : > { %v2556_v33 = vshll.u32 %v7153_v18, 16 }
 0x14c   : > { %v2487_v51 = vsel %vm7286_vm2, %v2482_v54, %v8911_v14  ;;  %v2505_v5 = vor.u32 %v2504_v42, %v2501_v0  ;;  %v2560_v14 = vshrl.u32 %v7153_v18, 16  ;;  %v2549_v19 = vrot.slane %v2547_v9, 4 }
 0x14d   : > { %6650 = vmatmul.mubr.bf16.gmra.mrb[12].mxu0 %v5841_v38  ;;  %v2449_v38 = vsel %vm7286_vm2, %v2444_v47, %v2448_v8  ;;  %v2538_v8 = vrot.slane %v2536_v44, 4  ;;  %v2463_v47 = vsel %vm7286_vm2, %v2458_v56, %v8909_v41  ;;  %v7152_v41 = vld [vmem:[%s7254_s16 + $0xb0] sm:$0x1]  ;;  %v5606_v58 = vcombine.low %v2487_v51, %v2497_v32  ;;  %v7155_v44 = vld [vmem:[%s7254_s16 + $0xc8] sm:$0x1] }
 0x14e   : > { %6426 = vmatmul.mubr.bf16.gmra.mrb[28].mxu1 %v7085_v61  ;;  %6653 = vmatprep.mubr.bf16.mxu0 %v5842_v35  ;;  %v2468_v35 = vrot.slane %v2467_v26, 4  ;;  %v5604_v40 = vcombine.low %v2439_v43, %v2449_v38  ;;  %v2528_v61 = vrot.slane %v2526_v63, 5  ;;  %v2518_v6 = vshll.u32 %v7152_v41, 16 }
 0x14f   : > { %6461 = vmatprep.mubr.bf16.mxu1 %v5602_v45  ;;  %v2534_v45 = vrot.slane %v2532_v29, 5  ;;  %v2550_v26 = vshll.u32 %v5591_v36, 16  ;;  %v2506_v22 = vrot.slane %v2505_v5, 4  ;;  %v2558_v15 = vrot.slane %v2556_v33, 5 }
 0x150   : > { %v2473_v12 = vsel %vm7286_vm2, %v2468_v35, %v2472_v1  ;;  %v2529_v10 = vor.u32 %v2528_v61, %v2525_v21  ;;  %v2520_v30 = vrot.slane %v2518_v6, 5  ;;  %v2562_v43 = vrot.slane %v2560_v14, 4 }
 0x151   : > { %v2539_v39 = vor.u32 %v2538_v8, %v2534_v45  ;;  %v5605_v3 = vcombine.low %v2463_v47, %v2473_v12  ;;  %v2552_v52 = vrot.slane %v2550_v26, 5  ;;  %v2511_v31 = vsel %vm7286_vm2, %v2506_v22, %v2510_v17  ;;  %v8995_v8 = vld [vmem:[%s9067_s2] ss:$0 sm:$0xff] }
 0x152   : > { %v2530_v38 = vrot.slane %v2529_v10, 4  ;;  %v2563_v29 = vor.u32 %v2562_v43, %v2558_v15  ;;  %v2566_v35 = vshll.u32 %v7155_v44, 16 }
 0x153   : > { %v2540_v56 = vrot.slane %v2539_v39, 4  ;;  %v2553_v20 = vor.u32 %v2552_v52, %v2549_v19 }
 0x154   : > { %v2535_v4 = vsel %vm7286_vm2, %v2530_v38, %v2534_v45  ;;  %v2568_v54 = vrot.slane %v2566_v35, 5 }
 0x155   : > { %6654 = vmatmul.mubr.bf16.gmra.mrb[16].mxu0 %v5843_v62  ;;  %v2515_v62 = vor.u32 %v2514_v24, %v2510_v17  ;;  %v2554_v25 = vrot.slane %v2553_v20, 4 }
 0x156   : > { %6462 = vmatmul.mubr.bf16.vlgmr.msra.gmra.mrb[16].mxu1 %v8734_v50  ;;  %6657 = vmatprep.mubr.bf16.mxu0 %v5844_v59  ;;  %v7154_v50 = vld [vmem:[%s7254_s16 + $0xbc] sm:$0x1] }
 0x157   : > { %6465 = vmatprep.mubr.bf16.mxu1 %v5604_v40  ;;  %v2542_v23 = vshll.u32 %v7154_v50, 16  ;;  %v2516_v59 = vrot.slane %v2515_v62, 4  ;;  %v2559_v13 = vsel %vm7286_vm2, %v2554_v25, %v2558_v15 }
 0x159   : > { %v2544_v1 = vrot.slane %v2542_v23, 5  ;;  %v2521_v63 = vsel %vm7286_vm2, %v2516_v59, %v2520_v30 }
 0x15b   : > { %v2545_v57 = vsel %vm7286_vm2, %v2540_v56, %v2544_v1 }
 0x15c   : > { %v5608_v7 = vcombine.low %v2535_v4, %v2545_v57 }
 0x15d   : > { %6658 = vmatmul.mubr.bf16.gmra.mrb[20].mxu0 %v5845_v53  ;;  %v5607_v53 = vcombine.low %v2511_v31, %v2521_v63 }
 0x15e   : > { %6466 = vmatmul.mubr.bf16.gmra.mrb[20].mxu1 %v5605_v3  ;;  %6661 = vmatprep.mubr.bf16.mxu0 %v5846_v16  ;;  %v2564_v16 = vrot.slane %v2563_v29, 4 }
 0x15f   : > { %6469 = vmatprep.mubr.bf16.mxu1 %v5606_v58 }
 0x160   : > { %v2569_v60 = vsel %vm7286_vm2, %v2564_v16, %v2568_v54 }
 0x161   : > { %v5609_v0 = vcombine.low %v2559_v13, %v2569_v60 }
 0x165   : > { %6662 = vmatmul.mubr.bf16.gmra.mrb[24].mxu0 %v5847_v2 }
 0x166   : > { %6470 = vmatmul.mubr.bf16.gmra.mrb[24].mxu1 %v5607_v53  ;;  %6665 = vmatprep.mubr.bf16.mxu0 %v5848_v28 }
 0x167   : > { %6473 = vmatprep.mubr.bf16.mxu1 %v5608_v7 }
 0x16d   : > { %6666 = vmatmul.mubr.bf16.gmra.mrb[28].mxu0 %v5849_v48 }
 0x16e   : > { %6474 = vmatmul.mubr.bf16.gmra.mrb[28].mxu1 %v5609_v0 }
 0x1e9   : > { %v6399_v27 = vpop.f32.mrb[0].mxu1 }
 0x1ea   : > { %v1979_v46 = vpop.f32.mrb[1].mxu1 }
 0x1eb   : > { %v6400_v2 = vpop.f32.mrb[2].mxu1 }
 0x1ec   : > { %v1982_v42 = vpop.f32.mrb[3].mxu1 }
 0x1f1   : > { %v6403_v17 = vpop.f32.mrb[4].mxu1 }
 0x1f2   : > { %v1995_v55 = vpop.f32.mrb[5].mxu1 }
 0x1f3   : > { %v6404_v49 = vpop.f32.mrb[6].mxu1 }
 0x1f4   : > { %v1998_v28 = vpop.f32.mrb[7].mxu1 }
 0x1f9   : > { %v6407_v24 = vpop.f32.mrb[8].mxu1 }
 0x1fa   : > { %v2011_v40 = vpop.f32.mrb[9].mxu1 }
 0x1fb   : > { %v6408_v21 = vpop.f32.mrb[10].mxu1 }
 0x1fc   : > { %v8982_v61 = vpop.f32.mrb[11].mxu1 }
 0x201   : > { %v8984_v37 = vpop.f32.mrb[12].mxu1 }
 0x202   : > { %v8986_v45 = vpop.f32.mrb[13].mxu1 }
 0x203   : > { %v8988_v34 = vpop.f32.mrb[14].mxu1 }
 0x204   : > { %v8990_v11 = vpop.f32.mrb[15].mxu1 }
 0x208   : > { %v6639_v48 = vpop.f32.mrb[0].mxu0 }
 0x209   : > { %v6685_v36 = vadd.f32 %v6639_v48, %v6399_v27  ;;  %v4865_v47 = vpop.f32.mrb[1].mxu0 }
 0x20a   : > { %v6686_v12 = vadd.f32 %v4865_v47, %v1979_v46  ;;  %v6640_v51 = vpop.f32.mrb[2].mxu0 }
 0x20b   : > { %v5033_v32 = vadd.f32 %v6685_v36, %v8995_v8  ;;  %v6687_v5 = vadd.f32 %v6640_v51, %v6400_v2  ;;  %v4868_v62 = vpop.f32.mrb[3].mxu0 }
 0x20c   : > { %v5031_v41 = vadd.f32 %v6686_v12, %v8995_v8  ;;  %v6688_v6 = vadd.f32 %v4868_v62, %v1982_v42 }
 0x20d   : > { %v5065_v9 = vmul.f32 0.1, %v5033_v32  ;;  %v5034_v26 = vadd.f32 %v6687_v5, %v8995_v8 }
 0x20e   : > { %v5063_v18 = vmul.f32 0.1, %v5031_v41  ;;  %v5032_v33 = vadd.f32 %v6688_v6, %v8995_v8 }
 0x20f   : > { %v5066_v14 = vmul.f32 0.1, %v5034_v26  ;;  %v5097_v50 = vmax.f32 %v5033_v32, %v5065_v9 }
 0x210   : > { %v5064_v10 = vmul.f32 0.1, %v5032_v33  ;;  %v6643_v39 = vpop.f32.mrb[4].mxu0  ;;  %v5095_v22 = vmax.f32 %v5031_v41, %v5063_v18 }
 0x211   : > { %v5098_v23 = vmax.f32 %v5034_v26, %v5066_v14  ;;  %v6689_v3 = vadd.f32 %v6643_v39, %v6403_v17  ;;  %v4881_v58 = vpop.f32.mrb[5].mxu0 }
 0x212   : > { %v5096_v59 = vmax.f32 %v5032_v33, %v5064_v10  ;;  %v6690_v30 = vadd.f32 %v4881_v58, %v1995_v55  ;;  %v6644_v19 = vpop.f32.mrb[6].mxu0 }
 0x213   : > { %v5934_v52 = vpack.c.bf16 %v5098_v23, %v5097_v50  ;;  %v5037_v15 = vadd.f32 %v6689_v3, %v8995_v8  ;;  %v6691_v43 = vadd.f32 %v6644_v19, %v6404_v49  ;;  %v4884_v38 = vpop.f32.mrb[7].mxu0 }
 0x214   : > { %v5929_v56 = vpack.c.bf16 %v5096_v59, %v5095_v22  ;;  %v5035_v1 = vadd.f32 %v6690_v30, %v8995_v8  ;;  %v6692_v31 = vadd.f32 %v4884_v38, %v1998_v28 }
 0x215   : > { %6006 = vst [vmem:[%s9005_s29 + $0x8] sm:$0xff] %v5934_v52   ;;  %v5069_v63 = vmul.f32 0.1, %v5037_v15  ;;  %v5038_v20 = vadd.f32 %v6691_v43, %v8995_v8 }
 0x216   : > { %5930 = vst [vmem:[%s9005_s29] sm:$0xff] %v5929_v56   ;;  %v5067_v29 = vmul.f32 0.1, %v5035_v1  ;;  %v5036_v44 = vadd.f32 %v6692_v31, %v8995_v8 }
 0x217   : > { %v5070_v35 = vmul.f32 0.1, %v5038_v20  ;;  %v5101_v53 = vmax.f32 %v5037_v15, %v5069_v63 }
 0x218   : > { %v5068_v4 = vmul.f32 0.1, %v5036_v44  ;;  %v6647_v57 = vpop.f32.mrb[8].mxu0  ;;  %v5099_v54 = vmax.f32 %v5035_v1, %v5067_v29 }
 0x219   : > { %v5102_v7 = vmax.f32 %v5038_v20, %v5070_v35  ;;  %v6693_v25 = vadd.f32 %v6647_v57, %v6407_v24  ;;  %v4897_v16 = vpop.f32.mrb[9].mxu0 }
 0x21a   : > { %v5100_v13 = vmax.f32 %v5036_v44, %v5068_v4  ;;  %v6694_v60 = vadd.f32 %v4897_v16, %v2011_v40  ;;  %v6648_v0 = vpop.f32.mrb[10].mxu0 }
 0x21b   : > { %v5944_v27 = vpack.c.bf16 %v5102_v7, %v5101_v53  ;;  %v5041_v46 = vadd.f32 %v6693_v25, %v8995_v8  ;;  %v6695_v2 = vadd.f32 %v6648_v0, %v6408_v21  ;;  %v4900_v42 = vpop.f32.mrb[11].mxu0 }
 0x21c   : > { %v5939_v17 = vpack.c.bf16 %v5100_v13, %v5099_v54  ;;  %v5039_v55 = vadd.f32 %v6694_v60, %v8995_v8  ;;  %v6696_v49 = vadd.f32 %v4900_v42, %v8982_v61 }
 0x21d   : > { %6008 = vst [vmem:[%s9005_s29 + $0x18] sm:$0xff] %v5944_v27   ;;  %v5073_v28 = vmul.f32 0.1, %v5041_v46  ;;  %v5042_v24 = vadd.f32 %v6695_v2, %v8995_v8 }
 0x21e   : > { %6007 = vst [vmem:[%s9005_s29 + $0x10] sm:$0xff] %v5939_v17   ;;  %v5071_v48 = vmul.f32 0.1, %v5039_v55  ;;  %v5040_v36 = vadd.f32 %v6696_v49, %v8995_v8 }
 0x21f   : > { %v5074_v40 = vmul.f32 0.1, %v5042_v24  ;;  %v5105_v51 = vmax.f32 %v5041_v46, %v5073_v28 }
 0x220   : > { %v5072_v47 = vmul.f32 0.1, %v5040_v36  ;;  %v6651_v12 = vpop.f32.mrb[12].mxu0  ;;  %v5103_v62 = vmax.f32 %v5039_v55, %v5071_v48 }
 0x221   : > { %v5106_v21 = vmax.f32 %v5042_v24, %v5074_v40  ;;  %v6697_v32 = vadd.f32 %v6651_v12, %v8984_v37  ;;  %v4913_v5 = vpop.f32.mrb[13].mxu0 }
 0x222   : > { %v5104_v61 = vmax.f32 %v5040_v36, %v5072_v47  ;;  %v6698_v41 = vadd.f32 %v4913_v5, %v8986_v45  ;;  %v6652_v6 = vpop.f32.mrb[14].mxu0 }
 0x223   : > { %v5954_v9 = vpack.c.bf16 %v5106_v21, %v5105_v51  ;;  %v5045_v26 = vadd.f32 %v6697_v32, %v8995_v8  ;;  %v6699_v18 = vadd.f32 %v6652_v6, %v8988_v34  ;;  %v4916_v33 = vpop.f32.mrb[15].mxu0 }
 0x224   : > { %v5949_v14 = vpack.c.bf16 %v5104_v61, %v5103_v62  ;;  %v5043_v10 = vadd.f32 %v6698_v41, %v8995_v8  ;;  %v6700_v39 = vadd.f32 %v4916_v33, %v8990_v11 }
 0x225   : > { %6010 = vst [vmem:[%s9005_s29 + $0x28] sm:$0xff] %v5954_v9   ;;  %v5077_v37 = vmul.f32 0.1, %v5045_v26  ;;  %v5046_v50 = vadd.f32 %v6699_v18, %v8995_v8 }
 0x226   : > { %6009 = vst [vmem:[%s9005_s29 + $0x20] sm:$0xff] %v5949_v14   ;;  %v5075_v23 = vmul.f32 0.1, %v5043_v10  ;;  %v5044_v45 = vadd.f32 %v6700_v39, %v8995_v8 }
 0x227   : > { %v5078_v3 = vmul.f32 0.1, %v5046_v50  ;;  %v5109_v59 = vmax.f32 %v5045_v26, %v5077_v37 }
 0x228   : > { %v5076_v58 = vmul.f32 0.1, %v5044_v45  ;;  %v6655_v22 = vpop.f32.mrb[16].mxu0  ;;  %v5107_v52 = vmax.f32 %v5043_v10, %v5075_v23 }
 0x229   : > { %v5110_v30 = vmax.f32 %v5046_v50, %v5078_v3  ;;  %v6463_v34 = vpop.f32.mrb[16].mxu1  ;;  %v4929_v19 = vpop.f32.mrb[17].mxu0 }
 0x22a   : > { %v5108_v15 = vmax.f32 %v5044_v45, %v5076_v58  ;;  %v6701_v11 = vadd.f32 %v6655_v22, %v6463_v34  ;;  %v2796_v43 = vpop.f32.mrb[17].mxu1  ;;  %v6656_v38 = vpop.f32.mrb[18].mxu0 }
 0x22b   : > { %v5964_v56 = vpack.c.bf16 %v5110_v30, %v5109_v59  ;;  %v6702_v1 = vadd.f32 %v4929_v19, %v2796_v43  ;;  %v6464_v31 = vpop.f32.mrb[18].mxu1  ;;  %v4932_v63 = vpop.f32.mrb[19].mxu0 }
 0x22c   : > { %v5959_v20 = vpack.c.bf16 %v5108_v15, %v5107_v52  ;;  %v5049_v29 = vadd.f32 %v6701_v11, %v8995_v8  ;;  %v6703_v44 = vadd.f32 %v6656_v38, %v6464_v31  ;;  %v2799_v35 = vpop.f32.mrb[19].mxu1 }
 0x22d   : > { %6012 = vst [vmem:[%s9005_s29 + $0x38] sm:$0xff] %v5964_v56   ;;  %v5047_v4 = vadd.f32 %v6702_v1, %v8995_v8  ;;  %v6704_v57 = vadd.f32 %v4932_v63, %v2799_v35 }
 0x22e   : > { %6011 = vst [vmem:[%s9005_s29 + $0x30] sm:$0xff] %v5959_v20   ;;  %v5081_v53 = vmul.f32 0.1, %v5049_v29  ;;  %v5050_v7 = vadd.f32 %v6703_v44, %v8995_v8 }
 0x22f   : > { %v5079_v25 = vmul.f32 0.1, %v5047_v4  ;;  %v5048_v16 = vadd.f32 %v6704_v57, %v8995_v8 }
 0x230   : > { %v5082_v54 = vmul.f32 0.1, %v5050_v7  ;;  %v6659_v13 = vpop.f32.mrb[20].mxu0  ;;  %v5113_v46 = vmax.f32 %v5049_v29, %v5081_v53 }
 0x231   : > { %v5080_v60 = vmul.f32 0.1, %v5048_v16  ;;  %v6467_v0 = vpop.f32.mrb[20].mxu1  ;;  %v4945_v27 = vpop.f32.mrb[21].mxu0  ;;  %v5111_v49 = vmax.f32 %v5047_v4, %v5079_v25 }
 0x232   : > { %v5114_v2 = vmax.f32 %v5050_v7, %v5082_v54  ;;  %v6705_v42 = vadd.f32 %v6659_v13, %v6467_v0  ;;  %v2812_v17 = vpop.f32.mrb[21].mxu1  ;;  %v6660_v55 = vpop.f32.mrb[22].mxu0 }
 0x233   : > { %v5112_v28 = vmax.f32 %v5048_v16, %v5080_v60  ;;  %v6706_v24 = vadd.f32 %v4945_v27, %v2812_v17  ;;  %v6468_v48 = vpop.f32.mrb[22].mxu1  ;;  %v4948_v36 = vpop.f32.mrb[23].mxu0 }
 0x234   : > { %v5974_v40 = vpack.c.bf16 %v5114_v2, %v5113_v46  ;;  %v5053_v47 = vadd.f32 %v6705_v42, %v8995_v8  ;;  %v6707_v12 = vadd.f32 %v6660_v55, %v6468_v48  ;;  %v2815_v51 = vpop.f32.mrb[23].mxu1 }
 0x235   : > { %v5969_v21 = vpack.c.bf16 %v5112_v28, %v5111_v49  ;;  %v5051_v32 = vadd.f32 %v6706_v24, %v8995_v8  ;;  %v6708_v5 = vadd.f32 %v4948_v36, %v2815_v51 }
 0x236   : > { %6014 = vst [vmem:[%s9005_s29 + $0x48] sm:$0xff] %v5974_v40   ;;  %v5085_v62 = vmul.f32 0.1, %v5053_v47  ;;  %v5054_v61 = vadd.f32 %v6707_v12, %v8995_v8 }
 0x237   : > { %6013 = vst [vmem:[%s9005_s29 + $0x40] sm:$0xff] %v5969_v21   ;;  %v5083_v41 = vmul.f32 0.1, %v5051_v32  ;;  %v5052_v6 = vadd.f32 %v6708_v5, %v8995_v8 }
 0x238   : > { %v5086_v9 = vmul.f32 0.1, %v5054_v61  ;;  %v6663_v26 = vpop.f32.mrb[24].mxu0  ;;  %v5117_v10 = vmax.f32 %v5053_v47, %v5085_v62 }
 0x239   : > { %v5084_v18 = vmul.f32 0.1, %v5052_v6  ;;  %v6471_v33 = vpop.f32.mrb[24].mxu1  ;;  %v4961_v14 = vpop.f32.mrb[25].mxu0  ;;  %v5115_v45 = vmax.f32 %v5051_v32, %v5083_v41 }
 0x23a   : > { %v5118_v39 = vmax.f32 %v5054_v61, %v5086_v9  ;;  %v6709_v37 = vadd.f32 %v6663_v26, %v6471_v33  ;;  %v2828_v50 = vpop.f32.mrb[25].mxu1  ;;  %v6664_v23 = vpop.f32.mrb[26].mxu0 }
 0x23b   : > { %v5116_v3 = vmax.f32 %v5052_v6, %v5084_v18  ;;  %v6710_v58 = vadd.f32 %v4961_v14, %v2828_v50  ;;  %v6472_v22 = vpop.f32.mrb[26].mxu1  ;;  %v4964_v59 = vpop.f32.mrb[27].mxu0 }
 0x23c   : > { %v5984_v30 = vpack.c.bf16 %v5118_v39, %v5117_v10  ;;  %v5057_v34 = vadd.f32 %v6709_v37, %v8995_v8  ;;  %v6711_v19 = vadd.f32 %v6664_v23, %v6472_v22  ;;  %v2831_v52 = vpop.f32.mrb[27].mxu1 }
 0x23d   : > { %v5979_v15 = vpack.c.bf16 %v5116_v3, %v5115_v45  ;;  %v5055_v11 = vadd.f32 %v6710_v58, %v8995_v8  ;;  %v6712_v43 = vadd.f32 %v4964_v59, %v2831_v52 }
 0x23e   : > { %6016 = vst [vmem:[%s9005_s29 + $0x58] sm:$0xff] %v5984_v30   ;;  %v5089_v38 = vmul.f32 0.1, %v5057_v34  ;;  %v5058_v56 = vadd.f32 %v6711_v19, %v8995_v8 }
 0x23f   : > { %6015 = vst [vmem:[%s9005_s29 + $0x50] sm:$0xff] %v5979_v15   ;;  %v5087_v1 = vmul.f32 0.1, %v5055_v11  ;;  %v5056_v31 = vadd.f32 %v6712_v43, %v8995_v8 }
 0x240   : > { %v5090_v63 = vmul.f32 0.1, %v5058_v56  ;;  %v6667_v20 = vpop.f32.mrb[28].mxu0  ;;  %v5121_v4 = vmax.f32 %v5057_v34, %v5089_v38 }
 0x241   : > { %v5088_v29 = vmul.f32 0.1, %v5056_v31  ;;  %v6475_v44 = vpop.f32.mrb[28].mxu1  ;;  %v4977_v35 = vpop.f32.mrb[29].mxu0  ;;  %v5119_v16 = vmax.f32 %v5055_v11, %v5087_v1 }
 0x242   : > { %v5122_v57 = vmax.f32 %v5058_v56, %v5090_v63  ;;  %v6713_v53 = vadd.f32 %v6667_v20, %v6475_v44  ;;  %v2844_v7 = vpop.f32.mrb[29].mxu1  ;;  %v6668_v25 = vpop.f32.mrb[30].mxu0 }
 0x243   : > { %v5120_v54 = vmax.f32 %v5056_v31, %v5088_v29  ;;  %v6714_v13 = vadd.f32 %v4977_v35, %v2844_v7  ;;  %v6476_v60 = vpop.f32.mrb[30].mxu1  ;;  %v4980_v0 = vpop.f32.mrb[31].mxu0 }
 0x244   : > { %v5994_v27 = vpack.c.bf16 %v5122_v57, %v5121_v4  ;;  %v5061_v46 = vadd.f32 %v6713_v53, %v8995_v8  ;;  %v6715_v2 = vadd.f32 %v6668_v25, %v6476_v60  ;;  %v2847_v42 = vpop.f32.mrb[31].mxu1 }
 0x245   : > { %v5989_v17 = vpack.c.bf16 %v5120_v54, %v5119_v16  ;;  %v5059_v55 = vadd.f32 %v6714_v13, %v8995_v8  ;;  %v6716_v49 = vadd.f32 %v4980_v0, %v2847_v42 }
 0x246   : > { %6018 = vst [vmem:[%s9005_s29 + $0x68] sm:$0xff] %v5994_v27   ;;  %v5093_v28 = vmul.f32 0.1, %v5061_v46  ;;  %v5062_v24 = vadd.f32 %v6715_v2, %v8995_v8 }
 0x247   : > { %6017 = vst [vmem:[%s9005_s29 + $0x60] sm:$0xff] %v5989_v17   ;;  %v5091_v48 = vmul.f32 0.1, %v5059_v55  ;;  %v5060_v36 = vadd.f32 %v6716_v49, %v8995_v8 }
 0x248   : > { %v5094_v40 = vmul.f32 0.1, %v5062_v24  ;;  %v5125_v12 = vmax.f32 %v5061_v46, %v5093_v28 }
 0x249   : > { %v5092_v47 = vmul.f32 0.1, %v5060_v36  ;;  %v5123_v21 = vmax.f32 %v5059_v55, %v5091_v48 }
 0x24a   : > { %v5126_v51 = vmax.f32 %v5062_v24, %v5094_v40 }
 0x24b   : > { %v5124_v32 = vmax.f32 %v5060_v36, %v5092_v47 }
 0x24c   : > { %v6004_v5 = vpack.c.bf16 %v5126_v51, %v5125_v12 }
 0x24d   : > { %v5999_v62 = vpack.c.bf16 %v5124_v32, %v5123_v21 }
 0x24e   : > { %6020 = vst [vmem:[%s9005_s29 + $0x78] sm:$0xff] %v6004_v5  }
 0x24f   : > { %6019 = vst [vmem:[%s9005_s29 + $0x70] sm:$0xff] %v5999_v62  }
 0x250 PF: > { %s13_s14 = sadd.s32 1, %s7178_s14   ;;  %s9135_s12 = smov %s7174_s13 }
 0x251   : > { %p10_p5 = scmp.ge.s32.totalorder %s13_s14, 4   ;;  %s9136_s13 = smov %s9138_s15 }
 0x253   :  { %12 = sbr.rel (!%p10_p5) target bundleno = 2 (0x2), region = 70 }

</bundles_post_ra>
